<compile_context>
chip_gen: v6e
topology: v6e:2x2x1
jax: 0.10.0
libtpu: 0.0.40
codegen_flags: <defaults>
</compile_context>

<pallas_src>
import jax
import jax.numpy as jnp
import numpy as np
from jax.experimental import pallas as pl
from jax.experimental.pallas import tpu as pltpu

# Model dims implied by the PyTorch module (fc1 = Linear(64*64, 100) => L == 64)
C_IN = 14
C1 = 32
C2 = 64
C3 = 64
SEQ_LEN = 64            # L
HID = 100
OUT = 2

# lane-dense padded dims used inside the kernel
C3P = 128               # conv3 output channels padded 64 -> 128 (zeros)
HIDP = 128              # fc1 hidden padded 100 -> 128 (zeros)

COMPUTE_DTYPE = jnp.bfloat16   # matmul-input dtype (accumulation stays f32)


# ----------------------------------------------------------------------------
# Fused kernel: one grid step processes TB batch elements.
# Activation layout inside the kernel: (TB*L, C) — sequence on sublanes,
# channels on lanes — so every conv becomes a plain matmul on the MXU.
# ----------------------------------------------------------------------------
def fused_forward_kernel(x_ref, w1_ref, b1_ref, w2_ref, b2_ref, w3_ref, b3_ref,
                         wfc1_ref, bfc1_ref, wfc2_ref, bfc2_ref, o_ref):
    TB, L, CIN = x_ref.shape
    M = TB * L
    cdt = w1_ref.dtype                                    # bf16 compute dtype

    x = x_ref[...].reshape(M, CIN).astype(cdt)            # fold batch into M

    # conv1 (k=1) + ReLU : (M, 14) @ (14, 32)
    h1 = jnp.dot(x, w1_ref[...], preferred_element_type=jnp.float32) + b1_ref[...]
    h1 = jnp.maximum(h1, 0.0)

    # conv2 (k=1) + ReLU : (M, 32) @ (32, 64)
    h2 = jnp.dot(h1.astype(cdt), w2_ref[...],
                 preferred_element_type=jnp.float32) + b2_ref[...]
    h2 = jnp.maximum(h2, 0.0)                             # (M, 64)

    # conv3 (k=3, padding=1) + ReLU as ONE K=192 matmul.
    # Build shifted neighbours; zero them at sequence boundaries so shifts do
    # not leak across batch elements packed into the M axis.
    zero_row = jnp.zeros((1, C2), dtype=h2.dtype)
    prev = jnp.concatenate([zero_row, h2[:-1, :]], axis=0)    # x_{l-1}
    nxt = jnp.concatenate([h2[1:, :], zero_row], axis=0)      # x_{l+1}
    l_idx = jax.lax.broadcasted_iota(jnp.int32, (M, C2), 0) % L
    prev = jnp.where(l_idx == 0, 0.0, prev)
    nxt = jnp.where(l_idx == L - 1, 0.0, nxt)
    cat = jnp.concatenate([prev, h2, nxt], axis=1).astype(cdt)   # (M, 192)
    h3 = jnp.dot(cat, w3_ref[...], preferred_element_type=jnp.float32) + b3_ref[...]
    h3 = jnp.maximum(h3, 0.0)                             # (M, 128); cols >=64 are 0

    # Flatten: row-major over (L, C3P).  wfc1 rows were pre-permuted (and zero
    # padded) host-side to exactly this l*C3P + c order, so no transpose here.
    flat = h3.reshape(TB, L * C3P).astype(cdt)            # (TB, 8192)

    # fc1 + ReLU : (TB, 8192) @ (8192, 128)
    h4 = jnp.dot(flat, wfc1_ref[...],
                 preferred_element_type=jnp.float32) + bfc1_ref[...]
    h4 = jnp.maximum(h4, 0.0)                             # (TB, 128)

    # fc2 : (TB, 128) @ (128, 2)
    out = jnp.dot(h4.astype(cdt), wfc2_ref[...],
                  preferred_element_type=jnp.float32) + bfc2_ref[...]
    o_ref[...] = out.astype(o_ref.dtype)


# ----------------------------------------------------------------------------
# Wrapper
# ----------------------------------------------------------------------------
@jax.jit
def model_forward(x_enc, window_features, kparams):
    del window_features                 # unused by the PyTorch forward as well
    (w1k, b1k, w2k, b2k, w3k, b3k, wfc1k, bfc1k, wfc2k, bfc2k) = kparams
    B, L, CIN = x_enc.shape

    # batch tile: M = TB*L fills the MXU rows; TB=2 -> M=128 for the B=2 test.
    TB = 4 if B % 4 == 0 else (2 if B % 2 == 0 else 1)
    grid = (B // TB,)

    def full_spec(arr):
        return pl.BlockSpec(arr.shape, lambda i, n=arr.ndim: (0,) * n)

    return pl.pallas_call(
        fused_forward_kernel,
        out_shape=jax.ShapeDtypeStruct((B, OUT), jnp.float32),
        grid=grid,
        in_specs=[
            pl.BlockSpec((TB, L, CIN), lambda i: (i, 0, 0)),
            full_spec(w1k), full_spec(b1k),
            full_spec(w2k), full_spec(b2k),
            full_spec(w3k), full_spec(b3k),
            full_spec(wfc1k), full_spec(bfc1k),
            full_spec(wfc2k), full_spec(bfc2k),
        ],
        out_specs=pl.BlockSpec((TB, OUT), lambda i: (i, 0)),
        compiler_params=pltpu.CompilerParams(
            dimension_semantics=("parallel",)),
    )(x_enc, w1k, b1k, w2k, b2k, w3k, b3k, wfc1k, bfc1k, wfc2k, bfc2k)


# ----------------------------------------------------------------------------
# Parameter construction: torch-layout params -> kernel-layout params
# ----------------------------------------------------------------------------
def init_torch_params(key):
    ks = jax.random.split(key, 10)
    s = 0.05
    conv1_w = jax.random.normal(ks[0], (C1, C_IN, 1), jnp.float32) * s
    conv1_b = jax.random.normal(ks[1], (C1,), jnp.float32) * s
    conv2_w = jax.random.normal(ks[2], (C2, C1, 1), jnp.float32) * s
    conv2_b = jax.random.normal(ks[3], (C2,), jnp.float32) * s
    conv3_w = jax.random.normal(ks[4], (C3, C2, 3), jnp.float32) * s
    conv3_b = jax.random.normal(ks[5], (C3,), jnp.float32) * s
    fc1_w = jax.random.normal(ks[6], (HID, C3 * SEQ_LEN), jnp.float32) * s
    fc1_b = jax.random.normal(ks[7], (HID,), jnp.float32) * s
    fc2_w = jax.random.normal(ks[8], (OUT, HID), jnp.float32) * s
    fc2_b = jax.random.normal(ks[9], (OUT,), jnp.float32) * s
    return (conv1_w, conv1_b, conv2_w, conv2_b, conv3_w, conv3_b,
            fc1_w, fc1_b, fc2_w, fc2_b)


def prepare_params(tp, compute_dtype=COMPUTE_DTYPE):
    (w1, b1, w2, b2, w3, b3, fw1, fb1, fw2, fb2) = tp
    # conv weights transposed for the (L, C) activation layout
    w1k = w1[:, :, 0].T.astype(compute_dtype)                       # (14, 32)
    b1k = b1.reshape(1, C1).astype(jnp.float32)
    w2k = w2[:, :, 0].T.astype(compute_dtype)                       # (32, 64)
    b2k = b2.reshape(1, C2).astype(jnp.float32)
    # conv3 taps stacked along K -> single (192, 128) matrix (out chans padded)
    w3cat = jnp.concatenate(
        [w3[:, :, 0].T, w3[:, :, 1].T, w3[:, :, 2].T], axis=0)      # (192, 64)
    w3k = jnp.pad(w3cat, ((0, 0), (0, C3P - C3))).astype(compute_dtype)
    b3k = jnp.pad(b3, (0, C3P - C3)).reshape(1, C3P).astype(jnp.float32)
    # fc1: torch flat index is c*L + l; kernel flat index is l*C3P + c.
    wf1 = fw1.reshape(HID, C3, SEQ_LEN)                             # [h, c, l]
    wf1 = jnp.transpose(wf1, (2, 1, 0))                             # [l, c, h]
    wf1 = jnp.pad(wf1, ((0, 0), (0, C3P - C3), (0, HIDP - HID)))
    wfc1k = wf1.reshape(SEQ_LEN * C3P, HIDP).astype(compute_dtype)  # (8192, 128)
    bfc1k = jnp.pad(fb1, (0, HIDP - HID)).reshape(1, HIDP).astype(jnp.float32)
    wfc2k = jnp.pad(fw2, ((0, 0), (0, HIDP - HID))).T.astype(compute_dtype)  # (128, 2)
    bfc2k = fb2.reshape(1, OUT).astype(jnp.float32)
    return (w1k, b1k, w2k, b2k, w3k, b3k, wfc1k, bfc1k, wfc2k, bfc2k)


# ----------------------------------------------------------------------------
# Pure-JAX float32 reference (mirrors the PyTorch forward exactly)
# ----------------------------------------------------------------------------
def reference_forward(x_enc, tp):
    (w1, b1, w2, b2, w3, b3, fw1, fb1, fw2, fb2) = tp
    B, L, _ = x_enc.shape
    h1 = jax.nn.relu(x_enc @ w1[:, :, 0].T + b1)                    # (B, L, 32)
    h2 = jax.nn.relu(h1 @ w2[:, :, 0].T + b2)                       # (B, L, 64)
    h2p = jnp.pad(h2, ((0, 0), (1, 1), (0, 0)))
    h3 = jax.nn.relu(h2p[:, 0:L] @ w3[:, :, 0].T
                     + h2p[:, 1:L + 1] @ w3[:, :, 1].T
                     + h2p[:, 2:L + 2] @ w3[:, :, 2].T + b3)        # (B, L, 64)
    flat = jnp.transpose(h3, (0, 2, 1)).reshape(B, C3 * L)          # torch flatten
    f1 = jax.nn.relu(flat @ fw1.T + fb1)
    return f1 @ fw2.T + fb2


if __name__ == "__main__":
    key = jax.random.PRNGKey(0)
    k_x, k_w, k_p = jax.random.split(key, 3)

    B = 2
    x_enc = jax.random.normal(k_x, (B, SEQ_LEN, C_IN), jnp.float32)
    window_features = jax.random.normal(k_w, (B, 8), jnp.float32)   # unused (as in torch)

    torch_params = init_torch_params(k_p)
    kparams = prepare_params(torch_params)

    out = model_forward(x_enc, window_features, kparams)
    out = jax.block_until_ready(out)

    ref = reference_forward(x_enc, torch_params)
    # tolerance accounts for bf16 matmul inputs (f32 accumulation)
    np.testing.assert_allclose(np.asarray(out), np.asarray(ref),
                               rtol=3e-2, atol=3e-2)
    assert out.shape == (B, OUT)
    print("KERNEL_OK")
</pallas_src>

<mosaic_0001>
module attributes {stable_mosaic.version = 11 : i64} {
  func.func @fused_forward_kernel(%arg0: i32, %arg1: memref<2x64x14xf32, #tpu.memory_space<vmem>>, %arg2: memref<14x32xbf16, #tpu.memory_space<vmem>>, %arg3: memref<1x32xf32, #tpu.memory_space<vmem>>, %arg4: memref<32x64xbf16, #tpu.memory_space<vmem>>, %arg5: memref<1x64xf32, #tpu.memory_space<vmem>>, %arg6: memref<192x128xbf16, #tpu.memory_space<vmem>>, %arg7: memref<1x128xf32, #tpu.memory_space<vmem>>, %arg8: memref<8192x128xbf16, #tpu.memory_space<vmem>>, %arg9: memref<1x128xf32, #tpu.memory_space<vmem>>, %arg10: memref<128x2xbf16, #tpu.memory_space<vmem>>, %arg11: memref<1x2xf32, #tpu.memory_space<vmem>>, %arg12: memref<2x2xf32, #tpu.memory_space<vmem>>) attributes {dimension_semantics = [#tpu.dimension_semantics<parallel>], iteration_bounds = array<i64: 1>, scalar_prefetch = 0 : i64, scratch_operands = 0 : i64, tpu.core_type = #tpu.core_type<tc>, window_params = [{transform_indices = @transform_0, window_bounds = array<i64: 2, 64, 14>}, {pipeline_mode = #tpu.pipeline_mode<synchronous>, transform_indices = @transform_1, window_bounds = array<i64: 14, 32>}, {pipeline_mode = #tpu.pipeline_mode<synchronous>, transform_indices = @transform_2, window_bounds = array<i64: 1, 32>}, {pipeline_mode = #tpu.pipeline_mode<synchronous>, transform_indices = @transform_3, window_bounds = array<i64: 32, 64>}, {pipeline_mode = #tpu.pipeline_mode<synchronous>, transform_indices = @transform_4, window_bounds = array<i64: 1, 64>}, {pipeline_mode = #tpu.pipeline_mode<synchronous>, transform_indices = @transform_5, window_bounds = array<i64: 192, 128>}, {pipeline_mode = #tpu.pipeline_mode<synchronous>, transform_indices = @transform_6, window_bounds = array<i64: 1, 128>}, {pipeline_mode = #tpu.pipeline_mode<synchronous>, transform_indices = @transform_7, window_bounds = array<i64: 8192, 128>}, {pipeline_mode = #tpu.pipeline_mode<synchronous>, transform_indices = @transform_8, window_bounds = array<i64: 1, 128>}, {pipeline_mode = #tpu.pipeline_mode<synchronous>, transform_indices = @transform_9, window_bounds = array<i64: 128, 2>}, {pipeline_mode = #tpu.pipeline_mode<synchronous>, transform_indices = @transform_10, window_bounds = array<i64: 1, 2>}, {transform_indices = @transform_11, window_bounds = array<i64: 2, 2>}]} {
    %c0 = arith.constant 0 : index
    %c0_0 = arith.constant 0 : index
    %c0_1 = arith.constant 0 : index
    %0 = vector.load %arg1[%c0, %c0_0, %c0_1] : memref<2x64x14xf32, #tpu.memory_space<vmem>>, vector<2x64x14xf32>
    %1 = vector.shape_cast %0 : vector<2x64x14xf32> to vector<128x14xf32>
    %2 = arith.truncf %1 : vector<128x14xf32> to vector<128x14xbf16>
    %c0_2 = arith.constant 0 : index
    %c0_3 = arith.constant 0 : index
    %3 = vector.load %arg2[%c0_2, %c0_3] : memref<14x32xbf16, #tpu.memory_space<vmem>>, vector<14x32xbf16>
    %cst = arith.constant dense<0.000000e+00> : vector<128x32xf32>
    %4 = tpu.matmul %2, %3, %cst {dimension_numbers = #tpu.dot_dimension_numbers<[1], [0], [0], [1], [0, 0, 1, 1], [], []>} : vector<128x14xbf16>, vector<14x32xbf16>, vector<128x32xf32> -> vector<128x32xf32>
    %c0_4 = arith.constant 0 : index
    %c0_5 = arith.constant 0 : index
    %5 = vector.load %arg3[%c0_4, %c0_5] : memref<1x32xf32, #tpu.memory_space<vmem>>, vector<1x32xf32>
    %6 = vector.broadcast %5 : vector<1x32xf32> to vector<128x32xf32>
    %7 = arith.addf %4, %6 : vector<128x32xf32>
    %cst_6 = arith.constant 0.000000e+00 : f32
    %8 = vector.broadcast %cst_6 : f32 to vector<128x32xf32>
    %9 = arith.maximumf %7, %8 : vector<128x32xf32>
    %10 = arith.truncf %9 : vector<128x32xf32> to vector<128x32xbf16>
    %c0_7 = arith.constant 0 : index
    %c0_8 = arith.constant 0 : index
    %11 = vector.load %arg4[%c0_7, %c0_8] : memref<32x64xbf16, #tpu.memory_space<vmem>>, vector<32x64xbf16>
    %cst_9 = arith.constant dense<0.000000e+00> : vector<128x64xf32>
    %12 = tpu.matmul %10, %11, %cst_9 {dimension_numbers = #tpu.dot_dimension_numbers<[1], [0], [0], [1], [0, 0, 1, 1], [], []>} : vector<128x32xbf16>, vector<32x64xbf16>, vector<128x64xf32> -> vector<128x64xf32>
    %c0_10 = arith.constant 0 : index
    %c0_11 = arith.constant 0 : index
    %13 = vector.load %arg5[%c0_10, %c0_11] : memref<1x64xf32, #tpu.memory_space<vmem>>, vector<1x64xf32>
    %14 = vector.broadcast %13 : vector<1x64xf32> to vector<128x64xf32>
    %15 = arith.addf %12, %14 : vector<128x64xf32>
    %cst_12 = arith.constant 0.000000e+00 : f32
    %16 = vector.broadcast %cst_12 : f32 to vector<128x64xf32>
    %17 = arith.maximumf %15, %16 : vector<128x64xf32>
    %cst_13 = arith.constant 0.000000e+00 : f32
    %18 = vector.broadcast %cst_13 : f32 to vector<1x64xf32>
    %19 = vector.extract_strided_slice %17 {offsets = [0, 0], sizes = [127, 64], strides = [1, 1]} : vector<128x64xf32> to vector<127x64xf32>
    %20 = tpu.concatenate %18, %19 in 0 : vector<1x64xf32>, vector<127x64xf32> -> vector<128x64xf32>
    %21 = vector.extract_strided_slice %17 {offsets = [1, 0], sizes = [127, 64], strides = [1, 1]} : vector<128x64xf32> to vector<127x64xf32>
    %22 = tpu.concatenate %21, %18 in 0 : vector<127x64xf32>, vector<1x64xf32> -> vector<128x64xf32>
    %23 = tpu.iota {dimensions = array<i32: 0>} : vector<128x64xi32>
    %c64_i32 = arith.constant 64 : i32
    %c0_i32 = arith.constant 0 : i32
    %24 = arith.cmpi eq, %c64_i32, %c0_i32 : i32
    %c1_i32 = arith.constant 1 : i32
    %25 = arith.select %24, %c1_i32, %c64_i32 : i32
    %26 = vector.broadcast %25 : i32 to vector<128x64xi32>
    %27 = arith.remsi %23, %26 : vector<128x64xi32>
    %c0_i32_14 = arith.constant 0 : i32
    %28 = vector.broadcast %c0_i32_14 : i32 to vector<128x64xi32>
    %29 = arith.cmpi ne, %27, %28 : vector<128x64xi32>
    %c0_i32_15 = arith.constant 0 : i32
    %30 = vector.broadcast %c0_i32_15 : i32 to vector<128x64xi32>
    %31 = arith.cmpi slt, %27, %30 : vector<128x64xi32>
    %c0_i32_16 = arith.constant 0 : i32
    %32 = arith.cmpi slt, %25, %c0_i32_16 : i32
    %33 = vector.broadcast %32 : i1 to vector<128x64xi1>
    %34 = vector.broadcast %33 : vector<128x64xi1> to vector<128x64xi1>
    %35 = arith.xori %31, %34 : vector<128x64xi1>
    %36 = arith.andi %35, %29 : vector<128x64xi1>
    %37 = vector.broadcast %25 : i32 to vector<128x64xi32>
    %38 = arith.addi %27, %37 : vector<128x64xi32>
    %39 = arith.select %36, %38, %27 : vector<128x64xi1>, vector<128x64xi32>
    %c0_i32_17 = arith.constant 0 : i32
    %40 = vector.broadcast %c0_i32_17 : i32 to vector<128x64xi32>
    %41 = arith.cmpi eq, %39, %40 : vector<128x64xi32>
    %cst_18 = arith.constant 0.000000e+00 : f32
    %42 = vector.broadcast %cst_18 : f32 to vector<128x64xf32>
    %43 = arith.select %41, %42, %20 : vector<128x64xi1>, vector<128x64xf32>
    %c63_i32 = arith.constant 63 : i32
    %44 = vector.broadcast %c63_i32 : i32 to vector<128x64xi32>
    %45 = arith.cmpi eq, %39, %44 : vector<128x64xi32>
    %cst_19 = arith.constant 0.000000e+00 : f32
    %46 = vector.broadcast %cst_19 : f32 to vector<128x64xf32>
    %47 = arith.select %45, %46, %22 : vector<128x64xi1>, vector<128x64xf32>
    %48 = tpu.concatenate %43, %17, %47 in 1 : vector<128x64xf32>, vector<128x64xf32>, vector<128x64xf32> -> vector<128x192xf32>
    %49 = arith.truncf %48 : vector<128x192xf32> to vector<128x192xbf16>
    %c0_20 = arith.constant 0 : index
    %c0_21 = arith.constant 0 : index
    %50 = vector.load %arg6[%c0_20, %c0_21] : memref<192x128xbf16, #tpu.memory_space<vmem>>, vector<192x128xbf16>
    %cst_22 = arith.constant dense<0.000000e+00> : vector<128x128xf32>
    %51 = tpu.matmul %49, %50, %cst_22 {dimension_numbers = #tpu.dot_dimension_numbers<[1], [0], [0], [1], [0, 0, 1, 1], [], []>} : vector<128x192xbf16>, vector<192x128xbf16>, vector<128x128xf32> -> vector<128x128xf32>
    %c0_23 = arith.constant 0 : index
    %c0_24 = arith.constant 0 : index
    %52 = vector.load %arg7[%c0_23, %c0_24] : memref<1x128xf32, #tpu.memory_space<vmem>>, vector<1x128xf32>
    %53 = vector.broadcast %52 : vector<1x128xf32> to vector<128x128xf32>
    %54 = arith.addf %51, %53 : vector<128x128xf32>
    %cst_25 = arith.constant 0.000000e+00 : f32
    %55 = vector.broadcast %cst_25 : f32 to vector<128x128xf32>
    %56 = arith.maximumf %54, %55 : vector<128x128xf32>
    %57 = vector.shape_cast %56 : vector<128x128xf32> to vector<2x8192xf32>
    %58 = arith.truncf %57 : vector<2x8192xf32> to vector<2x8192xbf16>
    %c0_26 = arith.constant 0 : index
    %c0_27 = arith.constant 0 : index
    %59 = vector.load %arg8[%c0_26, %c0_27] : memref<8192x128xbf16, #tpu.memory_space<vmem>>, vector<8192x128xbf16>
    %cst_28 = arith.constant dense<0.000000e+00> : vector<2x128xf32>
    %60 = tpu.matmul %58, %59, %cst_28 {dimension_numbers = #tpu.dot_dimension_numbers<[1], [0], [0], [1], [0, 0, 1, 1], [], []>} : vector<2x8192xbf16>, vector<8192x128xbf16>, vector<2x128xf32> -> vector<2x128xf32>
    %c0_29 = arith.constant 0 : index
    %c0_30 = arith.constant 0 : index
    %61 = vector.load %arg9[%c0_29, %c0_30] : memref<1x128xf32, #tpu.memory_space<vmem>>, vector<1x128xf32>
    %62 = vector.broadcast %61 : vector<1x128xf32> to vector<2x128xf32>
    %63 = arith.addf %60, %62 : vector<2x128xf32>
    %cst_31 = arith.constant 0.000000e+00 : f32
    %64 = vector.broadcast %cst_31 : f32 to vector<2x128xf32>
    %65 = arith.maximumf %63, %64 : vector<2x128xf32>
    %66 = arith.truncf %65 : vector<2x128xf32> to vector<2x128xbf16>
    %c0_32 = arith.constant 0 : index
    %c0_33 = arith.constant 0 : index
    %67 = vector.load %arg10[%c0_32, %c0_33] : memref<128x2xbf16, #tpu.memory_space<vmem>>, vector<128x2xbf16>
    %cst_34 = arith.constant dense<0.000000e+00> : vector<2x2xf32>
    %68 = tpu.matmul %66, %67, %cst_34 {dimension_numbers = #tpu.dot_dimension_numbers<[1], [0], [0], [1], [0, 0, 1, 1], [], []>} : vector<2x128xbf16>, vector<128x2xbf16>, vector<2x2xf32> -> vector<2x2xf32>
    %c0_35 = arith.constant 0 : index
    %c0_36 = arith.constant 0 : index
    %69 = vector.load %arg11[%c0_35, %c0_36] : memref<1x2xf32, #tpu.memory_space<vmem>>, vector<1x2xf32>
    %70 = vector.broadcast %69 : vector<1x2xf32> to vector<2x2xf32>
    %71 = arith.addf %68, %70 : vector<2x2xf32>
    %c0_37 = arith.constant 0 : index
    %c0_38 = arith.constant 0 : index
    %72 = vector.load %arg12[%c0_37, %c0_38] : memref<2x2xf32, #tpu.memory_space<vmem>>, vector<2x2xf32>
    tpu.vector_store %arg12[%c0_37, %c0_38], %71 {strides = array<i32>} : memref<2x2xf32, #tpu.memory_space<vmem>>, vector<2x2xf32>,
    return
  }
  func.func @transform_0(%arg0: i32) -> (i32, i32, i32) {
    %c0_i32 = arith.constant 0 : i32
    %c0_i32_0 = arith.constant 0 : i32
    %c0_i32_1 = arith.constant 0 : i32
    return %arg0, %c0_i32, %c0_i32_0 : i32, i32, i32
  }
  func.func @transform_1(%arg0: i32) -> (i32, i32) {
    %c0_i32 = arith.constant 0 : i32
    %c0_i32_0 = arith.constant 0 : i32
    %c0_i32_1 = arith.constant 0 : i32
    return %c0_i32, %c0_i32_0 : i32, i32
  }
  func.func @transform_2(%arg0: i32) -> (i32, i32) {
    %c0_i32 = arith.constant 0 : i32
    %c0_i32_0 = arith.constant 0 : i32
    %c0_i32_1 = arith.constant 0 : i32
    return %c0_i32, %c0_i32_0 : i32, i32
  }
  func.func @transform_3(%arg0: i32) -> (i32, i32) {
    %c0_i32 = arith.constant 0 : i32
    %c0_i32_0 = arith.constant 0 : i32
    %c0_i32_1 = arith.constant 0 : i32
    return %c0_i32, %c0_i32_0 : i32, i32
  }
  func.func @transform_4(%arg0: i32) -> (i32, i32) {
    %c0_i32 = arith.constant 0 : i32
    %c0_i32_0 = arith.constant 0 : i32
    %c0_i32_1 = arith.constant 0 : i32
    return %c0_i32, %c0_i32_0 : i32, i32
  }
  func.func @transform_5(%arg0: i32) -> (i32, i32) {
    %c0_i32 = arith.constant 0 : i32
    %c0_i32_0 = arith.constant 0 : i32
    %c0_i32_1 = arith.constant 0 : i32
    return %c0_i32, %c0_i32_0 : i32, i32
  }
  func.func @transform_6(%arg0: i32) -> (i32, i32) {
    %c0_i32 = arith.constant 0 : i32
    %c0_i32_0 = arith.constant 0 : i32
    %c0_i32_1 = arith.constant 0 : i32
    return %c0_i32, %c0_i32_0 : i32, i32
  }
  func.func @transform_7(%arg0: i32) -> (i32, i32) {
    %c0_i32 = arith.constant 0 : i32
    %c0_i32_0 = arith.constant 0 : i32
    %c0_i32_1 = arith.constant 0 : i32
    return %c0_i32, %c0_i32_0 : i32, i32
  }
  func.func @transform_8(%arg0: i32) -> (i32, i32) {
    %c0_i32 = arith.constant 0 : i32
    %c0_i32_0 = arith.constant 0 : i32
    %c0_i32_1 = arith.constant 0 : i32
    return %c0_i32, %c0_i32_0 : i32, i32
  }
  func.func @transform_9(%arg0: i32) -> (i32, i32) {
    %c0_i32 = arith.constant 0 : i32
    %c0_i32_0 = arith.constant 0 : i32
    %c0_i32_1 = arith.constant 0 : i32
    return %c0_i32, %c0_i32_0 : i32, i32
  }
  func.func @transform_10(%arg0: i32) -> (i32, i32) {
    %c0_i32 = arith.constant 0 : i32
    %c0_i32_0 = arith.constant 0 : i32
    %c0_i32_1 = arith.constant 0 : i32
    return %c0_i32, %c0_i32_0 : i32, i32
  }
  func.func @transform_11(%arg0: i32) -> (i32, i32) {
    %c0_i32 = arith.constant 0 : i32
    %c0_i32_0 = arith.constant 0 : i32
    return %arg0, %c0_i32 : i32, i32
  }
}

</mosaic_0001>

<bundles_post_ra>
// kernel: model_forward.1
= control target key start
LH: loop header
LB: loop body
LE: loop exit
PB: predicated region body
PF: predicated region fallthrough
CT: control target
= control target key end

     0   :  { %16 = vsyncpa [#allocation3], 0  ;;  %s10242_s0 = inlined_call_operand.vmem [shape: f32[2,64,14], index: 0, kind: input, shape index: {}]   ;;  %s10243_s1 = inlined_call_operand.hbm [shape: bf16[14,32], index: 1, kind: input, shape index: {}]   ;;  %s10244_s2 = inlined_call_operand.hbm [shape: f32[1,32], index: 2, kind: input, shape index: {}]   ;;  %s10245_s3 = inlined_call_operand.hbm [shape: bf16[32,64], index: 3, kind: input, shape index: {}]   ;;  %s10246_s4 = inlined_call_operand.hbm [shape: f32[1,64], index: 4, kind: input, shape index: {}]   ;;  %s10247_s5 = inlined_call_operand.hbm [shape: bf16[192,128], index: 5, kind: input, shape index: {}]   ;;  %s10248_s6 = inlined_call_operand.hbm [shape: f32[1,128], index: 6, kind: input, shape index: {}]   ;;  %s10249_s7 = inlined_call_operand.hbm [shape: bf16[8192,128], index: 7, kind: input, shape index: {}]   ;;  %s10250_s8 = inlined_call_operand.hbm [shape: f32[1,128], index: 8, kind: input, shape index: {}]   ;;  %s10251_s9 = inlined_call_operand.vmem [shape: bf16[128,2], index: 9, kind: input, shape index: {}]   ;;  %s10252_s10 = inlined_call_operand.hbm [shape: f32[1,2], index: 10, kind: input, shape index: {}]   ;;  %s10253_s11 = inlined_call_operand.hbm [shape: f32[2,2], index: 11, kind: output, shape index: {}]  }
   0x1   :  { %17 = vsyncpa [#allocation6], 0 }
   0x2   :  { %18 = vsyncpa [#allocation9], 0 }
   0x3   :  { %19 = vsyncpa [#allocation12], 0 }
   0x4   :  { %20 = vsyncpa [#allocation15], 0 }
   0x5   :  { %21 = vsyncpa [#allocation4], 0  ;;  %s9427_s17 = smov [#allocation5]   ;;  %s9428_s19 = smov [#allocation8]  }
   0x6   :  { %s42_s18 = sshll.u32 %s9427_s17, 4  ;;  %s64_s20 = sshll.u32 %s9428_s19, 4  ;;  %s43_s18 = int_to_ptr.vmem [resolvable:$true] %s42_s18  ;;  %s65_s20 = int_to_ptr.vmem [resolvable:$true] %s64_s20 }
   0x7   :  { %s9223_s21 = scalar_lea.vmem %s43_s18, 16  ;;  %s9227_s22 = scalar_lea.vmem %s43_s18, 32 }
   0x8   :  { %p9224_p0 = scmp.ne.s32.totalorder %s43_s18, %s9223_s21  ;;  %p9228_p1 = scmp.lt.s32.totalorder %s43_s18, %s43_s18 }
   0x9   :  { %p9229_p2 = scmp.lt.s32.totalorder %s9227_s22, %s9223_s21 }
   0xb   :  { %p9230_p3 = por %p9229_p2, %p9228_p1 }
   0xd   :  { %p9231_p4 = pnand %p9230_p3, %p9224_p0 }
   0xf   :  { %9234 = shalt.err (!%p9231_p4)
}
  0x10   :  { %45 = dma.hbm_to_vmem [thread:$0]  %s10244_s2, 16, %s43_s18, [#allocation6]  }
  0x11   :  { %s9243_s25 = scalar_lea.vmem %s65_s20, 16  ;;  %s9247_s26 = scalar_lea.vmem %s65_s20, 32 }
  0x12   :  { %p9244_p5 = scmp.ne.s32.totalorder %s65_s20, %s9243_s25  ;;  %p9248_p6 = scmp.lt.s32.totalorder %s65_s20, %s65_s20 }
  0x13   :  { %p9249_p7 = scmp.lt.s32.totalorder %s9247_s26, %s9243_s25 }
  0x15   :  { %p9250_p8 = por %p9249_p7, %p9248_p6 }
  0x17   :  { %p9251_p9 = pnand %p9250_p8, %p9244_p5 }
  0x19   :  { %9254 = shalt.err (!%p9251_p9)
}
  0x1a   :  { %67 = dma.hbm_to_vmem [thread:$0]  %s10246_s4, 16, %s65_s20, [#allocation9]  }
  0x1b   :  { %s9429_s29 = smov [#allocation11]   ;;  %s9430_s12 = smov [#allocation14]  }
  0x1c   :  { %s86_s30 = sshll.u32 %s9429_s29, 4  ;;  %s108_s13 = sshll.u32 %s9430_s12, 4  ;;  %s87_s30 = int_to_ptr.vmem [resolvable:$true] %s86_s30  ;;  %s109_s13 = int_to_ptr.vmem [resolvable:$true] %s108_s13 }
  0x1d   :  { %s9263_s14 = scalar_lea.vmem %s87_s30, 16  ;;  %s9267_s2 = scalar_lea.vmem %s87_s30, 32 }
  0x1e   :  { %p9264_p10 = scmp.ne.s32.totalorder %s87_s30, %s9263_s14  ;;  %p9268_p11 = scmp.lt.s32.totalorder %s87_s30, %s87_s30 }
  0x1f   :  { %p9269_p12 = scmp.lt.s32.totalorder %s9267_s2, %s9263_s14 }
  0x21   :  { %p9270_p13 = por %p9269_p12, %p9268_p11 }
  0x23   :  { %p9271_p0 = pnand %p9270_p13, %p9264_p10 }
  0x25   :  { %9274 = shalt.err (!%p9271_p0)
}
  0x26   :  { %89 = dma.hbm_to_vmem [thread:$0]  %s10248_s6, 16, %s87_s30, [#allocation12]  }
  0x27   :  { %s9283_s17 = scalar_lea.vmem %s109_s13, 16  ;;  %s9287_s4 = scalar_lea.vmem %s109_s13, 32 }
  0x28   :  { %p9284_p1 = scmp.ne.s32.totalorder %s109_s13, %s9283_s17  ;;  %p9288_p2 = scmp.lt.s32.totalorder %s109_s13, %s109_s13 }
  0x29   :  { %p9289_p3 = scmp.lt.s32.totalorder %s9287_s4, %s9283_s17 }
  0x2b   :  { %p9290_p4 = por %p9289_p3, %p9288_p2 }
  0x2d   :  { %p9291_p5 = pnand %p9290_p4, %p9284_p1 }
  0x2f   :  { %9294 = shalt.err (!%p9291_p5)
}
  0x30   :  { %111 = dma.hbm_to_vmem [thread:$0]  %s10250_s8, 16, %s109_s13, [#allocation15]  }
  0x31   :  { %s9431_s20 = smov [#allocation2]  }
  0x32   :  { %s29_s21 = sshll.u32 %s9431_s20, 4  ;;  %s30_s21 = int_to_ptr.vmem [resolvable:$true] %s29_s21 }
  0x33   :  { %s9303_s22 = scalar_lea.vmem %s30_s21, 128  ;;  %p9308_p7 = scmp.lt.s32.totalorder %s30_s21, %s30_s21 }
  0x34   :  { %p9304_p6 = scmp.ne.s32.totalorder %s30_s21, %s9303_s22  ;;  %p9309_p8 = scmp.lt.s32.totalorder %s9303_s22, %s9303_s22 }
  0x36   :  { %p9310_p9 = por %p9309_p8, %p9308_p7 }
  0x38   :  { %p9311_p10 = pnand %p9310_p9, %p9304_p6 }
  0x3a   :  { %9314 = shalt.err (!%p9311_p10)
}
  0x3b   :  { %s9432_s6 = smov 64   ;;  %s9433_s23 = smov 4  }
  0x3c   :  { %35 = dma.hbm_to_vmem [thread:$0]  %s10243_s1, 128, %s30_s21, [#allocation3], %s9432_s6, %s9432_s6, %s9433_s23  }
  0x3d   :  { %s9434_s8 = smov [#allocation7]   ;;  %s9435_s27 = smov [#allocation10]  }
  0x3e   :  { %s51_s26 = sshll.u32 %s9434_s8, 4  ;;  %s73_s28 = sshll.u32 %s9435_s27, 4  ;;  %s52_s26 = int_to_ptr.vmem [resolvable:$true] %s51_s26  ;;  %s74_s28 = int_to_ptr.vmem [resolvable:$true] %s73_s28 }
  0x3f   :  { %s9323_s29 = scalar_lea.vmem %s52_s26, 256  ;;  %p9328_p12 = scmp.lt.s32.totalorder %s52_s26, %s52_s26 }
  0x40   :  { %p9324_p11 = scmp.ne.s32.totalorder %s52_s26, %s9323_s29  ;;  %p9329_p13 = scmp.lt.s32.totalorder %s9323_s29, %s9323_s29 }
  0x42   :  { %p9330_p0 = por %p9329_p13, %p9328_p12 }
  0x44   :  { %p9331_p1 = pnand %p9330_p0, %p9324_p11 }
  0x46   :  { %9334 = shalt.err (!%p9331_p1)
}
  0x47   :  { %57 = dma.hbm_to_vmem [thread:$0]  %s10245_s3, 256, %s52_s26, [#allocation6], %s9432_s6, %s9432_s6, %s9433_s23  }
  0x48   :  { %s9343_s1 = scalar_lea.vmem %s74_s28, 1536  ;;  %p9348_p3 = scmp.lt.s32.totalorder %s74_s28, %s74_s28 }
  0x49   :  { %p9344_p2 = scmp.ne.s32.totalorder %s74_s28, %s9343_s1  ;;  %p9349_p4 = scmp.lt.s32.totalorder %s9343_s1, %s9343_s1 }
  0x4b   :  { %p9350_p5 = por %p9349_p4, %p9348_p3 }
  0x4d   :  { %p9351_p6 = pnand %p9350_p5, %p9344_p2 }
  0x4f   :  { %9354 = shalt.err (!%p9351_p6)
}
  0x50   :  { %79 = dma.hbm_to_vmem [thread:$0]  %s10247_s5, 1536, %s74_s28, [#allocation9], %s9432_s6, %s9432_s6, %s9433_s23  }
  0x51   :  { %s9436_s2 = smov [#allocation13]   ;;  %s9437_s16 = smov [#allocation16]  }
  0x52   :  { %s95_s15 = sshll.u32 %s9436_s2, 4  ;;  %s120_s3 = sshll.u32 %s9437_s16, 4  ;;  %s96_s15 = int_to_ptr.vmem [resolvable:$true] %s95_s15  ;;  %s121_s3 = int_to_ptr.vmem [resolvable:$true] %s120_s3 }
  0x53   :  { %s9363_s17 = scalar_lea.vmem %s96_s15, 65536  ;;  %p9368_p8 = scmp.lt.s32.totalorder %s96_s15, %s96_s15 }
  0x54   :  { %p9364_p7 = scmp.ne.s32.totalorder %s96_s15, %s9363_s17  ;;  %p9369_p9 = scmp.lt.s32.totalorder %s9363_s17, %s9363_s17 }
  0x56   :  { %p9370_p10 = por %p9369_p9, %p9368_p8 }
  0x58   :  { %p9371_p11 = pnand %p9370_p10, %p9364_p7 }
  0x5a   :  { %9374 = shalt.err (!%p9371_p11)
}
  0x5b   :  { %101 = dma.hbm_to_vmem [thread:$0]  %s10249_s7, 65536, %s96_s15, [#allocation12], %s9432_s6, %s9432_s6, %s9433_s23  }
  0x5c   :  { %s9383_s5 = scalar_lea.vmem %s121_s3, 16  ;;  %s9387_s19 = scalar_lea.vmem %s121_s3, 32 }
  0x5d   :  { %p9384_p12 = scmp.ne.s32.totalorder %s121_s3, %s9383_s5  ;;  %p9388_p13 = scmp.lt.s32.totalorder %s121_s3, %s121_s3 }
  0x5e   :  { %p9389_p0 = scmp.lt.s32.totalorder %s9387_s19, %s9383_s5 }
  0x60   :  { %p9390_p1 = por %p9389_p0, %p9388_p13 }
  0x62   :  { %p9391_p2 = pnand %p9390_p1, %p9384_p12 }
  0x64   :  { %9394 = shalt.err (!%p9391_p2)
}
  0x65   :  { %123 = dma.hbm_to_vmem [thread:$0]  %s10252_s10, 16, %s121_s3, [#allocation15]  }
  0x66   :  { %9415 = dma.done.wait [#allocation3], 128  }
  0x67   :  { %9416 = vsyncadd [#allocation3], 4294967168 }
  0x68   :  { %9417 = dma.done.wait [#allocation6], 272  }
  0x69   :  { %9418 = vsyncadd [#allocation6], 4294967024 }
  0x6a   :  { %9419 = dma.done.wait [#allocation9], 1552  }
  0x6b   :  { %9420 = vsyncadd [#allocation9], 4294965744 }
  0x6c   :  { %9421 = dma.done.wait [#allocation12], 65552  }
  0x6d   :  { %9422 = vsyncadd [#allocation12], 4294901744 }
  0x6e   :  { %9423 = dma.done.wait [#allocation15], 32  }
  0x6f   :  { %9424 = vsyncadd [#allocation15], 4294967264  ;;  %vm215_vm0 = vcmask 1046528   ;;  %v8680_v0 = vld [vmem:[#allocation2] sm:$0x7f]   ;;  %v153_v2 = vld [vmem:[%s10242_s0 + $0x8] sm:$0xff] }
  0x70   :  { %v152_v1 = vld [vmem:[%s10242_s0] sm:$0xff]  ;;  %vm190_vm1 = vcmask 113664   ;;  %v154_v3 = vld [vmem:[%s10242_s0 + $0x10] sm:$0xff]  ;;  %8623 = vmatprep.subr.msk.bf16.mxu0 %vm215_vm0, %v8680_v0  ;;  %v217_v4 = vsel %vm215_vm0, %v8680_v0, 0  ;;  %v155_v6 = vld [vmem:[%s10242_s0 + $0x18] sm:$0xff]  ;;  %vm363_vm2 = vcmask 261120  }
  0x71   :  { %v168_v5 = vpack.c.bf16 %v153_v2, %v152_v1  ;;  %v156_v7 = vld [vmem:[%s10242_s0 + $0x20] sm:$0xff]  ;;  %v157_v8 = vld [vmem:[%s10242_s0 + $0x28] sm:$0xff]  ;;  %8566 = vmatpush3.bf16.msra.mxu0 %v217_v4  ;;  %v169_v9 = vpack.c.bf16 %v155_v6, %v154_v3  ;;  %v158_v11 = vld [vmem:[%s10242_s0 + $0x30] sm:$0xff]  ;;  %vm517_vm3 = vcmask 1040384   ;;  %vm935_vm4 = vcmask 523264  }
  0x72   :  { %v170_v10 = vpack.c.bf16 %v157_v8, %v156_v7  ;;  %v159_v12 = vld [vmem:[%s10242_s0 + $0x38] sm:$0xff]  ;;  %v160_v13 = vld [vmem:[%s10242_s0 + $0x40] sm:$0xff]  ;;  %v161_v14 = vld [vmem:[%s10242_s0 + $0x48] sm:$0xff]  ;;  %vm9441_vm9 = vmmov 0   ;;  %vm7248_vm10 = vcmask 9216  }
  0x73   :  { %8567 = vmatprep.mubr.msk.bf16.mxu0 %vm190_vm1, %v168_v5  ;;  %v171_v15 = vpack.c.bf16 %v159_v12, %v158_v11  ;;  %v172_v16 = vpack.c.bf16 %v161_v14, %v160_v13  ;;  %v162_v17 = vld [vmem:[%s10242_s0 + $0x50] sm:$0xff]  ;;  %v163_v18 = vld [vmem:[%s10242_s0 + $0x58] sm:$0xff]  ;;  %v164_v19 = vld [vmem:[%s10242_s0 + $0x60] sm:$0xff] }
  0x74   :  { %8568 = vmatmul.mubr.msk.bf16.vlgmr.msra.gmra.mxu0 %vm190_vm1, %v169_v9  ;;  %v165_v20 = vld [vmem:[%s10242_s0 + $0x68] sm:$0xff]  ;;  %v173_v21 = vpack.c.bf16 %v163_v18, %v162_v17  ;;  %v166_v23 = vld [vmem:[%s10242_s0 + $0x70] sm:$0xff]  ;;  %v167_v24 = vld [vmem:[%s10242_s0 + $0x78] sm:$0xff] }
  0x75   :  { %8571 = vmatprep.mubr.msk.bf16.mxu0 %vm190_vm1, %v170_v10  ;;  %v174_v22 = vpack.c.bf16 %v165_v20, %v164_v19  ;;  %v175_v25 = vpack.c.bf16 %v167_v24, %v166_v23  ;;  %v8681_v26 = vld [vmem:[#allocation7 + $0x8] sm:$0xff]   ;;  %v8682_v27 = vld [vmem:[#allocation7] sm:$0xff]   ;;  %v7269_v28 = vld [vmem:[#allocation5] ss:$0 sm:$0xff] }
  0x76   :  { %8583 = vmatprep.subr.bf16.mxu1 %v8681_v26  ;;  %v8684_v23 = vld [vmem:[#allocation10 + $0x30] sm:$0xff]   ;;  %v8685_v24 = vld [vmem:[#allocation10 + $0x28] sm:$0xff]  }
  0x77   :  { %8584 = vmatpush3.bf16.msra.mxu1 %v8681_v26  ;;  %v8687_v26 = vld [vmem:[#allocation10 + $0x18] sm:$0xff]  }
  0x78   :  { %8585 = vmatprep.subr.bf16.mxu1 %v8682_v27 }
  0x7b   :  { %8586 = vmatpush3.bf16.msra.mxu1 %v8682_v27  ;;  %v8688_v27 = vld [vmem:[#allocation10 + $0x10] sm:$0xff]  }
  0x7c   :  { %8572 = vmatmul.mubr.msk.bf16.gmra.mxu0 %vm190_vm1, %v171_v15 }
  0x7d   :  { %8575 = vmatprep.mubr.msk.bf16.mxu0 %vm190_vm1, %v172_v16 }
  0x84   :  { %8576 = vmatmul.mubr.msk.bf16.gmra.mxu0 %vm190_vm1, %v173_v21  ;;  %v8683_v21 = vld [vmem:[#allocation10 + $0x38] sm:$0xff]  }
  0x85   :  { %8579 = vmatprep.mubr.msk.bf16.mxu0 %vm190_vm1, %v174_v22  ;;  %v9438_v22 = vmov 0  }
  0x86   :  { %1095 = vmatprep.subr.bf16.mxu0 %v9438_v22 }
  0x87   :  { %1096 = vmatpush1.bf16.msra.mxu0 %v8683_v21 }
  0x88   :  { %1097 = vmatprep.subr.bf16.mxu0 %v9438_v22 }
  0x8b   :  { %1098 = vmatpush1.bf16.msra.mxu0 %v8684_v23 }
  0x8c   :  { %8580 = vmatmul.mubr.msk.bf16.gmra.mxu0 %vm190_vm1, %v175_v25  ;;  %1099 = vmatprep.subr.bf16.mxu0 %v9438_v22  ;;  %v8686_v25 = vld [vmem:[#allocation10 + $0x20] sm:$0xff]  }
  0x8f   :  { %1100 = vmatpush1.bf16.msra.mxu0 %v8685_v24 }
  0x90   :  { %1101 = vmatprep.subr.bf16.mxu0 %v9438_v22 }
  0x93   :  { %1102 = vmatpush1.bf16.msra.mxu0 %v8686_v25 }
  0x94   :  { %1103 = vmatprep.subr.bf16.mxu0 %v9438_v22 }
  0x97   :  { %1104 = vmatpush1.bf16.msra.mxu0 %v8687_v26 }
  0x98   :  { %1105 = vmatprep.subr.bf16.mxu0 %v9438_v22 }
  0x9b   :  { %1106 = vmatpush1.bf16.msra.mxu0 %v8688_v27 }
  0x9c   :  { %1107 = vmatprep.subr.bf16.mxu0 %v9438_v22 }
 0x134   :  { %v8569_v29 = vpop.f32.mrf.mxu0 }
 0x135   :  { %v262_v31 = vadd.f32 %v8569_v29, %v7269_v28  ;;  %v8690_v29 = vld [vmem:[#allocation10] sm:$0xff]  }
 0x136   :  { %v253_v30 = vpop.f32.mrf.mxu0 }
 0x137   :  { %v254_v33 = vadd.f32 %v7269_v28, %v253_v30  ;;  %v318_v36 = vmax.f32 %v262_v31, 0.0  ;;  %v8691_v30 = vld [vmem:[#allocation10 + $0x58] sm:$0xff]   ;;  %v8692_v31 = vld [vmem:[#allocation10 + $0x50] sm:$0xff]  }
 0x138   :  { %v8570_v32 = vpop.f32.mrf.mxu0 }
 0x139   :  { %v265_v34 = vadd.f32 %v8570_v32, %v7269_v28  ;;  %v316_v40 = vmax.f32 %v254_v33, 0.0  ;;  %v8693_v32 = vld [vmem:[#allocation10 + $0x48] sm:$0xff]   ;;  %v9608_v33 = vld [vmem:[#allocation8] ss:$0 sm:$0xff] }
 0x13a   :  { %v256_v35 = vpop.f32.mrf.mxu0 }
 0x13b   :  { %v319_v37 = vmax.f32 %v265_v34, 0.0  ;;  %v257_v38 = vadd.f32 %v7269_v28, %v256_v35  ;;  %v8694_v35 = vld [vmem:[#allocation10 + $0x40] sm:$0xff]  }
 0x13c   :  { %v8573_v39 = vpop.f32.mrf.mxu0 }
 0x13d   :  { %v317_v41 = vmax.f32 %v257_v38, 0.0  ;;  %v278_v42 = vadd.f32 %v8573_v39, %v7269_v28  ;;  %v333_v46 = vpack.c.bf16 %v319_v37, %v318_v36 }
 0x13e   :  { %v269_v43 = vpop.f32.mrf.mxu0 }
 0x13f   :  { %v270_v44 = vadd.f32 %v7269_v28, %v269_v43  ;;  %v332_v45 = vpack.c.bf16 %v317_v41, %v316_v40  ;;  %v322_v48 = vmax.f32 %v278_v42, 0.0  ;;  %v614_v41 = vlaneseq }
 0x140   :  { %v8574_v47 = vpop.f32.mrf.mxu0 }
 0x141   :  { %v281_v49 = vadd.f32 %v8574_v47, %v7269_v28  ;;  %8587 = vmatprep.mubr.msk.bf16.mxu1 %vm363_vm2, %v332_v45  ;;  %v320_v51 = vmax.f32 %v270_v44, 0.0 }
 0x142   :  { %v272_v50 = vpop.f32.mrf.mxu0  ;;  %8588 = vmatmul.mubr.msk.bf16.vlgmr.msra.gmra.mxu1 %vm363_vm2, %v333_v46 }
 0x143   :  { %v323_v52 = vmax.f32 %v281_v49, 0.0  ;;  %v273_v53 = vadd.f32 %v7269_v28, %v272_v50 }
 0x144   :  { %v8577_v54 = vpop.f32.mrf.mxu0 }
 0x145   :  { %v321_v55 = vmax.f32 %v273_v53, 0.0  ;;  %v294_v56 = vadd.f32 %v8577_v54, %v7269_v28  ;;  %v335_v57 = vpack.c.bf16 %v323_v52, %v322_v48 }
 0x146   :  { %v285_v58 = vpop.f32.mrf.mxu0 }
 0x147   :  { %v334_v59 = vpack.c.bf16 %v321_v55, %v320_v51  ;;  %v286_v60 = vadd.f32 %v7269_v28, %v285_v58  ;;  %v326_v62 = vmax.f32 %v294_v56, 0.0  ;;  %v9616_v51 = vshrl.u32 %v614_v41, 7 }
 0x148   :  { %v8578_v61 = vpop.f32.mrf.mxu0 }
 0x149   :  { %v297_v63 = vadd.f32 %v8578_v61, %v7269_v28  ;;  %8591 = vmatprep.mubr.msk.bf16.mxu1 %vm363_vm2, %v334_v59  ;;  %v324_v1 = vmax.f32 %v286_v60, 0.0 }
 0x14a   :  { %v288_v0 = vpop.f32.mrf.mxu0  ;;  %8592 = vmatmul.mubr.msk.bf16.gmra.mxu1 %vm363_vm2, %v335_v57 }
 0x14b   :  { %v327_v2 = vmax.f32 %v297_v63, 0.0  ;;  %v289_v3 = vadd.f32 %v7269_v28, %v288_v0 }
 0x14c   :  { %v8581_v4 = vpop.f32.mrf.mxu0 }
 0x14d   :  { %v325_v5 = vmax.f32 %v289_v3, 0.0  ;;  %v310_v6 = vadd.f32 %v8581_v4, %v7269_v28  ;;  %v337_v7 = vpack.c.bf16 %v327_v2, %v326_v62 }
 0x14e   :  { %v301_v8 = vpop.f32.mrf.mxu0 }
 0x14f   :  { %v336_v9 = vpack.c.bf16 %v325_v5, %v324_v1  ;;  %v302_v10 = vadd.f32 %v7269_v28, %v301_v8  ;;  %v330_v12 = vmax.f32 %v310_v6, 0.0 }
 0x150   :  { %v8582_v11 = vpop.f32.mrf.mxu0 }
 0x151   :  { %v313_v13 = vadd.f32 %v8582_v11, %v7269_v28  ;;  %8595 = vmatprep.mubr.msk.bf16.mxu1 %vm363_vm2, %v336_v9  ;;  %v328_v15 = vmax.f32 %v302_v10, 0.0 }
 0x152   :  { %v304_v14 = vpop.f32.mrf.mxu0  ;;  %8596 = vmatmul.mubr.msk.bf16.gmra.mxu1 %vm363_vm2, %v337_v7 }
 0x153   :  { %v331_v16 = vmax.f32 %v313_v13, 0.0  ;;  %v305_v17 = vadd.f32 %v7269_v28, %v304_v14  ;;  %v8689_v28 = vld [vmem:[#allocation10 + $0x8] sm:$0xff]  }
 0x154   :  { %1108 = vmatpush1.bf16.msra.mxu0 %v8689_v28 }
 0x155   :  { %v329_v18 = vmax.f32 %v305_v17, 0.0  ;;  %v339_v19 = vpack.c.bf16 %v331_v16, %v330_v12  ;;  %1109 = vmatprep.subr.bf16.mxu0 %v9438_v22  ;;  %v622_v16 = vadd.s32 56, %v9616_v51 }
 0x157   :  { %v338_v20 = vpack.c.bf16 %v329_v18, %v328_v15 }
 0x158   :  { %1110 = vmatpush1.bf16.msra.mxu0 %v8690_v29 }
 0x159   :  { %8599 = vmatprep.mubr.msk.bf16.mxu1 %vm363_vm2, %v338_v20  ;;  %1119 = vmatprep.subr.bf16.mxu0 %v9438_v22 }
 0x15a   :  { %8600 = vmatmul.mubr.msk.bf16.gmra.mxu1 %vm363_vm2, %v339_v19 }
 0x15c   :  { %1120 = vmatpush2.bf16.msra.mxu0 %v8691_v30 }
 0x15d   :  { %1121 = vmatprep.subr.bf16.mxu0 %v9438_v22 }
 0x160   :  { %1122 = vmatpush2.bf16.msra.mxu0 %v8692_v31 }
 0x161   :  { %1123 = vmatprep.subr.bf16.mxu0 %v9438_v22 }
 0x164   :  { %1124 = vmatpush2.bf16.msra.mxu0 %v8693_v32 }
 0x165   :  { %1125 = vmatprep.subr.bf16.mxu0 %v9438_v22 }
 0x168   :  { %1126 = vmatpush2.bf16.msra.mxu0 %v8694_v35 }
 0x202   :  { %v8589_v34 = vpop.f32.mrf.mxu1 }
 0x203   :  { %v431_v36 = vadd.f32 %v8589_v34, %v9608_v33 }
 0x204   :  { %v422_v37 = vpop.f32.mrf.mxu1 }
 0x205   :  { %v423_v38 = vadd.f32 %v9608_v33, %v422_v37  ;;  %v487_v42 = vmax.f32 %v431_v36, 0.0 }
 0x206   :  { %v8590_v39 = vpop.f32.mrf.mxu1 }
 0x207   :  { %v434_v40 = vadd.f32 %v8590_v39, %v9608_v33  ;;  %v9613_v43 = vmax.f32 %v423_v38, 0.0  ;;  %v521_v52 = vrot.slane %v487_v42, 7  ;;  %v569_v53 = vrot.slane %v487_v42, 1 }
 0x208   :  { %v425_v44 = vpop.f32.mrf.mxu1  ;;  %v684_v38 = vand.u32 63, %v622_v16 }
 0x209   :  { %v488_v45 = vmax.f32 %v434_v40, 0.0  ;;  %v426_v46 = vadd.f32 %v9608_v33, %v425_v44  ;;  %v566_v54 = vrot.slane %v9613_v43, 1  ;;  %v518_v61 = vrot.slane %v9613_v43, 7 }
 0x20a   :  { %v8593_v47 = vpop.f32.mrf.mxu1  ;;  %vm9677_vm5 = vcmp.eq.s32.totalorder %v684_v38, 63 }
 0x20b   :  { %v523_v48 = vrot.slane %v488_v45, 7  ;;  %v571_v49 = vrot.slane %v488_v45, 1  ;;  %v486_v50 = vmax.f32 %v426_v46, 0.0  ;;  %v447_v55 = vadd.f32 %v8593_v47, %v9608_v33 }
 0x20c   :  { %v438_v56 = vpop.f32.mrf.mxu1  ;;  %v8645_v8 = vpack.i.bf16 %v488_v45, %v487_v42 }
 0x20d   :  { %v519_v57 = vrot.slane %v486_v50, 7  ;;  %v567_v58 = vrot.slane %v486_v50, 1  ;;  %v439_v59 = vadd.f32 %v9608_v33, %v438_v56  ;;  %v8640_v60 = vpack.i.bf16 %v486_v50, %v9613_v43 }
 0x20e   :  { %v8594_v62 = vpop.f32.mrf.mxu1  ;;  %v9624_v63 = vsel %vm215_vm0, %v569_v53, %v571_v49  ;;  %v9627_v0 = vsel %vm517_vm3, %v521_v52, %v523_v48  ;;  %v491_v5 = vmax.f32 %v447_v55, 0.0 }
 0x20f   :  { %v489_v1 = vmax.f32 %v439_v59, 0.0  ;;  %v450_v2 = vadd.f32 %v8594_v62, %v9608_v33  ;;  %8641 = vrot.lane.b32.xlu0 %v8640_v60, %s9432_s6  ;;  %v568_v3 = vsel %vm215_vm0, %v566_v54, %v567_v58  ;;  %v570_v4 = vsel %vm215_vm0, %v567_v58, %v569_v53 }
 0x210   :  { %v441_v6 = vpop.f32.mrf.mxu1  ;;  %v953_v7 = vpack.c.bf16 %v570_v4, %v568_v3  ;;  %v9636_v9 = vsel %vm517_vm3, %v518_v61, %v519_v57  ;;  %v9641_v15 = vsel %vm517_vm3, %v519_v57, %v521_v52  ;;  %v529_v21 = vrot.slane %v491_v5, 7 }
 0x211   :  { %v525_v10 = vrot.slane %v489_v1, 7  ;;  %v573_v11 = vrot.slane %v489_v1, 1  ;;  %v492_v12 = vmax.f32 %v450_v2, 0.0  ;;  %v442_v13 = vadd.f32 %v9608_v33, %v441_v6 }
 0x212   :  { %v8597_v14 = vpop.f32.mrf.mxu1  ;;  %7303 = vmatprep.mubr.msk.bf16.mxu0 %vm935_vm4, %v953_v7  ;;  %v577_v22 = vrot.slane %v491_v5, 1 }
 0x213   :  { %v531_v17 = vrot.slane %v492_v12, 7  ;;  %v579_v18 = vrot.slane %v492_v12, 1  ;;  %v490_v19 = vmax.f32 %v442_v13, 0.0  ;;  %v463_v20 = vadd.f32 %v8597_v14, %v9608_v33  ;;  %8646 = vrot.lane.b32.xlu0 %v8645_v8, %s9432_s6 }
 0x214   :  { %v454_v23 = vpop.f32.mrf.mxu1  ;;  %v9647_v24 = vsel %vm215_vm0, %v571_v49, %v573_v11  ;;  %v9650_v25 = vsel %vm517_vm3, %v523_v48, %v525_v10  ;;  %v8655_v52 = vpack.i.bf16 %v492_v12, %v491_v5 }
 0x215   :  { %v527_v26 = vrot.slane %v490_v19, 7  ;;  %v575_v27 = vrot.slane %v490_v19, 1  ;;  %v455_v28 = vadd.f32 %v9608_v33, %v454_v23  ;;  %v8650_v30 = vpack.i.bf16 %v490_v19, %v489_v1 }
 0x216   :  { %v8598_v29 = vpop.f32.mrf.mxu1  ;;  %v955_v31 = vpack.c.bf16 %v9647_v24, %v9624_v63  ;;  %v580_v32 = vsel %vm215_vm0, %v577_v22, %v579_v18  ;;  %v9657_v34 = vsel %vm517_vm3, %v529_v21, %v531_v17  ;;  %v495_v35 = vmax.f32 %v463_v20, 0.0 }
 0x217   :  { %v493_v36 = vmax.f32 %v455_v28, 0.0  ;;  %v466_v37 = vadd.f32 %v8598_v29, %v9608_v33  ;;  %8651 = vrot.lane.b32.xlu1 %v8650_v30, %s9432_s6  ;;  %v9662_v40 = vsel %vm215_vm0, %v573_v11, %v575_v27  ;;  %v9665_v41 = vsel %vm215_vm0, %v575_v27, %v577_v22 }
 0x218   :  { %v457_v39 = vpop.f32.mrf.mxu1  ;;  %v9668_v42 = vsel %vm517_vm3, %v525_v10, %v527_v26  ;;  %v9671_v44 = vsel %vm517_vm3, %v527_v26, %v529_v21  ;;  %v585_v49 = vrot.slane %v495_v35, 1  ;;  %v957_v53 = vpack.c.bf16 %v9665_v41, %v9662_v40 }
 0x219   :  { %v533_v45 = vrot.slane %v493_v36, 7  ;;  %v581_v46 = vrot.slane %v493_v36, 1  ;;  %v496_v47 = vmax.f32 %v466_v37, 0.0  ;;  %v458_v48 = vadd.f32 %v9608_v33, %v457_v39 }
 0x21a   :  { %v8601_v50 = vpop.f32.mrf.mxu1  ;;  %v537_v1 = vrot.slane %v495_v35, 7 }
 0x21b   :  { %v587_v54 = vrot.slane %v496_v47, 1  ;;  %v494_v55 = vmax.f32 %v458_v48, 0.0  ;;  %v479_v56 = vadd.f32 %v8601_v50, %v9608_v33  ;;  %8656 = vrot.lane.b32.xlu1 %v8655_v52, %s9432_s6  ;;  %v8665_v59 = vpack.i.bf16 %v496_v47, %v495_v35 }
 0x21c   :  { %v470_v58 = vpop.f32.mrf.mxu1  ;;  %v582_v60 = vsel %vm215_vm0, %v579_v18, %v581_v46  ;;  %v9684_v62 = vsel %vm517_vm3, %v531_v17, %v533_v45  ;;  %v539_v2 = vrot.slane %v496_v47, 7 }
 0x21d   :  { %v583_v3 = vrot.slane %v494_v55, 1  ;;  %v471_v4 = vadd.f32 %v9608_v33, %v470_v58  ;;  %v535_v5 = vrot.slane %v494_v55, 7  ;;  %v8660_v7 = vpack.i.bf16 %v494_v55, %v493_v36 }
 0x21e   :  { %v8602_v6 = vpop.f32.mrf.mxu1  ;;  %v878_v8 = vsel %vm9677_vm5, 0.0, %v582_v60  ;;  %v9690_v10 = vsel %vm215_vm0, %v585_v49, %v587_v54  ;;  %v499_v11 = vmax.f32 %v479_v56, 0.0  ;;  %v9713_v28 = vsel %vm517_vm3, %v537_v1, %v539_v2 }
 0x21f   :  { %v497_v12 = vmax.f32 %v471_v4, 0.0  ;;  %v482_v13 = vadd.f32 %v8602_v6, %v9608_v33  ;;  %8666 = vrot.lane.b32.xlu1 %v8665_v59, %s9432_s6  ;;  %8661 = vrot.lane.b32.xlu0 %v8660_v7, %s9432_s6  ;;  %v9695_v16 = vpack.c.bf16 %v878_v8, %v580_v32  ;;  %v9698_v17 = vsel %vm215_vm0, %v581_v46, %v583_v3 }
 0x220   :  { %v473_v14 = vpop.f32.mrf.mxu1  ;;  %v9701_v18 = vsel %vm215_vm0, %v583_v3, %v585_v49  ;;  %v9707_v26 = vsel %vm517_vm3, %v533_v45, %v535_v5  ;;  %v9710_v27 = vsel %vm517_vm3, %v535_v5, %v537_v1  ;;  %v593_v39 = vrot.slane %v499_v11, 1 }
 0x221   :  { %v541_v19 = vrot.slane %v497_v12, 7  ;;  %v589_v20 = vrot.slane %v497_v12, 1  ;;  %v500_v21 = vmax.f32 %v482_v13, 0.0  ;;  %v474_v22 = vadd.f32 %v9608_v33, %v473_v14 }
 0x222   :  { %v961_v23 = vpack.c.bf16 %v9701_v18, %v9698_v17  ;;  %v545_v50 = vrot.slane %v499_v11, 7  ;;  %v630_v55 = vadd.s32 120, %v9616_v51  ;;  %v565_v3 = vsel %vm517_vm3, 0.0, %v518_v61  ;;  %v8696_v17 = vld [vmem:[#allocation13 + $0x38] sm:$0xff]  }
 0x223   :  { %v498_v29 = vmax.f32 %v474_v22, 0.0  ;;  %v8675_v30 = vpack.i.bf16 %v500_v21, %v499_v11  ;;  %v9716_v32 = vsel %vm215_vm0, %v587_v54, %v589_v20  ;;  %v9719_v35 = vsel %vm517_vm3, %v539_v2, %v541_v19  ;;  %v8697_v18 = vld [vmem:[#allocation13 + $0x1f8] sm:$0xff]  }
 0x224   :  { %v963_v37 = vpack.c.bf16 %v9716_v32, %v9690_v10  ;;  %v595_v49 = vrot.slane %v500_v21, 1  ;;  %v547_v52 = vrot.slane %v500_v21, 7  ;;  %v740_v59 = vand.u32 63, %v630_v55  ;;  %v8699_v10 = vld [vmem:[#allocation13 + $0x70] sm:$0xff]   ;;  %7918 = vmatprep.subr.bf16.mxu0 %v8697_v18 }
 0x225   :  { %v543_v33 = vrot.slane %v498_v29, 7  ;;  %v8670_v36 = vpack.i.bf16 %v498_v29, %v497_v12  ;;  %8676 = vrot.lane.b32.xlu1 %v8675_v30, %s9432_s6  ;;  %v591_v45 = vrot.slane %v498_v29, 1  ;;  %v635_v2 = vand.u32 63, %v9616_v51  ;;  %v8700_v32 = vld [vmem:[#allocation13 + $0x30] sm:$0xff]  }
 0x226   :  { %v596_v54 = vsel %vm215_vm0, %v593_v39, %v595_v49  ;;  %v9742_v57 = vsel %vm517_vm3, %v545_v50, %v547_v52  ;;  %v613_v58 = vsel %vm215_vm0, %v595_v49, 0.0  ;;  %vm870_vm6 = vcmp.eq.s32.totalorder %v740_v59, 63 }
 0x227   :  { %8671 = vrot.lane.b32.xlu0 %v8670_v36, %s9432_s6  ;;  %v9726_v38 = vsel %vm517_vm3, %v541_v19, %v543_v33  ;;  %v9729_v46 = vsel %vm215_vm0, %v589_v20, %v591_v45  ;;  %v9732_v47 = vsel %vm215_vm0, %v591_v45, %v593_v39  ;;  %v9739_v56 = vsel %vm517_vm3, %v543_v33, %v545_v50 }
 0x228   :  { %v965_v48 = vpack.c.bf16 %v9732_v47, %v9729_v46  ;;  %v886_v60 = vsel %vm870_vm6, 0.0, %v613_v58  ;;  %vm823_vm7 = vcmp.eq.s32.totalorder %v635_v2, 0  ;;  %v623_v21 = vadd.s32 64, %v9616_v51  ;;  %v8704_v46 = vld [vmem:[#allocation13 + $0x28] sm:$0xff]  }
 0x229   :  { %v9745_v1 = vpack.c.bf16 %v886_v60, %v596_v54  ;;  %v839_v7 = vsel %vm823_vm7, 0.0, %v565_v3  ;;  %v8705_v47 = vld [vmem:[#allocation13 + $0x1e8] sm:$0xff]  }
 0x22a   :  { %v691_v24 = vand.u32 63, %v623_v21  ;;  %v8719_v21 = vld [vmem:[#allocation13 + $0x48] sm:$0xff]  }
 0x22c   :  { %vm831_vm8 = vcmp.eq.s32.totalorder %v691_v24, 0  ;;  %v8725_v24 = vld [vmem:[#allocation13 + $0x1c0] sm:$0xff]  }
 0x22d   :  { %v847_v55 = vsel %vm831_vm8, 0.0, %v9684_v62 }
 0x281   :  { %v8642_v4 = vpop.permute.xlu0 %8641 }
 0x282   :  { %v8644_v5 = vunpack.i.h.bf16 %v8642_v4  ;;  %v8643_v6 = vunpack.i.l.bf16 %v8642_v4 }
 0x284   :  { %v936_v8 = vsel %vm935_vm4, %v839_v7, %v8643_v6  ;;  %v937_v11 = vsel %vm935_vm4, %v9636_v9, %v8644_v5 }
 0x285   :  { %v952_v12 = vpack.c.bf16 %v937_v11, %v936_v8  ;;  %v8647_v13 = vpop.permute.xlu0 %8646  ;;  %v8710_v8 = vld [vmem:[#allocation13 + $0x1a0] sm:$0xff]   ;;  %v8711_v11 = vld [vmem:[#allocation13 + $0x58] sm:$0xff]  }
 0x286   :  { %v8649_v14 = vunpack.i.h.bf16 %v8647_v13  ;;  %v8648_v19 = vunpack.i.l.bf16 %v8647_v13  ;;  %v8713_v13 = vld [vmem:[#allocation13 + $0x1d8] sm:$0xff]  }
 0x287   :  { %1128 = vmatmul.mubr.bf16.vlgmr.msra.gmra.mxu0 %v952_v12  ;;  %v8712_v12 = vld [vmem:[#allocation13 + $0x18] sm:$0xff]  }
 0x288   :  { %7304 = vmatprep.mubr.msk.bf16.mxu0 %vm935_vm4, %v955_v31  ;;  %v938_v43 = vsel %vm935_vm4, %v9641_v15, %v8648_v19  ;;  %v939_v61 = vsel %vm935_vm4, %v9627_v0, %v8649_v14  ;;  %v8714_v14 = vld [vmem:[#allocation13 + $0x198] sm:$0xff]   ;;  %v8715_v19 = vld [vmem:[#allocation13 + $0x50] sm:$0xff]  }
 0x289   :  { %v954_v20 = vpack.c.bf16 %v939_v61, %v938_v43  ;;  %v8652_v9 = vpop.permute.xlu1 %8651  ;;  %v8716_v43 = vld [vmem:[#allocation13 + $0x10] sm:$0xff]  }
 0x28a   :  { %v8654_v22 = vunpack.i.h.bf16 %v8652_v9  ;;  %v8653_v29 = vunpack.i.l.bf16 %v8652_v9  ;;  %v8717_v61 = vld [vmem:[#allocation13 + $0x1d0] sm:$0xff]   ;;  %v8720_v9 = vld [vmem:[#allocation13 + $0x8] sm:$0xff]  }
 0x28c   :  { %v940_v30 = vsel %vm935_vm4, %v9650_v25, %v8653_v29  ;;  %v941_v63 = vsel %vm935_vm4, %v9668_v42, %v8654_v22  ;;  %v8721_v22 = vld [vmem:[#allocation13 + $0x1c8] sm:$0xff]  }
 0x28d   :  { %v8657_v31 = vpop.permute.xlu1 %8656  ;;  %v956_v33 = vpack.c.bf16 %v941_v63, %v940_v30  ;;  %v8722_v29 = vld [vmem:[#allocation13 + $0x188] sm:$0xff]   ;;  %v8723_v30 = vld [vmem:[#allocation13 + $0x40] sm:$0xff]  }
 0x28e   :  { %v8659_v36 = vunpack.i.h.bf16 %v8657_v31  ;;  %v8658_v15 = vunpack.i.l.bf16 %v8657_v31  ;;  %v8724_v63 = vld [vmem:[#allocation13] sm:$0xff]  }
 0x28f   :  { %1136 = vmatmul.mubr.bf16.gmra.mxu0 %v954_v20  ;;  %v8718_v20 = vld [vmem:[#allocation13 + $0x190] sm:$0xff]   ;;  %v8726_v31 = vld [vmem:[#allocation13 + $0x180] sm:$0xff]  }
 0x290   :  { %7305 = vmatprep.mubr.msk.bf16.mxu0 %vm935_vm4, %v957_v53  ;;  %v942_v0 = vsel %vm935_vm4, %v9671_v44, %v8658_v15  ;;  %v943_v25 = vsel %vm935_vm4, %v9657_v34, %v8659_v36  ;;  %v8729_v36 = vld [vmem:[#allocation13 + $0x2f8] sm:$0xff]  }
 0x291   :  { %v8667_v39 = vpop.permute.xlu1 %8666  ;;  %v8662_v42 = vpop.permute.xlu0 %8661  ;;  %v958_v45 = vpack.c.bf16 %v943_v25, %v942_v0 }
 0x292   :  { %v8669_v49 = vunpack.i.h.bf16 %v8667_v39  ;;  %v8668_v50 = vunpack.i.l.bf16 %v8667_v39  ;;  %v8664_v52 = vunpack.i.h.bf16 %v8662_v42  ;;  %v8663_v54 = vunpack.i.l.bf16 %v8662_v42  ;;  %v9807_v42 = vld [vmem:[#allocation11] ss:$0 sm:$0xff] }
 0x294   :  { %v944_v40 = vsel %vm935_vm4, %v847_v55, %v8663_v54  ;;  %v945_v41 = vsel %vm935_vm4, %v9707_v26, %v8664_v52  ;;  %v946_v44 = vsel %vm935_vm4, %v9710_v27, %v8668_v50  ;;  %v947_v34 = vsel %vm935_vm4, %v9713_v28, %v8669_v49 }
 0x295   :  { %v960_v53 = vpack.c.bf16 %v945_v41, %v944_v40  ;;  %v962_v58 = vpack.c.bf16 %v947_v34, %v946_v44 }
 0x297   :  { %1144 = vmatmul.mubr.bf16.gmra.mxu0 %v956_v33  ;;  %v8677_v59 = vpop.permute.xlu1 %8676  ;;  %v8727_v33 = vld [vmem:[#allocation13 + $0xf8] sm:$0xff]  }
 0x298   :  { %7306 = vmatprep.mubr.msk.bf16.mxu0 %vm935_vm4, %v9695_v16  ;;  %v8679_v60 = vunpack.i.h.bf16 %v8677_v59  ;;  %v8678_v62 = vunpack.i.l.bf16 %v8677_v59  ;;  %v8695_v16 = vld [vmem:[#allocation13 + $0x78] sm:$0xff]  }
 0x299   :  { %v8672_v2 = vpop.permute.xlu0 %8671  ;;  %7852 = vmatprep.subr.bf16.mxu1 %v8695_v16 }
 0x29a   :  { %v8674_v3 = vunpack.i.h.bf16 %v8672_v2  ;;  %v8673_v4 = vunpack.i.l.bf16 %v8672_v2  ;;  %v950_v26 = vsel %vm935_vm4, %v9739_v56, %v8678_v62  ;;  %v951_v27 = vsel %vm935_vm4, %v9742_v57, %v8679_v60  ;;  %7853 = vmatpush3.bf16.msra.mxu1 %v8696_v17  ;;  %v8707_v56 = vld [vmem:[#allocation13 + $0x60] sm:$0xff]  }
 0x29b   :  { %v966_v5 = vpack.c.bf16 %v951_v27, %v950_v26  ;;  %7854 = vmatprep.subr.bf16.mxu1 %v8699_v10  ;;  %v8708_v57 = vld [vmem:[#allocation13 + $0x20] sm:$0xff]   ;;  %v9439_v2 = vmov 1966171168  }
 0x29c   :  { %v948_v28 = vsel %vm935_vm4, %v9719_v35, %v8673_v4  ;;  %v949_v6 = vsel %vm935_vm4, %v9726_v38, %v8674_v3  ;;  %v8701_v35 = vld [vmem:[#allocation13 + $0x1f0] sm:$0xff]   ;;  %v8703_v38 = vld [vmem:[#allocation13 + $0x68] sm:$0xff]   ;;  %v1227_v3 = vunpack.c.l.s4 %v9439_v2 }
 0x29d   :  { %v964_v7 = vpack.c.bf16 %v949_v6, %v948_v28 }
 0x29e   :  { %7855 = vmatpush3.bf16.msra.mxu1 %v8700_v32 }
 0x29f   :  { %1152 = vmatmul.mubr.bf16.gmra.mxu0 %v958_v45  ;;  %7856 = vmatprep.subr.bf16.mxu1 %v8703_v38 }
 0x2a0   :  { %7307 = vmatprep.mubr.msk.bf16.mxu0 %vm935_vm4, %v961_v23  ;;  %v8698_v23 = vld [vmem:[#allocation13 + $0x1b8] sm:$0xff]  }
 0x2a1   :  { %7919 = vmatpush3.bf16.msra.mxu0 %v8698_v23 }
 0x2a2   :  { %7920 = vmatprep.subr.bf16.mxu0 %v8701_v35  ;;  %7857 = vmatpush3.bf16.msra.mxu1 %v8704_v46 }
 0x2a3   :  { %7858 = vmatprep.subr.bf16.mxu1 %v8707_v56 }
 0x2a6   :  { %7859 = vmatpush3.bf16.msra.mxu1 %v8708_v57 }
 0x2a7   :  { %1160 = vmatmul.mubr.bf16.gmra.mxu0 %v960_v53  ;;  %7860 = vmatprep.subr.bf16.mxu1 %v8711_v11 }
 0x2a8   :  { %7308 = vmatprep.mubr.msk.bf16.mxu0 %vm935_vm4, %v963_v37  ;;  %v8702_v37 = vld [vmem:[#allocation13 + $0x1b0] sm:$0xff]  }
 0x2a9   :  { %7921 = vmatpush3.bf16.msra.mxu0 %v8702_v37 }
 0x2aa   :  { %7922 = vmatprep.subr.bf16.mxu0 %v8705_v47  ;;  %7861 = vmatpush3.bf16.msra.mxu1 %v8712_v12 }
 0x2ab   :  { %7862 = vmatprep.subr.bf16.mxu1 %v8715_v19 }
 0x2ae   :  { %7863 = vmatpush3.bf16.msra.mxu1 %v8716_v43 }
 0x2af   :  { %1168 = vmatmul.mubr.bf16.gmra.mxu0 %v962_v58  ;;  %7864 = vmatprep.subr.bf16.mxu1 %v8719_v21 }
 0x2b0   :  { %7309 = vmatprep.mubr.msk.bf16.mxu0 %vm935_vm4, %v965_v48  ;;  %v8706_v48 = vld [vmem:[#allocation13 + $0x1a8] sm:$0xff]  }
 0x2b1   :  { %7923 = vmatpush3.bf16.msra.mxu0 %v8706_v48 }
 0x2b2   :  { %7865 = vmatpush3.bf16.msra.mxu1 %v8720_v9 }
 0x2b3   :  { %7866 = vmatprep.subr.bf16.mxu1 %v8723_v30 }
 0x2b6   :  { %7867 = vmatpush3.bf16.msra.mxu1 %v8724_v63  ;;  %v8728_v63 = vld [vmem:[#allocation13 + $0xb8] sm:$0xff]  }
 0x2b7   :  { %1176 = vmatmul.mubr.bf16.gmra.mxu0 %v964_v7  ;;  %7874 = vmatprep.subr.bf16.mxu1 %v8727_v33 }
 0x2b8   :  { %7310 = vmatprep.mubr.msk.bf16.mxu0 %vm935_vm4, %v9745_v1  ;;  %v8709_v1 = vld [vmem:[#allocation13 + $0x1e0] sm:$0xff]  }
 0x2b9   :  { %7924 = vmatprep.subr.bf16.mxu0 %v8709_v1 }
 0x2ba   :  { %7925 = vmatpush3.bf16.msra.mxu0 %v8710_v8 }
 0x2bb   :  { %7926 = vmatprep.subr.bf16.mxu0 %v8713_v13 }
 0x2be   :  { %7927 = vmatpush3.bf16.msra.mxu0 %v8714_v14 }
 0x2bf   :  { %1184 = vmatmul.mubr.bf16.gmra.mxu0 %v966_v5  ;;  %7928 = vmatprep.subr.bf16.mxu0 %v8717_v61  ;;  %v1228_v5 = vunpack.c.0.s8 %v1227_v3 }
 0x2c1   :  { %v9830_v17 = vsub.s32 %v1228_v5, %v9616_v51 }
 0x2c2   :  { %7929 = vmatpush3.bf16.msra.mxu0 %v8718_v20 }
 0x2c3   :  { %7930 = vmatprep.subr.bf16.mxu0 %v8721_v22 }
 0x2c6   :  { %7931 = vmatpush3.bf16.msra.mxu0 %v8722_v29 }
 0x2c7   :  { %7932 = vmatprep.subr.bf16.mxu0 %v8725_v24 }
 0x2ca   :  { %7933 = vmatpush3.bf16.msra.mxu0 %v8726_v31 }
 0x2cb   :  { %7962 = vmatprep.subr.bf16.mxu0 %v8729_v36 }
 0x347   :  { %v1129_v15 = vpop.f32.mrf.mxu0 }
 0x348   :  { %v1130_v28 = vadd.f32 %v9807_v42, %v1129_v15 }
 0x349   :  { %v1131_v0 = vpop.f32.mrf.mxu0 }
 0x34a   :  { %v1192_v18 = vmax.f32 %v1130_v28, 0.0 }
 0x34b   :  { %v1132_v25 = vpop.f32.mrf.mxu0 }
 0x34c   :  { %v9833_v10 = vadd.f32 %v9807_v42, %v1132_v25  ;;  %v8731_v25 = vld [vmem:[#allocation13 + $0xf0] sm:$0xff]  }
 0x34d   :  { %v1134_v39 = vpop.f32.mrf.mxu0 }
 0x34e   :  { %v1193_v51 = vmax.f32 %v9833_v10, 0.0 }
 0x34f   :  { %v1137_v45 = vpop.f32.mrf.mxu0 }
 0x350   :  { %v9810_v49 = vadd.f32 %v9807_v42, %v1137_v45 }
 0x351   :  { %v1139_v50 = vpop.f32.mrf.mxu0 }
 0x352   :  { %v1194_v22 = vmax.f32 %v9810_v49, 0.0 }
 0x353   :  { %v1140_v52 = vpop.f32.mrf.mxu0 }
 0x354   :  { %v9813_v54 = vadd.f32 %v9807_v42, %v1140_v52 }
 0x355   :  { %v1142_v55 = vpop.f32.mrf.mxu0 }
 0x356   :  { %v1195_v31 = vmax.f32 %v9813_v54, 0.0 }
 0x357   :  { %v1145_v40 = vpop.f32.mrf.mxu0 }
 0x358   :  { %v9816_v41 = vadd.f32 %v9807_v42, %v1145_v40 }
 0x359   :  { %v1147_v44 = vpop.f32.mrf.mxu0 }
 0x35b   :  { %v1148_v34 = vpop.f32.mrf.mxu0 }
 0x35c   :  { %v9819_v53 = vadd.f32 %v9807_v42, %v1148_v34 }
 0x35d   :  { %v1150_v58 = vpop.f32.mrf.mxu0 }
 0x35f   :  { %v1153_v59 = vpop.f32.mrf.mxu0 }
 0x360   :  { %v9822_v60 = vadd.f32 %v9807_v42, %v1153_v59  ;;  %v8732_v59 = vld [vmem:[#allocation13 + $0xb0] sm:$0xff]  }
 0x361   :  { %v1155_v62 = vpop.f32.mrf.mxu0 }
 0x363   :  { %v1156_v4 = vpop.f32.mrf.mxu0 }
 0x364   :  { %v9825_v26 = vadd.f32 %v9807_v42, %v1156_v4  ;;  %v8730_v4 = vld [vmem:[#allocation13 + $0x2b8] sm:$0xff]  }
 0x365   :  { %v1158_v27 = vpop.f32.mrf.mxu0 }
 0x367   :  { %v1161_v6 = vpop.f32.mrf.mxu0 }
 0x368   :  { %v1162_v7 = vadd.f32 %v9807_v42, %v1161_v6 }
 0x369   :  { %v1163_v16 = vpop.f32.mrf.mxu0 }
 0x36a   :  { %v1200_v23 = vmax.f32 %v1162_v7, 0.0  ;;  %v8733_v7 = vld [vmem:[#allocation13 + $0x2f0] sm:$0xff]  }
 0x36b   :  { %v1164_v32 = vpop.f32.mrf.mxu0 }
 0x36c   :  { %v1224_v35 = vcombine.low %v1192_v18, %v1200_v23  ;;  %v1225_v37 = vcombine.high %v1192_v18, %v1200_v23  ;;  %v9836_v38 = vadd.f32 %v9807_v42, %v1164_v32 }
 0x36d   :  { %v1166_v46 = vpop.f32.mrf.mxu0 }
 0x36e   :  { %v1232_v47 = vrot.slane %v1224_v35, %v9830_v17  ;;  %v1239_v48 = vrot.slane %v1225_v37, %v9830_v17  ;;  %v1201_v56 = vmax.f32 %v9836_v38, 0.0  ;;  %v8735_v37 = vld [vmem:[#allocation13 + $0xe8] sm:$0xff]   ;;  %v1196_v46 = vmax.f32 %v9816_v41, 0.0  ;;  %v8746_v38 = vld [vmem:[#allocation13 + $0x298] sm:$0xff]  }
 0x36f   :  { %v1169_v57 = vpop.f32.mrf.mxu0 }
 0x370   :  { %v1240_v1 = vcombine.high %v1232_v47, %v1232_v47  ;;  %v1241_v8 = vcombine.high %v1239_v48, %v1239_v48  ;;  %v9843_v11 = vrot.slane %v1232_v47, %v9830_v17  ;;  %v9846_v12 = vrot.slane %v1239_v48, %v9830_v17  ;;  %v8736_v48 = vld [vmem:[#allocation13 + $0xa8] sm:$0xff]  }
 0x371   :  { %v1274_v13 = vcombine.low %v1193_v51, %v1201_v56  ;;  %v1170_v14 = vadd.f32 %v9807_v42, %v1169_v57  ;;  %v1171_v19 = vpop.f32.mrf.mxu0 }
 0x372   :  { %v1262_v43 = vrot.slane %v1240_v1, %v9830_v17  ;;  %v9858_v9 = vrot.slane %v1241_v8, %v9830_v17  ;;  %v1271_v33 = vcombine.high %v9846_v12, %v9846_v12  ;;  %v1688_v36 = vpack.c.bf16 %v9843_v11, %v9843_v11 }
 0x373   :  { %v9855_v61 = vrot.slane %v1274_v13, %v9830_v17  ;;  %v1202_v20 = vmax.f32 %v1170_v14, 0.0  ;;  %v1172_v21 = vpop.f32.mrf.mxu0  ;;  %v8734_v13 = vld [vmem:[#allocation13 + $0x2b0] sm:$0xff]   ;;  %v8739_v14 = vld [vmem:[#allocation13 + $0xe0] sm:$0xff]   ;;  %v1197_v19 = vmax.f32 %v9819_v53, 0.0 }
 0x374   :  { %v1173_v29 = vadd.f32 %v9807_v42, %v1172_v21  ;;  %v1689_v30 = vpack.c.bf16 %v1262_v43, %v1262_v43  ;;  %v1272_v24 = vcombine.high %v1262_v43, %v1262_v43  ;;  %v1273_v54 = vcombine.high %v9858_v9, %v9858_v9  ;;  %v8737_v21 = vld [vmem:[#allocation13 + $0x2e8] sm:$0xff]   ;;  %v8740_v53 = vld [vmem:[#allocation13 + $0xa0] sm:$0xff]  }
 0x375   :  { %v1290_v15 = vcombine.high %v9855_v61, %v9855_v61  ;;  %v1174_v0 = vpop.f32.mrf.mxu0  ;;  %v1324_v39 = vcombine.low %v1194_v22, %v1202_v20  ;;  %v1325_v45 = vcombine.high %v1194_v22, %v1202_v20  ;;  %v1694_v5 = vpack.c.bf16 %v1271_v33, %v1271_v33 }
 0x376   :  { %v1203_v49 = vmax.f32 %v1173_v29, 0.0  ;;  %5887 = vmatprep.mubr.bf16.mxu1 %v1689_v30  ;;  %v1691_v50 = vpack.c.bf16 %v1272_v24, %v1272_v24  ;;  %v1695_v2 = vpack.c.bf16 %v1273_v54, %v1273_v54 }
 0x377   :  { %v1177_v52 = vpop.f32.mrf.mxu0  ;;  %5888 = vmatmul.mubr.bf16.vlgmr.msra.gmra.mxu1 %v1688_v36  ;;  %v9872_v55 = vrot.slane %v1290_v15, %v9830_v17  ;;  %v9875_v40 = vrot.slane %v1324_v39, %v9830_v17  ;;  %v9878_v44 = vrot.slane %v1325_v45, %v9830_v17  ;;  %v8738_v15 = vld [vmem:[#allocation13 + $0x2a8] sm:$0xff]   ;;  %v8741_v45 = vld [vmem:[#allocation13 + $0x2e0] sm:$0xff]  }
 0x378   :  { %v1374_v34 = vcombine.low %v1195_v31, %v1203_v49  ;;  %v1375_v58 = vcombine.high %v1195_v31, %v1203_v49  ;;  %7875 = vmatpush3.bf16.msra.mxu1 %v8728_v63  ;;  %v1178_v62 = vadd.f32 %v9807_v42, %v1177_v52  ;;  %5927 = vmatprep.mubr.bf16.mxu1 %v1691_v50  ;;  %v8743_v49 = vld [vmem:[#allocation13 + $0xd8] sm:$0xff]  }
 0x379   :  { %v1179_v3 = vpop.f32.mrf.mxu0  ;;  %7876 = vmatprep.subr.bf16.mxu1 %v8731_v25  ;;  %v1322_v27 = vcombine.high %v9872_v55, %v9872_v55  ;;  %v9885_v28 = vrot.slane %v9875_v40, %v9830_v17  ;;  %v9889_v6 = vrot.slane %v9878_v44, %v9830_v17  ;;  %6007 = vmatprep.mubr.bf16.mxu0 %v1695_v2 }
 0x37a   :  { %v9892_v16 = vrot.slane %v1374_v34, %v9830_v17  ;;  %v9895_v18 = vrot.slane %v1375_v58, %v9830_v17  ;;  %v1204_v23 = vmax.f32 %v1178_v62, 0.0  ;;  %6008 = vmatmul.mubr.bf16.vlgmr.msra.gmra.mxu0 %v1694_v5  ;;  %v1340_v22 = vcombine.high %v9875_v40, %v9875_v40  ;;  %v8742_v3 = vld [vmem:[#allocation13 + $0x2a0] sm:$0xff]  }
 0x37b   :  { %v1180_v32 = vpop.f32.mrf.mxu0  ;;  %v1699_v35 = vpack.c.bf16 %v1322_v27, %v1322_v27  ;;  %7963 = vmatpush3.bf16.msra.mxu0 %v8730_v4  ;;  %v1341_v0 = vcombine.high %v9878_v44, %v9878_v44  ;;  %v1198_v34 = vmax.f32 %v9822_v60, 0.0  ;;  %v8747_v4 = vld [vmem:[#allocation13 + $0xd0] sm:$0xff]   ;;  %v1199_v5 = vmax.f32 %v9825_v26, 0.0 }
 0x37c   :  { %v1181_v47 = vadd.f32 %v9807_v42, %v1180_v32  ;;  %7877 = vmatpush3.bf16.msra.mxu1 %v8732_v59  ;;  %v9901_v57 = vrot.slane %v9892_v16, %v9830_v17  ;;  %v9905_v1 = vrot.slane %v9895_v18, %v9830_v17  ;;  %v1424_v41 = vcombine.low %v1196_v46, %v1204_v23  ;;  %v8744_v59 = vld [vmem:[#allocation13 + $0x98] sm:$0xff]  }
 0x37d   :  { %v1182_v8 = vpop.f32.mrf.mxu0  ;;  %v1425_v43 = vcombine.high %v1196_v46, %v1204_v23  ;;  %7964 = vmatprep.subr.bf16.mxu0 %v8733_v7  ;;  %6087 = vmatprep.mubr.bf16.mxu0 %v1699_v35  ;;  %v9934_v44 = vrot.slane %v1340_v22, %v9830_v17  ;;  %v1275_v32 = vcombine.high %v1193_v51, %v1201_v56 }
 0x37e   :  { %v1205_v20 = vmax.f32 %v1181_v47, 0.0  ;;  %7878 = vmatprep.subr.bf16.mxu1 %v8735_v37  ;;  %v9911_v30 = vrot.slane %v1424_v41, %v9830_v17  ;;  %v1390_v35 = vcombine.high %v9892_v16, %v9892_v16  ;;  %v9954_v37 = vrot.slane %v1341_v0, %v9830_v17  ;;  %v8748_v8 = vld [vmem:[#allocation13 + $0x90] sm:$0xff]   ;;  %v8756_v0 = vld [vmem:[#allocation13 + $0x80] sm:$0xff]  }
 0x37f   :  { %v1185_v29 = vpop.f32.mrf.mxu0  ;;  %v9914_v63 = vrot.slane %v1425_v43, %v9830_v17  ;;  %7965 = vmatpush3.bf16.msra.mxu0 %v8734_v13  ;;  %v1391_v10 = vcombine.high %v9895_v18, %v9895_v18  ;;  %v8749_v16 = vld [vmem:[#allocation13 + $0x2d0] sm:$0xff]   ;;  %v8751_v13 = vld [vmem:[#allocation13 + $0xc8] sm:$0xff]  }
 0x380   :  { %v1474_v24 = vcombine.low %v1197_v19, %v1205_v20  ;;  %v1475_v31 = vcombine.high %v1197_v19, %v1205_v20  ;;  %7879 = vmatpush3.bf16.msra.mxu1 %v8736_v48  ;;  %v1186_v33 = vadd.f32 %v9807_v42, %v1185_v29  ;;  %v9921_v25 = vrot.slane %v9911_v30, %v9830_v17  ;;  %v8752_v43 = vld [vmem:[#allocation13 + $0x88] sm:$0xff]   ;;  %v8750_v29 = vld [vmem:[#allocation13 + $0x290] sm:$0xff]  }
 0x381   :  { %v1187_v36 = vpop.f32.mrf.mxu0  ;;  %7880 = vmatprep.subr.bf16.mxu1 %v8739_v14  ;;  %v9925_v39 = vrot.slane %v9914_v63, %v9830_v17  ;;  %7966 = vmatprep.subr.bf16.mxu0 %v8737_v21  ;;  %v9973_v14 = vrot.slane %v1275_v32, %v9830_v17  ;;  %v1440_v19 = vcombine.high %v9911_v30, %v9911_v30  ;;  %v8755_v30 = vld [vmem:[#allocation13 + $0xc0] sm:$0xff]  }
 0x382   :  { %v9928_v50 = vrot.slane %v1474_v24, %v9830_v17  ;;  %v9931_v52 = vrot.slane %v1475_v31, %v9830_v17  ;;  %v1206_v54 = vmax.f32 %v1186_v33, 0.0  ;;  %v9984_v20 = vrot.slane %v1390_v35, %v9830_v17  ;;  %v8753_v31 = vld [vmem:[#allocation13 + $0x2c8] sm:$0xff]  }
 0x383   :  { %v1188_v40 = vpop.f32.mrf.mxu0  ;;  %7967 = vmatpush3.bf16.msra.mxu0 %v8738_v15  ;;  %v1441_v24 = vcombine.high %v9914_v63, %v9914_v63  ;;  %v1291_v33 = vcombine.high %v9973_v14, %v9973_v14  ;;  %v10004_v15 = vrot.slane %v1440_v19, %v9830_v17  ;;  %v8766_v19 = vld [vmem:[#allocation13 + $0x3b0] sm:$0xff]  }
 0x384   :  { %v1189_v58 = vadd.f32 %v9807_v42, %v1188_v40  ;;  %7881 = vmatpush3.bf16.msra.mxu1 %v8740_v53  ;;  %v9940_v62 = vrot.slane %v9928_v50, %v9830_v17  ;;  %v9944_v2 = vrot.slane %v9931_v52, %v9830_v17  ;;  %v1524_v7 = vcombine.low %v1198_v34, %v1206_v54  ;;  %v8745_v42 = vld [vmem:[#allocation13 + $0x2d8] sm:$0xff]  }
 0x385   :  { %v1190_v27 = vpop.f32.mrf.mxu0  ;;  %v1525_v60 = vcombine.high %v1198_v34, %v1206_v54  ;;  %7968 = vmatprep.subr.bf16.mxu0 %v8741_v45  ;;  %7882 = vmatprep.subr.bf16.mxu1 %v8743_v49  ;;  %v9997_v53 = vrot.slane %v1391_v10, %v9830_v17  ;;  %v1490_v36 = vcombine.high %v9928_v50, %v9928_v50  ;;  %v8754_v45 = vld [vmem:[#allocation13 + $0x288] sm:$0xff]   ;;  %v8759_v54 = vld [vmem:[#allocation13 + $0x178] sm:$0xff]   ;;  %v8757_v50 = vld [vmem:[#allocation13 + $0x2c0] sm:$0xff]  }
 0x386   :  { %v1207_v23 = vmax.f32 %v1189_v58, 0.0  ;;  %v9957_v46 = vrot.slane %v1524_v7, %v9830_v17  ;;  %v1491_v63 = vcombine.high %v9931_v52, %v9931_v52  ;;  %v1270_v49 = vcombine.high %v9843_v11, %v9843_v11  ;;  %v8760_v11 = vld [vmem:[#allocation13 + $0x138] sm:$0xff]  }
 0x387   :  { %v9960_v26 = vrot.slane %v1525_v60, %v9830_v17  ;;  %7969 = vmatpush3.bf16.msra.mxu0 %v8742_v3  ;;  %v10012_v40 = vrot.slane %v9855_v61, %v9830_v17  ;;  %v10015_v34 = vrot.slane %v1441_v24, %v9830_v17  ;;  %v10020_v52 = vrot.slane %v1291_v33, %v9830_v17  ;;  %v8758_v3 = vld [vmem:[#allocation13 + $0x280] sm:$0xff]   ;;  %v8775_v24 = vld [vmem:[#allocation13 + $0x158] sm:$0xff]  }
 0x388   :  { %v1574_v47 = vcombine.low %v1199_v5, %v1207_v23  ;;  %v1575_v48 = vcombine.high %v1199_v5, %v1207_v23  ;;  %7883 = vmatpush3.bf16.msra.mxu1 %v8744_v59  ;;  %v9966_v56 = vrot.slane %v9957_v46, %v9830_v17  ;;  %7970 = vmatprep.subr.bf16.mxu0 %v8745_v42  ;;  %v8761_v23 = vld [vmem:[#allocation13 + $0x3f8] sm:$0xff]  }
 0x389   :  { %7884 = vmatprep.subr.bf16.mxu1 %v8747_v4  ;;  %v9970_v51 = vrot.slane %v9960_v26, %v9830_v17  ;;  %v1540_v58 = vcombine.high %v9957_v46, %v9957_v46  ;;  %v10023_v59 = vrot.slane %v1490_v36, %v9830_v17  ;;  %v1690_v61 = vpack.c.bf16 %v1270_v49, %v1270_v49  ;;  %v8763_v4 = vld [vmem:[#allocation13 + $0x170] sm:$0xff]   ;;  %v8776_v33 = vld [vmem:[#allocation13 + $0x118] sm:$0xff]   ;;  %v8774_v36 = vld [vmem:[#allocation13 + $0x3a0] sm:$0xff]  }
 0x38a   :  { %v9978_v41 = vrot.slane %v1574_v47, %v9830_v17  ;;  %v9981_v18 = vrot.slane %v1575_v48, %v9830_v17  ;;  %v10026_v27 = vrot.slane %v1491_v63, %v9830_v17  ;;  %v1541_v5 = vcombine.high %v9960_v26, %v9960_v26  ;;  %v8764_v46 = vld [vmem:[#allocation13 + $0x130] sm:$0xff]   ;;  %v8762_v26 = vld [vmem:[#allocation13 + $0x3b8] sm:$0xff]  }
 0x38b   :  { %7971 = vmatpush3.bf16.msra.mxu0 %v8746_v38  ;;  %v1693_v7 = vpack.c.bf16 %v9858_v9, %v9858_v9  ;;  %v1320_v60 = vcombine.high %v10012_v40, %v10012_v40  ;;  %v1323_v32 = vcombine.high %v10020_v52, %v10020_v52  ;;  %v10039_v35 = vrot.slane %v1540_v58, %v9830_v17  ;;  %v8765_v48 = vld [vmem:[#allocation13 + $0x3f0] sm:$0xff]   ;;  %v8777_v63 = vld [vmem:[#allocation13 + $0x3d8] sm:$0xff]   ;;  %v8784_v58 = vld [vmem:[#allocation13 + $0x108] sm:$0xff]  }
 0x38c   :  { %7885 = vmatpush3.bf16.msra.mxu1 %v8748_v8  ;;  %v9988_v21 = vrot.slane %v9978_v41, %v9830_v17  ;;  %v9992_v22 = vrot.slane %v9981_v18, %v9830_v17  ;;  %7972 = vmatprep.subr.bf16.mxu0 %v8749_v16  ;;  %v1590_v42 = vcombine.high %v9978_v41, %v9978_v41  ;;  %v8767_v8 = vld [vmem:[#allocation13 + $0x168] sm:$0xff]   ;;  %v8771_v41 = vld [vmem:[#allocation13 + $0x160] sm:$0xff]   ;;  %v8778_v49 = vld [vmem:[#allocation13 + $0x398] sm:$0xff]  }
 0x38d   :  { %7886 = vmatprep.subr.bf16.mxu1 %v8751_v13  ;;  %v1591_v9 = vcombine.high %v9981_v18, %v9981_v18  ;;  %v1698_v47 = vpack.c.bf16 %v1320_v60, %v1320_v60  ;;  %v10044_v38 = vrot.slane %v1541_v5, %v9830_v17  ;;  %v1703_v10 = vpack.c.bf16 %v1323_v32, %v1323_v32  ;;  %v8768_v13 = vld [vmem:[#allocation13 + $0x128] sm:$0xff]   ;;  %v8790_v32 = vld [vmem:[#allocation13 + $0x380] sm:$0xff]  }
 0x38e   :  { %v10047_v16 = vrot.slane %v1590_v42, %v9830_v17  ;;  %v8786_v5 = vld [vmem:[#allocation13 + $0x388] sm:$0xff]   ;;  %v10054_v60 = vrot.slane %v9973_v14, %v9830_v17  ;;  %v8792_v42 = vld [vmem:[#allocation13 + $0x238] sm:$0xff]   ;;  %v1372_v14 = vcombine.high %v9934_v44, %v9934_v44 }
 0x38f   :  { %7973 = vmatpush3.bf16.msra.mxu0 %v8750_v29  ;;  %v10050_v18 = vrot.slane %v1591_v9, %v9830_v17  ;;  %v8772_v29 = vld [vmem:[#allocation13 + $0x120] sm:$0xff]   ;;  %v8795_v9 = vld [vmem:[#allocation13 + $0x270] sm:$0xff]   ;;  %v8793_v17 = vld [vmem:[#allocation13 + $0x4f8] sm:$0xff]  }
 0x390   :  { %7887 = vmatpush3.bf16.msra.mxu1 %v8752_v43  ;;  %7974 = vmatprep.subr.bf16.mxu0 %v8753_v31  ;;  %v8769_v43 = vld [vmem:[#allocation13 + $0x3e8] sm:$0xff]   ;;  %v8773_v31 = vld [vmem:[#allocation13 + $0x3e0] sm:$0xff]  }
 0x391   :  { %7888 = vmatprep.subr.bf16.mxu1 %v8755_v30  ;;  %v8770_v30 = vld [vmem:[#allocation13 + $0x3a8] sm:$0xff]  }
 0x393   :  { %7975 = vmatpush3.bf16.msra.mxu0 %v8754_v45  ;;  %v8780_v45 = vld [vmem:[#allocation13 + $0x110] sm:$0xff]  }
 0x394   :  { %7889 = vmatpush3.bf16.msra.mxu1 %v8756_v0  ;;  %7976 = vmatprep.subr.bf16.mxu0 %v8757_v50  ;;  %v8779_v0 = vld [vmem:[#allocation13 + $0x150] sm:$0xff]  }
 0x395   :  { %7896 = vmatprep.subr.bf16.mxu1 %v8759_v54  ;;  %v8783_v54 = vld [vmem:[#allocation13 + $0x148] sm:$0xff]   ;;  %v8781_v50 = vld [vmem:[#allocation13 + $0x3d0] sm:$0xff]  }
 0x397   :  { %5928 = vmatmul.mubr.bf16.vlgmr.msra.gmra.mxu1 %v1690_v61  ;;  %7977 = vmatpush3.bf16.msra.mxu0 %v8758_v3  ;;  %v8787_v3 = vld [vmem:[#allocation13 + $0x140] sm:$0xff]   ;;  %v8785_v61 = vld [vmem:[#allocation13 + $0x3c8] sm:$0xff]  }
 0x398   :  { %7897 = vmatpush3.bf16.msra.mxu1 %v8760_v11  ;;  %5967 = vmatprep.mubr.bf16.mxu1 %v1693_v7  ;;  %v8782_v11 = vld [vmem:[#allocation13 + $0x390] sm:$0xff]   ;;  %v8791_v7 = vld [vmem:[#allocation13 + $0x278] sm:$0xff]  }
 0x399   :  { %7898 = vmatprep.subr.bf16.mxu1 %v8763_v4  ;;  %8006 = vmatprep.subr.bf16.mxu0 %v8761_v23  ;;  %v8788_v4 = vld [vmem:[#allocation13 + $0x100] sm:$0xff]  }
 0x39a   :  { %6088 = vmatmul.mubr.bf16.vlgmr.msra.gmra.mxu0 %v1698_v47  ;;  %v8789_v23 = vld [vmem:[#allocation13 + $0x3c0] sm:$0xff]   ;;  %v1321_v47 = vcombine.high %v10054_v60, %v10054_v60 }
 0x39b   :  { %8007 = vmatpush3.bf16.msra.mxu0 %v8762_v26  ;;  %6167 = vmatprep.mubr.bf16.mxu0 %v1703_v10  ;;  %v1697_v26 = vpack.c.bf16 %v9872_v55, %v9872_v55  ;;  %v8797_v10 = vld [vmem:[#allocation13 + $0x4f0] sm:$0xff]   ;;  %v8800_v55 = vld [vmem:[#allocation13 + $0x228] sm:$0xff]  }
 0x39c   :  { %7899 = vmatpush3.bf16.msra.mxu1 %v8764_v46  ;;  %8008 = vmatprep.subr.bf16.mxu0 %v8765_v48  ;;  %v1692_v46 = vpack.c.bf16 %v9846_v12, %v9846_v12  ;;  %v8796_v48 = vld [vmem:[#allocation13 + $0x230] sm:$0xff]   ;;  %v1702_v12 = vpack.c.bf16 %v1321_v47, %v1321_v47  ;;  %v1701_v47 = vpack.c.bf16 %v10020_v52, %v10020_v52  ;;  %v8832_v52 = vld [vmem:[#allocation13 + $0x328] sm:$0xff]  }
 0x39d   :  { %7900 = vmatprep.subr.bf16.mxu1 %v8767_v8  ;;  %v8794_v8 = vld [vmem:[#allocation13 + $0x4b8] sm:$0xff]  }
 0x39f   :  { %8009 = vmatpush3.bf16.msra.mxu0 %v8766_v19  ;;  %v1707_v19 = vpack.c.bf16 %v1372_v14, %v1372_v14  ;;  %v8825_v14 = vld [vmem:[#allocation13 + $0x5f8] sm:$0xff]  }
 0x3a0   :  { %7901 = vmatpush3.bf16.msra.mxu1 %v8768_v13  ;;  %8010 = vmatprep.subr.bf16.mxu0 %v8769_v43  ;;  %v8799_v13 = vld [vmem:[#allocation13 + $0x268] sm:$0xff]   ;;  %v8803_v43 = vld [vmem:[#allocation13 + $0x260] sm:$0xff]  }
 0x3a1   :  { %7902 = vmatprep.subr.bf16.mxu1 %v8771_v41  ;;  %v8798_v41 = vld [vmem:[#allocation13 + $0x4b0] sm:$0xff]  }
 0x3a3   :  { %8011 = vmatpush3.bf16.msra.mxu0 %v8770_v30  ;;  %v8804_v30 = vld [vmem:[#allocation13 + $0x220] sm:$0xff]  }
 0x3a4   :  { %7903 = vmatpush3.bf16.msra.mxu1 %v8772_v29  ;;  %8012 = vmatprep.subr.bf16.mxu0 %v8773_v31  ;;  %v8801_v29 = vld [vmem:[#allocation13 + $0x4e8] sm:$0xff]   ;;  %v8807_v31 = vld [vmem:[#allocation13 + $0x258] sm:$0xff]  }
 0x3a5   :  { %7904 = vmatprep.subr.bf16.mxu1 %v8775_v24  ;;  %v8802_v24 = vld [vmem:[#allocation13 + $0x4a8] sm:$0xff]  }
 0x3a7   :  { %8013 = vmatpush3.bf16.msra.mxu0 %v8774_v36  ;;  %v8808_v36 = vld [vmem:[#allocation13 + $0x218] sm:$0xff]  }
 0x3a8   :  { %7905 = vmatpush3.bf16.msra.mxu1 %v8776_v33  ;;  %8014 = vmatprep.subr.bf16.mxu0 %v8777_v63  ;;  %v8805_v33 = vld [vmem:[#allocation13 + $0x4e0] sm:$0xff]   ;;  %v8811_v63 = vld [vmem:[#allocation13 + $0x250] sm:$0xff]  }
 0x3a9   :  { %7906 = vmatprep.subr.bf16.mxu1 %v8779_v0  ;;  %v8806_v0 = vld [vmem:[#allocation13 + $0x4a0] sm:$0xff]  }
 0x3ab   :  { %8015 = vmatpush3.bf16.msra.mxu0 %v8778_v49  ;;  %v8812_v49 = vld [vmem:[#allocation13 + $0x210] sm:$0xff]  }
 0x3ac   :  { %7907 = vmatpush3.bf16.msra.mxu1 %v8780_v45  ;;  %8016 = vmatprep.subr.bf16.mxu0 %v8781_v50  ;;  %v8809_v45 = vld [vmem:[#allocation13 + $0x4d8] sm:$0xff]   ;;  %v8815_v50 = vld [vmem:[#allocation13 + $0x248] sm:$0xff]  }
 0x3ad   :  { %7908 = vmatprep.subr.bf16.mxu1 %v8783_v54  ;;  %v8810_v54 = vld [vmem:[#allocation13 + $0x498] sm:$0xff]  }
 0x3af   :  { %8017 = vmatpush3.bf16.msra.mxu0 %v8782_v11  ;;  %v8816_v11 = vld [vmem:[#allocation13 + $0x208] sm:$0xff]  }
 0x3b0   :  { %7909 = vmatpush3.bf16.msra.mxu1 %v8784_v58  ;;  %8018 = vmatprep.subr.bf16.mxu0 %v8785_v61  ;;  %v8813_v58 = vld [vmem:[#allocation13 + $0x4d0] sm:$0xff]   ;;  %v8819_v61 = vld [vmem:[#allocation13 + $0x240] sm:$0xff]  }
 0x3b1   :  { %7910 = vmatprep.subr.bf16.mxu1 %v8787_v3  ;;  %v8814_v3 = vld [vmem:[#allocation13 + $0x490] sm:$0xff]  }
 0x3b3   :  { %8019 = vmatpush3.bf16.msra.mxu0 %v8786_v5  ;;  %v8820_v5 = vld [vmem:[#allocation13 + $0x200] sm:$0xff]  }
 0x3b4   :  { %7911 = vmatpush3.bf16.msra.mxu1 %v8788_v4  ;;  %8020 = vmatprep.subr.bf16.mxu0 %v8789_v23  ;;  %v8817_v4 = vld [vmem:[#allocation13 + $0x4c8] sm:$0xff]   ;;  %v8823_v23 = vld [vmem:[#allocation13 + $0x378] sm:$0xff]  }
 0x3b5   :  { %7940 = vmatprep.subr.bf16.mxu1 %v8791_v7  ;;  %v8818_v7 = vld [vmem:[#allocation13 + $0x488] sm:$0xff]  }
 0x3b7   :  { %5968 = vmatmul.mubr.bf16.vlgmr.msra.gmra.mxu1 %v1692_v46  ;;  %8021 = vmatpush3.bf16.msra.mxu0 %v8790_v32  ;;  %v8824_v32 = vld [vmem:[#allocation13 + $0x338] sm:$0xff]   ;;  %v8822_v46 = vld [vmem:[#allocation13 + $0x480] sm:$0xff]  }
 0x3b8   :  { %7941 = vmatpush3.bf16.msra.mxu1 %v8792_v42  ;;  %6047 = vmatprep.mubr.bf16.mxu1 %v1697_v26  ;;  %v8821_v42 = vld [vmem:[#allocation13 + $0x4c0] sm:$0xff]   ;;  %v8827_v26 = vld [vmem:[#allocation13 + $0x370] sm:$0xff]  }
 0x3b9   :  { %7942 = vmatprep.subr.bf16.mxu1 %v8795_v9  ;;  %8050 = vmatprep.subr.bf16.mxu0 %v8793_v17  ;;  %v1696_v9 = vpack.c.bf16 %v10012_v40, %v10012_v40  ;;  %v1370_v17 = vcombine.high %v9885_v28, %v9885_v28 }
 0x3ba   :  { %6168 = vmatmul.mubr.bf16.vlgmr.msra.gmra.mxu0 %v1702_v12  ;;  %v8826_v12 = vld [vmem:[#allocation13 + $0x5b8] sm:$0xff]  }
 0x3bb   :  { %8051 = vmatpush3.bf16.msra.mxu0 %v8794_v8  ;;  %6247 = vmatprep.mubr.bf16.mxu0 %v1707_v19  ;;  %v8828_v8 = vld [vmem:[#allocation13 + $0x330] sm:$0xff]   ;;  %v1706_v40 = vpack.c.bf16 %v1370_v17, %v1370_v17  ;;  %v8857_v17 = vld [vmem:[#allocation13 + $0x6f8] sm:$0xff]  }
 0x3bc   :  { %7943 = vmatpush3.bf16.msra.mxu1 %v8796_v48  ;;  %8052 = vmatprep.subr.bf16.mxu0 %v8797_v10  ;;  %v1373_v48 = vcombine.high %v9954_v37, %v9954_v37  ;;  %v8829_v10 = vld [vmem:[#allocation13 + $0x5f0] sm:$0xff]  }
 0x3bd   :  { %7944 = vmatprep.subr.bf16.mxu1 %v8799_v13  ;;  %v8831_v13 = vld [vmem:[#allocation13 + $0x368] sm:$0xff]  }
 0x3be   :  { %v1711_v19 = vpack.c.bf16 %v1373_v48, %v1373_v48  ;;  %v8860_v48 = vld [vmem:[#allocation13 + $0x430] sm:$0xff]  }
 0x3bf   :  { %8053 = vmatpush3.bf16.msra.mxu0 %v8798_v41  ;;  %v8835_v41 = vld [vmem:[#allocation13 + $0x360] sm:$0xff]  }
 0x3c0   :  { %7945 = vmatpush3.bf16.msra.mxu1 %v8800_v55  ;;  %8054 = vmatprep.subr.bf16.mxu0 %v8801_v29  ;;  %v8830_v55 = vld [vmem:[#allocation13 + $0x5b0] sm:$0xff]   ;;  %v8836_v29 = vld [vmem:[#allocation13 + $0x320] sm:$0xff]  }
 0x3c1   :  { %7946 = vmatprep.subr.bf16.mxu1 %v8803_v43  ;;  %v8833_v43 = vld [vmem:[#allocation13 + $0x5e8] sm:$0xff]  }
 0x3c3   :  { %8055 = vmatpush3.bf16.msra.mxu0 %v8802_v24  ;;  %v8839_v24 = vld [vmem:[#allocation13 + $0x358] sm:$0xff]  }
 0x3c4   :  { %7947 = vmatpush3.bf16.msra.mxu1 %v8804_v30  ;;  %8056 = vmatprep.subr.bf16.mxu0 %v8805_v33  ;;  %v8834_v30 = vld [vmem:[#allocation13 + $0x5a8] sm:$0xff]   ;;  %v8840_v33 = vld [vmem:[#allocation13 + $0x318] sm:$0xff]  }
 0x3c5   :  { %7948 = vmatprep.subr.bf16.mxu1 %v8807_v31  ;;  %v8837_v31 = vld [vmem:[#allocation13 + $0x5e0] sm:$0xff]  }
 0x3c7   :  { %8057 = vmatpush3.bf16.msra.mxu0 %v8806_v0  ;;  %v8843_v0 = vld [vmem:[#allocation13 + $0x350] sm:$0xff]  }
 0x3c8   :  { %7949 = vmatpush3.bf16.msra.mxu1 %v8808_v36  ;;  %8058 = vmatprep.subr.bf16.mxu0 %v8809_v45  ;;  %v8838_v36 = vld [vmem:[#allocation13 + $0x5a0] sm:$0xff]   ;;  %v8844_v45 = vld [vmem:[#allocation13 + $0x310] sm:$0xff]  }
 0x3c9   :  { %7950 = vmatprep.subr.bf16.mxu1 %v8811_v63  ;;  %v8841_v63 = vld [vmem:[#allocation13 + $0x5d8] sm:$0xff]  }
 0x3cb   :  { %8059 = vmatpush3.bf16.msra.mxu0 %v8810_v54  ;;  %v8847_v54 = vld [vmem:[#allocation13 + $0x348] sm:$0xff]  }
 0x3cc   :  { %7951 = vmatpush3.bf16.msra.mxu1 %v8812_v49  ;;  %8060 = vmatprep.subr.bf16.mxu0 %v8813_v58  ;;  %v8842_v49 = vld [vmem:[#allocation13 + $0x598] sm:$0xff]   ;;  %v8848_v58 = vld [vmem:[#allocation13 + $0x308] sm:$0xff]  }
 0x3cd   :  { %7952 = vmatprep.subr.bf16.mxu1 %v8815_v50  ;;  %v8845_v50 = vld [vmem:[#allocation13 + $0x5d0] sm:$0xff]  }
 0x3cf   :  { %8061 = vmatpush3.bf16.msra.mxu0 %v8814_v3  ;;  %v8851_v3 = vld [vmem:[#allocation13 + $0x340] sm:$0xff]  }
 0x3d0   :  { %7953 = vmatpush3.bf16.msra.mxu1 %v8816_v11  ;;  %8062 = vmatprep.subr.bf16.mxu0 %v8817_v4  ;;  %v8846_v11 = vld [vmem:[#allocation13 + $0x590] sm:$0xff]   ;;  %v8852_v4 = vld [vmem:[#allocation13 + $0x300] sm:$0xff]  }
 0x3d1   :  { %7954 = vmatprep.subr.bf16.mxu1 %v8819_v61  ;;  %v8849_v61 = vld [vmem:[#allocation13 + $0x5c8] sm:$0xff]  }
 0x3d3   :  { %8063 = vmatpush3.bf16.msra.mxu0 %v8818_v7  ;;  %v8855_v7 = vld [vmem:[#allocation13 + $0x478] sm:$0xff]  }
 0x3d4   :  { %7955 = vmatpush3.bf16.msra.mxu1 %v8820_v5  ;;  %8064 = vmatprep.subr.bf16.mxu0 %v8821_v42  ;;  %v8850_v5 = vld [vmem:[#allocation13 + $0x588] sm:$0xff]   ;;  %v8856_v42 = vld [vmem:[#allocation13 + $0x438] sm:$0xff]  }
 0x3d5   :  { %7984 = vmatprep.subr.bf16.mxu1 %v8823_v23  ;;  %v8853_v23 = vld [vmem:[#allocation13 + $0x5c0] sm:$0xff]  }
 0x3d7   :  { %6048 = vmatmul.mubr.bf16.vlgmr.msra.gmra.mxu1 %v1696_v9  ;;  %8065 = vmatpush3.bf16.msra.mxu0 %v8822_v46  ;;  %v1700_v46 = vpack.c.bf16 %v10054_v60, %v10054_v60  ;;  %v8859_v9 = vld [vmem:[#allocation13 + $0x470] sm:$0xff]  }
 0x3d8   :  { %7985 = vmatpush3.bf16.msra.mxu1 %v8824_v32  ;;  %6127 = vmatprep.mubr.bf16.mxu1 %v1701_v47  ;;  %v8854_v32 = vld [vmem:[#allocation13 + $0x580] sm:$0xff]   ;;  %v1371_v47 = vcombine.high %v9889_v6, %v9889_v6 }
 0x3d9   :  { %7986 = vmatprep.subr.bf16.mxu1 %v8827_v26  ;;  %8094 = vmatprep.subr.bf16.mxu0 %v8825_v14  ;;  %v1705_v26 = vpack.c.bf16 %v9934_v44, %v9934_v44  ;;  %v1422_v14 = vcombine.high %v9984_v20, %v9984_v20  ;;  %v8864_v44 = vld [vmem:[#allocation13 + $0x428] sm:$0xff]  }
 0x3da   :  { %6248 = vmatmul.mubr.bf16.vlgmr.msra.gmra.mxu0 %v1706_v40  ;;  %v1710_v60 = vpack.c.bf16 %v1371_v47, %v1371_v47  ;;  %v8863_v40 = vld [vmem:[#allocation13 + $0x468] sm:$0xff]   ;;  %v8892_v47 = vld [vmem:[#allocation13 + $0x530] sm:$0xff]  }
 0x3db   :  { %8095 = vmatpush3.bf16.msra.mxu0 %v8826_v12  ;;  %6327 = vmatprep.mubr.bf16.mxu0 %v1711_v19  ;;  %v8861_v12 = vld [vmem:[#allocation13 + $0x6f0] sm:$0xff]   ;;  %v8867_v19 = vld [vmem:[#allocation13 + $0x460] sm:$0xff]  }
 0x3dc   :  { %7987 = vmatpush3.bf16.msra.mxu1 %v8828_v8  ;;  %8096 = vmatprep.subr.bf16.mxu0 %v8829_v10  ;;  %v8858_v8 = vld [vmem:[#allocation13 + $0x6b8] sm:$0xff]   ;;  %v1715_v10 = vpack.c.bf16 %v1422_v14, %v1422_v14  ;;  %v8893_v14 = vld [vmem:[#allocation13 + $0x7f0] sm:$0xff]  }
 0x3dd   :  { %7988 = vmatprep.subr.bf16.mxu1 %v8831_v13  ;;  %v8862_v13 = vld [vmem:[#allocation13 + $0x6b0] sm:$0xff]  }
 0x3df   :  { %8097 = vmatpush3.bf16.msra.mxu0 %v8830_v55  ;;  %v8868_v55 = vld [vmem:[#allocation13 + $0x420] sm:$0xff]  }
 0x3e0   :  { %7989 = vmatpush3.bf16.msra.mxu1 %v8832_v52  ;;  %8098 = vmatprep.subr.bf16.mxu0 %v8833_v43  ;;  %v8865_v52 = vld [vmem:[#allocation13 + $0x6e8] sm:$0xff]   ;;  %v8871_v43 = vld [vmem:[#allocation13 + $0x458] sm:$0xff]  }
 0x3e1   :  { %7990 = vmatprep.subr.bf16.mxu1 %v8835_v41  ;;  %v8866_v41 = vld [vmem:[#allocation13 + $0x6a8] sm:$0xff]  }
 0x3e3   :  { %8099 = vmatpush3.bf16.msra.mxu0 %v8834_v30  ;;  %v8872_v30 = vld [vmem:[#allocation13 + $0x418] sm:$0xff]  }
 0x3e4   :  { %7991 = vmatpush3.bf16.msra.mxu1 %v8836_v29  ;;  %8100 = vmatprep.subr.bf16.mxu0 %v8837_v31  ;;  %v8869_v29 = vld [vmem:[#allocation13 + $0x6e0] sm:$0xff]   ;;  %v8875_v31 = vld [vmem:[#allocation13 + $0x450] sm:$0xff]  }
 0x3e5   :  { %7992 = vmatprep.subr.bf16.mxu1 %v8839_v24  ;;  %v8870_v24 = vld [vmem:[#allocation13 + $0x6a0] sm:$0xff]  }
 0x3e7   :  { %8101 = vmatpush3.bf16.msra.mxu0 %v8838_v36  ;;  %v8876_v36 = vld [vmem:[#allocation13 + $0x410] sm:$0xff]  }
 0x3e8   :  { %7993 = vmatpush3.bf16.msra.mxu1 %v8840_v33  ;;  %8102 = vmatprep.subr.bf16.mxu0 %v8841_v63  ;;  %v8873_v33 = vld [vmem:[#allocation13 + $0x6d8] sm:$0xff]   ;;  %v8879_v63 = vld [vmem:[#allocation13 + $0x448] sm:$0xff]  }
 0x3e9   :  { %7994 = vmatprep.subr.bf16.mxu1 %v8843_v0  ;;  %v8874_v0 = vld [vmem:[#allocation13 + $0x698] sm:$0xff]  }
 0x3eb   :  { %8103 = vmatpush3.bf16.msra.mxu0 %v8842_v49  ;;  %v8880_v49 = vld [vmem:[#allocation13 + $0x408] sm:$0xff]  }
 0x3ec   :  { %7995 = vmatpush3.bf16.msra.mxu1 %v8844_v45  ;;  %8104 = vmatprep.subr.bf16.mxu0 %v8845_v50  ;;  %v8877_v45 = vld [vmem:[#allocation13 + $0x6d0] sm:$0xff]   ;;  %v8883_v50 = vld [vmem:[#allocation13 + $0x440] sm:$0xff]  }
 0x3ed   :  { %7996 = vmatprep.subr.bf16.mxu1 %v8847_v54  ;;  %v8878_v54 = vld [vmem:[#allocation13 + $0x690] sm:$0xff]  }
 0x3ef   :  { %8105 = vmatpush3.bf16.msra.mxu0 %v8846_v11  ;;  %v8884_v11 = vld [vmem:[#allocation13 + $0x400] sm:$0xff]  }
 0x3f0   :  { %7997 = vmatpush3.bf16.msra.mxu1 %v8848_v58  ;;  %8106 = vmatprep.subr.bf16.mxu0 %v8849_v61  ;;  %v8881_v58 = vld [vmem:[#allocation13 + $0x6c8] sm:$0xff]   ;;  %v8887_v61 = vld [vmem:[#allocation13 + $0x578] sm:$0xff]  }
 0x3f1   :  { %7998 = vmatprep.subr.bf16.mxu1 %v8851_v3  ;;  %v8882_v3 = vld [vmem:[#allocation13 + $0x688] sm:$0xff]  }
 0x3f3   :  { %8107 = vmatpush3.bf16.msra.mxu0 %v8850_v5  ;;  %v8888_v5 = vld [vmem:[#allocation13 + $0x538] sm:$0xff]  }
 0x3f4   :  { %7999 = vmatpush3.bf16.msra.mxu1 %v8852_v4  ;;  %8108 = vmatprep.subr.bf16.mxu0 %v8853_v23  ;;  %v8885_v4 = vld [vmem:[#allocation13 + $0x6c0] sm:$0xff]   ;;  %v1704_v23 = vpack.c.bf16 %v9885_v28, %v9885_v28 }
 0x3f5   :  { %8028 = vmatprep.subr.bf16.mxu1 %v8855_v7  ;;  %v8886_v7 = vld [vmem:[#allocation13 + $0x680] sm:$0xff]  }
 0x3f7   :  { %6128 = vmatmul.mubr.bf16.vlgmr.msra.gmra.mxu1 %v1700_v46  ;;  %8109 = vmatpush3.bf16.msra.mxu0 %v8854_v32  ;;  %v1709_v32 = vpack.c.bf16 %v9954_v37, %v9954_v37  ;;  %v1420_v46 = vcombine.high %v9901_v57, %v9901_v57  ;;  %v8896_v37 = vld [vmem:[#allocation13 + $0x528] sm:$0xff]  }
 0x3f8   :  { %8029 = vmatpush3.bf16.msra.mxu1 %v8856_v42  ;;  %6207 = vmatprep.mubr.bf16.mxu1 %v1705_v26  ;;  %v8891_v42 = vld [vmem:[#allocation13 + $0x570] sm:$0xff]   ;;  %v1423_v26 = vcombine.high %v9997_v53, %v9997_v53 }
 0x3f9   :  { %8030 = vmatprep.subr.bf16.mxu1 %v8859_v9  ;;  %8138 = vmatprep.subr.bf16.mxu0 %v8857_v17  ;;  %v8889_v9 = vld [vmem:[#allocation13 + $0x7f8] sm:$0xff]   ;;  %v1714_v28 = vpack.c.bf16 %v1420_v46, %v1420_v46 }
 0x3fa   :  { %6328 = vmatmul.mubr.bf16.vlgmr.msra.gmra.mxu0 %v1710_v60  ;;  %v8890_v17 = vld [vmem:[#allocation13 + $0x7b8] sm:$0xff]   ;;  %v8894_v60 = vld [vmem:[#allocation13 + $0x7b0] sm:$0xff]  }
 0x3fb   :  { %8139 = vmatpush3.bf16.msra.mxu0 %v8858_v8  ;;  %6407 = vmatprep.mubr.bf16.mxu0 %v1715_v10  ;;  %v1719_v8 = vpack.c.bf16 %v1423_v26, %v1423_v26  ;;  %v8900_v10 = vld [vmem:[#allocation13 + $0x520] sm:$0xff]   ;;  %v8922_v46 = vld [vmem:[#allocation13 + $0x8b8] sm:$0xff]  }
 0x3fc   :  { %8031 = vmatpush3.bf16.msra.mxu1 %v8860_v48  ;;  %8140 = vmatprep.subr.bf16.mxu0 %v8861_v12  ;;  %v8895_v48 = vld [vmem:[#allocation13 + $0x568] sm:$0xff]   ;;  %v8899_v12 = vld [vmem:[#allocation13 + $0x560] sm:$0xff]  }
 0x3fd   :  { %8032 = vmatprep.subr.bf16.mxu1 %v8863_v40  ;;  %v8897_v40 = vld [vmem:[#allocation13 + $0x7e8] sm:$0xff]  }
 0x3ff   :  { %8141 = vmatpush3.bf16.msra.mxu0 %v8862_v13  ;;  %v8903_v13 = vld [vmem:[#allocation13 + $0x558] sm:$0xff]  }
 0x400   :  { %8033 = vmatpush3.bf16.msra.mxu1 %v8864_v44  ;;  %8142 = vmatprep.subr.bf16.mxu0 %v8865_v52  ;;  %v8898_v44 = vld [vmem:[#allocation13 + $0x7a8] sm:$0xff]   ;;  %v8904_v52 = vld [vmem:[#allocation13 + $0x518] sm:$0xff]  }
 0x401   :  { %8034 = vmatprep.subr.bf16.mxu1 %v8867_v19  ;;  %v8901_v19 = vld [vmem:[#allocation13 + $0x7e0] sm:$0xff]  }
 0x403   :  { %8143 = vmatpush3.bf16.msra.mxu0 %v8866_v41  ;;  %v8907_v41 = vld [vmem:[#allocation13 + $0x550] sm:$0xff]  }
 0x404   :  { %8035 = vmatpush3.bf16.msra.mxu1 %v8868_v55  ;;  %8144 = vmatprep.subr.bf16.mxu0 %v8869_v29  ;;  %v8902_v55 = vld [vmem:[#allocation13 + $0x7a0] sm:$0xff]   ;;  %v8908_v29 = vld [vmem:[#allocation13 + $0x510] sm:$0xff]  }
 0x405   :  { %8036 = vmatprep.subr.bf16.mxu1 %v8871_v43  ;;  %v8905_v43 = vld [vmem:[#allocation13 + $0x7d8] sm:$0xff]  }
 0x407   :  { %8145 = vmatpush3.bf16.msra.mxu0 %v8870_v24  ;;  %v8911_v24 = vld [vmem:[#allocation13 + $0x548] sm:$0xff]  }
 0x408   :  { %8037 = vmatpush3.bf16.msra.mxu1 %v8872_v30  ;;  %8146 = vmatprep.subr.bf16.mxu0 %v8873_v33  ;;  %v8906_v30 = vld [vmem:[#allocation13 + $0x798] sm:$0xff]   ;;  %v8912_v33 = vld [vmem:[#allocation13 + $0x508] sm:$0xff]  }
 0x409   :  { %8038 = vmatprep.subr.bf16.mxu1 %v8875_v31  ;;  %v8909_v31 = vld [vmem:[#allocation13 + $0x7d0] sm:$0xff]  }
 0x40b   :  { %8147 = vmatpush3.bf16.msra.mxu0 %v8874_v0  ;;  %v8915_v0 = vld [vmem:[#allocation13 + $0x540] sm:$0xff]  }
 0x40c   :  { %8039 = vmatpush3.bf16.msra.mxu1 %v8876_v36  ;;  %8148 = vmatprep.subr.bf16.mxu0 %v8877_v45  ;;  %v8910_v36 = vld [vmem:[#allocation13 + $0x790] sm:$0xff]   ;;  %v8916_v45 = vld [vmem:[#allocation13 + $0x500] sm:$0xff]  }
 0x40d   :  { %8040 = vmatprep.subr.bf16.mxu1 %v8879_v63  ;;  %v8913_v63 = vld [vmem:[#allocation13 + $0x7c8] sm:$0xff]  }
 0x40f   :  { %8149 = vmatpush3.bf16.msra.mxu0 %v8878_v54  ;;  %v8919_v54 = vld [vmem:[#allocation13 + $0x678] sm:$0xff]  }
 0x410   :  { %8041 = vmatpush3.bf16.msra.mxu1 %v8880_v49  ;;  %8150 = vmatprep.subr.bf16.mxu0 %v8881_v58  ;;  %v8914_v49 = vld [vmem:[#allocation13 + $0x788] sm:$0xff]   ;;  %v8920_v58 = vld [vmem:[#allocation13 + $0x638] sm:$0xff]  }
 0x411   :  { %8042 = vmatprep.subr.bf16.mxu1 %v8883_v50  ;;  %v8917_v50 = vld [vmem:[#allocation13 + $0x7c0] sm:$0xff]  }
 0x413   :  { %8151 = vmatpush3.bf16.msra.mxu0 %v8882_v3  ;;  %v1708_v3 = vpack.c.bf16 %v9889_v6, %v9889_v6 }
 0x414   :  { %8043 = vmatpush3.bf16.msra.mxu1 %v8884_v11  ;;  %8152 = vmatprep.subr.bf16.mxu0 %v8885_v4  ;;  %v8918_v11 = vld [vmem:[#allocation13 + $0x780] sm:$0xff]   ;;  %v1713_v4 = vpack.c.bf16 %v9984_v20, %v9984_v20  ;;  %v8925_v20 = vld [vmem:[#allocation13 + $0x8f0] sm:$0xff]  }
 0x415   :  { %8072 = vmatprep.subr.bf16.mxu1 %v8887_v61  ;;  %v8923_v61 = vld [vmem:[#allocation13 + $0x670] sm:$0xff]  }
 0x417   :  { %6208 = vmatmul.mubr.bf16.vlgmr.msra.gmra.mxu1 %v1704_v23  ;;  %8153 = vmatpush3.bf16.msra.mxu0 %v8886_v7  ;;  %v8921_v7 = vld [vmem:[#allocation13 + $0x8f8] sm:$0xff]  }
 0x418   :  { %8073 = vmatpush3.bf16.msra.mxu1 %v8888_v5  ;;  %6287 = vmatprep.mubr.bf16.mxu1 %v1709_v32  ;;  %v1421_v5 = vcombine.high %v9905_v1, %v9905_v1  ;;  %v8924_v32 = vld [vmem:[#allocation13 + $0x630] sm:$0xff]  }
 0x419   :  { %8074 = vmatprep.subr.bf16.mxu1 %v8891_v42  ;;  %8182 = vmatprep.subr.bf16.mxu0 %v8889_v9  ;;  %v1472_v42 = vcombine.high %v10004_v15, %v10004_v15 }
 0x41a   :  { %6408 = vmatmul.mubr.bf16.vlgmr.msra.gmra.mxu0 %v1714_v28  ;;  %v1718_v9 = vpack.c.bf16 %v1421_v5, %v1421_v5  ;;  %v1712_v5 = vpack.c.bf16 %v9901_v57, %v9901_v57 }
 0x41b   :  { %8183 = vmatpush3.bf16.msra.mxu0 %v8890_v17  ;;  %6487 = vmatprep.mubr.bf16.mxu0 %v1719_v8  ;;  %v1723_v17 = vpack.c.bf16 %v1472_v42, %v1472_v42  ;;  %v1470_v42 = vcombine.high %v9921_v25, %v9921_v25 }
 0x41c   :  { %8075 = vmatpush3.bf16.msra.mxu1 %v8892_v47  ;;  %8184 = vmatprep.subr.bf16.mxu0 %v8893_v14  ;;  %v8927_v47 = vld [vmem:[#allocation13 + $0x668] sm:$0xff]  }
 0x41d   :  { %8076 = vmatprep.subr.bf16.mxu1 %v8895_v48  ;;  %v8928_v48 = vld [vmem:[#allocation13 + $0x628] sm:$0xff]  }
 0x41f   :  { %8185 = vmatpush3.bf16.msra.mxu0 %v8894_v60  ;;  %v8931_v60 = vld [vmem:[#allocation13 + $0x660] sm:$0xff]  }
 0x420   :  { %8077 = vmatpush3.bf16.msra.mxu1 %v8896_v37  ;;  %8186 = vmatprep.subr.bf16.mxu0 %v8897_v40  ;;  %v8926_v37 = vld [vmem:[#allocation13 + $0x8b0] sm:$0xff]   ;;  %v8929_v40 = vld [vmem:[#allocation13 + $0x8e8] sm:$0xff]  }
 0x421   :  { %8078 = vmatprep.subr.bf16.mxu1 %v8899_v12 }
 0x423   :  { %8187 = vmatpush3.bf16.msra.mxu0 %v8898_v44 }
 0x424   :  { %8079 = vmatpush3.bf16.msra.mxu1 %v8900_v10  ;;  %8188 = vmatprep.subr.bf16.mxu0 %v8901_v19  ;;  %v8930_v19 = vld [vmem:[#allocation13 + $0x8a8] sm:$0xff]  }
 0x425   :  { %8080 = vmatprep.subr.bf16.mxu1 %v8903_v13  ;;  %v8932_v13 = vld [vmem:[#allocation13 + $0x620] sm:$0xff]  }
 0x427   :  { %8189 = vmatpush3.bf16.msra.mxu0 %v8902_v55 }
 0x428   :  { %8081 = vmatpush3.bf16.msra.mxu1 %v8904_v52  ;;  %8190 = vmatprep.subr.bf16.mxu0 %v8905_v43  ;;  %v8935_v52 = vld [vmem:[#allocation13 + $0x658] sm:$0xff]  }
 0x429   :  { %8082 = vmatprep.subr.bf16.mxu1 %v8907_v41  ;;  %v8933_v41 = vld [vmem:[#allocation13 + $0x8e0] sm:$0xff]   ;;  %v8936_v43 = vld [vmem:[#allocation13 + $0x618] sm:$0xff]  }
 0x42b   :  { %8191 = vmatpush3.bf16.msra.mxu0 %v8906_v30  ;;  %v8939_v30 = vld [vmem:[#allocation13 + $0x650] sm:$0xff]  }
 0x42c   :  { %8083 = vmatpush3.bf16.msra.mxu1 %v8908_v29  ;;  %8192 = vmatprep.subr.bf16.mxu0 %v8909_v31  ;;  %v8934_v29 = vld [vmem:[#allocation13 + $0x8a0] sm:$0xff]   ;;  %v8940_v31 = vld [vmem:[#allocation13 + $0x610] sm:$0xff]  }
 0x42d   :  { %8084 = vmatprep.subr.bf16.mxu1 %v8911_v24  ;;  %v8937_v24 = vld [vmem:[#allocation13 + $0x8d8] sm:$0xff]  }
 0x42f   :  { %8193 = vmatpush3.bf16.msra.mxu0 %v8910_v36  ;;  %v8943_v36 = vld [vmem:[#allocation13 + $0x648] sm:$0xff]  }
 0x430   :  { %8085 = vmatpush3.bf16.msra.mxu1 %v8912_v33  ;;  %8194 = vmatprep.subr.bf16.mxu0 %v8913_v63  ;;  %v8938_v33 = vld [vmem:[#allocation13 + $0x898] sm:$0xff]   ;;  %v8944_v63 = vld [vmem:[#allocation13 + $0x608] sm:$0xff]  }
 0x431   :  { %8086 = vmatprep.subr.bf16.mxu1 %v8915_v0  ;;  %v8941_v0 = vld [vmem:[#allocation13 + $0x8d0] sm:$0xff]  }
 0x433   :  { %8195 = vmatpush3.bf16.msra.mxu0 %v8914_v49  ;;  %v8947_v49 = vld [vmem:[#allocation13 + $0x640] sm:$0xff]  }
 0x434   :  { %8087 = vmatpush3.bf16.msra.mxu1 %v8916_v45  ;;  %8196 = vmatprep.subr.bf16.mxu0 %v8917_v50  ;;  %v8942_v45 = vld [vmem:[#allocation13 + $0x890] sm:$0xff]   ;;  %v8948_v50 = vld [vmem:[#allocation13 + $0x600] sm:$0xff]  }
 0x435   :  { %8116 = vmatprep.subr.bf16.mxu1 %v8919_v54  ;;  %v8945_v54 = vld [vmem:[#allocation13 + $0x8c8] sm:$0xff]  }
 0x437   :  { %6288 = vmatmul.mubr.bf16.vlgmr.msra.gmra.mxu1 %v1708_v3  ;;  %v7868_v23 = vpop.f32.mrf.mxu1  ;;  %8197 = vmatpush3.bf16.msra.mxu0 %v8918_v11  ;;  %v8951_v11 = vld [vmem:[#allocation13 + $0x778] sm:$0xff]   ;;  %v8949_v3 = vld [vmem:[#allocation13 + $0x8c0] sm:$0xff]  }
 0x438   :  { %8117 = vmatpush3.bf16.msra.mxu1 %v8920_v58  ;;  %6367 = vmatprep.mubr.bf16.mxu1 %v1713_v4  ;;  %v8946_v58 = vld [vmem:[#allocation13 + $0x888] sm:$0xff]   ;;  %v8950_v4 = vld [vmem:[#allocation13 + $0x880] sm:$0xff]  }
 0x439   :  { %v7869_v6 = vpop.f32.mrf.mxu1  ;;  %8118 = vmatprep.subr.bf16.mxu1 %v8923_v61  ;;  %8226 = vmatprep.subr.bf16.mxu0 %v8921_v7  ;;  %v8952_v61 = vld [vmem:[#allocation13 + $0x738] sm:$0xff]   ;;  %v8955_v7 = vld [vmem:[#allocation13 + $0x770] sm:$0xff]  }
 0x43a   :  { %v10096_v26 = vadd.f32 %v7869_v6, %v7868_v23  ;;  %6488 = vmatmul.mubr.bf16.vlgmr.msra.gmra.mxu0 %v1718_v9  ;;  %v7934_v14 = vpop.f32.mrf.mxu0  ;;  %v1717_v23 = vpack.c.bf16 %v9997_v53, %v9997_v53  ;;  %v7311_v6 = vld [vmem:[#allocation14] ss:$0 sm:$0xff]  ;;  %v1473_v9 = vcombine.high %v10015_v34, %v10015_v34 }
 0x43b   :  { %v7871_v28 = vpop.f32.mrf.mxu1  ;;  %8227 = vmatpush3.bf16.msra.mxu0 %v8922_v46  ;;  %6567 = vmatprep.mubr.bf16.mxu0 %v1723_v17 }
 0x43c   :  { %8119 = vmatpush3.bf16.msra.mxu1 %v8924_v32  ;;  %v7935_v12 = vpop.f32.mrf.mxu0  ;;  %8228 = vmatprep.subr.bf16.mxu0 %v8925_v20  ;;  %v8953_v32 = vld [vmem:[#allocation13 + $0x9f8] sm:$0xff]   ;;  %v8956_v20 = vld [vmem:[#allocation13 + $0x730] sm:$0xff]   ;;  %v5890_v17 = vadd.f32 %v10096_v26, %v7311_v6  ;;  %v1722_v28 = vpack.c.bf16 %v1470_v42, %v1470_v42  ;;  %v8961_v26 = vld [vmem:[#allocation13 + $0x9e8] sm:$0xff]   ;;  %v1716_v6 = vpack.c.bf16 %v9905_v1, %v9905_v1 }
 0x43d   :  { %v7872_v8 = vpop.f32.mrf.mxu1  ;;  %8120 = vmatprep.subr.bf16.mxu1 %v8927_v47  ;;  %v10098_v10 = vadd.f32 %v7935_v12, %v7934_v14  ;;  %v8954_v47 = vld [vmem:[#allocation13 + $0x9b8] sm:$0xff]   ;;  %v8957_v14 = vld [vmem:[#allocation13 + $0x9f0] sm:$0xff]  }
 0x43e   :  { %v7937_v44 = vpop.f32.mrf.mxu0  ;;  %v1727_v8 = vpack.c.bf16 %v1473_v9, %v1473_v9  ;;  %v8984_v42 = vld [vmem:[#allocation13 + $0x838] sm:$0xff]   ;;  %v1721_v9 = vpack.c.bf16 %v10004_v15, %v10004_v15  ;;  %v8989_v15 = vld [vmem:[#allocation13 + $0xaf0] sm:$0xff]  }
 0x43f   :  { %8229 = vmatpush3.bf16.msra.mxu0 %v8926_v37 }
 0x440   :  { %8121 = vmatpush3.bf16.msra.mxu1 %v8928_v48  ;;  %v7938_v55 = vpop.f32.mrf.mxu0  ;;  %8230 = vmatprep.subr.bf16.mxu0 %v8929_v40  ;;  %v8959_v48 = vld [vmem:[#allocation13 + $0x768] sm:$0xff]  }
 0x441   :  { %8122 = vmatprep.subr.bf16.mxu1 %v8931_v60  ;;  %v8960_v40 = vld [vmem:[#allocation13 + $0x728] sm:$0xff]  }
 0x443   :  { %8231 = vmatpush3.bf16.msra.mxu0 %v8930_v19  ;;  %v8963_v19 = vld [vmem:[#allocation13 + $0x760] sm:$0xff]  }
 0x444   :  { %8123 = vmatpush3.bf16.msra.mxu1 %v8932_v13  ;;  %8232 = vmatprep.subr.bf16.mxu0 %v8933_v41  ;;  %v8958_v13 = vld [vmem:[#allocation13 + $0x9b0] sm:$0xff]  }
 0x445   :  { %8124 = vmatprep.subr.bf16.mxu1 %v8935_v52 }
 0x447   :  { %8233 = vmatpush3.bf16.msra.mxu0 %v8934_v29  ;;  %v8962_v29 = vld [vmem:[#allocation13 + $0x9a8] sm:$0xff]  }
 0x448   :  { %8125 = vmatpush3.bf16.msra.mxu1 %v8936_v43  ;;  %8234 = vmatprep.subr.bf16.mxu0 %v8937_v24  ;;  %v8964_v43 = vld [vmem:[#allocation13 + $0x720] sm:$0xff]  }
 0x449   :  { %8126 = vmatprep.subr.bf16.mxu1 %v8939_v30  ;;  %v8967_v30 = vld [vmem:[#allocation13 + $0x758] sm:$0xff]  }
 0x44b   :  { %8235 = vmatpush3.bf16.msra.mxu0 %v8938_v33  ;;  %v8968_v33 = vld [vmem:[#allocation13 + $0x718] sm:$0xff]  }
 0x44c   :  { %8127 = vmatpush3.bf16.msra.mxu1 %v8940_v31  ;;  %8236 = vmatprep.subr.bf16.mxu0 %v8941_v0  ;;  %v8965_v31 = vld [vmem:[#allocation13 + $0x9e0] sm:$0xff]   ;;  %v8971_v0 = vld [vmem:[#allocation13 + $0x750] sm:$0xff]  }
 0x44d   :  { %8128 = vmatprep.subr.bf16.mxu1 %v8943_v36  ;;  %v8966_v36 = vld [vmem:[#allocation13 + $0x9a0] sm:$0xff]  }
 0x44f   :  { %8237 = vmatpush3.bf16.msra.mxu0 %v8942_v45  ;;  %v8972_v45 = vld [vmem:[#allocation13 + $0x710] sm:$0xff]  }
 0x450   :  { %8129 = vmatpush3.bf16.msra.mxu1 %v8944_v63  ;;  %8238 = vmatprep.subr.bf16.mxu0 %v8945_v54  ;;  %v8969_v63 = vld [vmem:[#allocation13 + $0x9d8] sm:$0xff]   ;;  %v8975_v54 = vld [vmem:[#allocation13 + $0x748] sm:$0xff]  }
 0x451   :  { %8130 = vmatprep.subr.bf16.mxu1 %v8947_v49  ;;  %v8970_v49 = vld [vmem:[#allocation13 + $0x998] sm:$0xff]  }
 0x453   :  { %8239 = vmatpush3.bf16.msra.mxu0 %v8946_v58  ;;  %v8976_v58 = vld [vmem:[#allocation13 + $0x708] sm:$0xff]  }
 0x454   :  { %8131 = vmatpush3.bf16.msra.mxu1 %v8948_v50  ;;  %8240 = vmatprep.subr.bf16.mxu0 %v8949_v3  ;;  %v8973_v50 = vld [vmem:[#allocation13 + $0x9d0] sm:$0xff]   ;;  %v8979_v3 = vld [vmem:[#allocation13 + $0x740] sm:$0xff]  }
 0x455   :  { %8160 = vmatprep.subr.bf16.mxu1 %v8951_v11  ;;  %v8974_v11 = vld [vmem:[#allocation13 + $0x990] sm:$0xff]  }
 0x457   :  { %v7890_v46 = vpop.f32.mrf.mxu1  ;;  %6368 = vmatmul.mubr.bf16.vlgmr.msra.gmra.mxu1 %v1712_v5  ;;  %8241 = vmatpush3.bf16.msra.mxu0 %v8950_v4  ;;  %v8980_v4 = vld [vmem:[#allocation13 + $0x700] sm:$0xff]   ;;  %v8978_v5 = vld [vmem:[#allocation13 + $0x988] sm:$0xff]  }
 0x458   :  { %8161 = vmatpush3.bf16.msra.mxu1 %v8952_v61  ;;  %6447 = vmatprep.mubr.bf16.mxu1 %v1717_v23  ;;  %v8977_v61 = vld [vmem:[#allocation13 + $0x9c8] sm:$0xff]   ;;  %v8981_v23 = vld [vmem:[#allocation13 + $0x9c0] sm:$0xff]  }
 0x459   :  { %v7891_v57 = vpop.f32.mrf.mxu1  ;;  %8162 = vmatprep.subr.bf16.mxu1 %v8955_v7  ;;  %8270 = vmatprep.subr.bf16.mxu0 %v8953_v32  ;;  %v8983_v7 = vld [vmem:[#allocation13 + $0x878] sm:$0xff]   ;;  %v8982_v32 = vld [vmem:[#allocation13 + $0x980] sm:$0xff]  }
 0x45a   :  { %v7892_v53 = vadd.f32 %v7891_v57, %v7890_v46  ;;  %v7978_v12 = vpop.f32.mrf.mxu0  ;;  %6568 = vmatmul.mubr.bf16.vlgmr.msra.gmra.mxu0 %v1722_v28  ;;  %v8987_v46 = vld [vmem:[#allocation13 + $0x870] sm:$0xff]   ;;  %v8985_v57 = vld [vmem:[#allocation13 + $0xaf8] sm:$0xff]  }
 0x45b   :  { %v7893_v37 = vpop.f32.mrf.mxu1  ;;  %8271 = vmatpush3.bf16.msra.mxu0 %v8954_v47  ;;  %6647 = vmatprep.mubr.bf16.mxu0 %v1727_v8  ;;  %v8986_v28 = vld [vmem:[#allocation13 + $0xab8] sm:$0xff]   ;;  %v8991_v8 = vld [vmem:[#allocation13 + $0x868] sm:$0xff]  }
 0x45c   :  { %v10109_v60 = vadd.f32 %v7892_v53, %v5890_v17  ;;  %8163 = vmatpush3.bf16.msra.mxu1 %v8956_v20  ;;  %v7979_v52 = vpop.f32.mrf.mxu0  ;;  %8272 = vmatprep.subr.bf16.mxu0 %v8957_v14  ;;  %v1471_v20 = vcombine.high %v9925_v39, %v9925_v39  ;;  %v1522_v17 = vcombine.high %v10023_v59, %v10023_v59  ;;  %v8988_v53 = vld [vmem:[#allocation13 + $0x830] sm:$0xff]  }
 0x45d   :  { %v7894_v44 = vpop.f32.mrf.mxu1  ;;  %8164 = vmatprep.subr.bf16.mxu1 %v8959_v48  ;;  %v10111_v55 = vadd.f32 %v7979_v52, %v7978_v12  ;;  %v8990_v52 = vld [vmem:[#allocation13 + $0xab0] sm:$0xff]  }
 0x45e   :  { %v7981_v41 = vpop.f32.mrf.mxu0  ;;  %v1726_v48 = vpack.c.bf16 %v1471_v20, %v1471_v20  ;;  %v1731_v37 = vpack.c.bf16 %v1522_v17, %v1522_v17  ;;  %v9019_v20 = vld [vmem:[#allocation13 + $0x970] sm:$0xff]   ;;  %v9017_v17 = vld [vmem:[#allocation13 + $0xbf8] sm:$0xff]  }
 0x45f   :  { %8273 = vmatpush3.bf16.msra.mxu0 %v8958_v13  ;;  %v8992_v13 = vld [vmem:[#allocation13 + $0x828] sm:$0xff]  }
 0x460   :  { %8165 = vmatpush3.bf16.msra.mxu1 %v8960_v40  ;;  %v7982_v24 = vpop.f32.mrf.mxu0  ;;  %8274 = vmatprep.subr.bf16.mxu0 %v8961_v26  ;;  %v8995_v26 = vld [vmem:[#allocation13 + $0x860] sm:$0xff]  }
 0x461   :  { %8166 = vmatprep.subr.bf16.mxu1 %v8963_v19 }
 0x463   :  { %8275 = vmatpush3.bf16.msra.mxu0 %v8962_v29 }
 0x464   :  { %8167 = vmatpush3.bf16.msra.mxu1 %v8964_v43  ;;  %8276 = vmatprep.subr.bf16.mxu0 %v8965_v31  ;;  %v8993_v43 = vld [vmem:[#allocation13 + $0xae8] sm:$0xff]  }
 0x465   :  { %8168 = vmatprep.subr.bf16.mxu1 %v8967_v30  ;;  %v8994_v31 = vld [vmem:[#allocation13 + $0xaa8] sm:$0xff]  }
 0x467   :  { %8277 = vmatpush3.bf16.msra.mxu0 %v8966_v36 }
 0x468   :  { %8169 = vmatpush3.bf16.msra.mxu1 %v8968_v33  ;;  %8278 = vmatprep.subr.bf16.mxu0 %v8969_v63  ;;  %v8999_v33 = vld [vmem:[#allocation13 + $0x858] sm:$0xff]  }
 0x469   :  { %8170 = vmatprep.subr.bf16.mxu1 %v8971_v0  ;;  %v8997_v0 = vld [vmem:[#allocation13 + $0xae0] sm:$0xff]   ;;  %v9000_v63 = vld [vmem:[#allocation13 + $0x818] sm:$0xff]  }
 0x46b   :  { %8279 = vmatpush3.bf16.msra.mxu0 %v8970_v49  ;;  %v9003_v49 = vld [vmem:[#allocation13 + $0x850] sm:$0xff]  }
 0x46c   :  { %8171 = vmatpush3.bf16.msra.mxu1 %v8972_v45  ;;  %8280 = vmatprep.subr.bf16.mxu0 %v8973_v50  ;;  %v8998_v45 = vld [vmem:[#allocation13 + $0xaa0] sm:$0xff]   ;;  %v9002_v50 = vld [vmem:[#allocation13 + $0xa98] sm:$0xff]  }
 0x46d   :  { %8172 = vmatprep.subr.bf16.mxu1 %v8975_v54  ;;  %v9004_v54 = vld [vmem:[#allocation13 + $0x810] sm:$0xff]  }
 0x46f   :  { %8281 = vmatpush3.bf16.msra.mxu0 %v8974_v11  ;;  %v9005_v11 = vld [vmem:[#allocation13 + $0xad0] sm:$0xff]  }
 0x470   :  { %8173 = vmatpush3.bf16.msra.mxu1 %v8976_v58  ;;  %8282 = vmatprep.subr.bf16.mxu0 %v8977_v61  ;;  %v9007_v58 = vld [vmem:[#allocation13 + $0x848] sm:$0xff]   ;;  %v9006_v61 = vld [vmem:[#allocation13 + $0xa90] sm:$0xff]  }
 0x471   :  { %8174 = vmatprep.subr.bf16.mxu1 %v8979_v3  ;;  %v9008_v3 = vld [vmem:[#allocation13 + $0x808] sm:$0xff]  }
 0x473   :  { %8283 = vmatpush3.bf16.msra.mxu0 %v8978_v5  ;;  %v9009_v5 = vld [vmem:[#allocation13 + $0xac8] sm:$0xff]  }
 0x474   :  { %8175 = vmatpush3.bf16.msra.mxu1 %v8980_v4  ;;  %8284 = vmatprep.subr.bf16.mxu0 %v8981_v23  ;;  %v9011_v4 = vld [vmem:[#allocation13 + $0x840] sm:$0xff]   ;;  %v9010_v23 = vld [vmem:[#allocation13 + $0xa88] sm:$0xff]  }
 0x475   :  { %8204 = vmatprep.subr.bf16.mxu1 %v8983_v7  ;;  %v9012_v7 = vld [vmem:[#allocation13 + $0x800] sm:$0xff]  }
 0x477   :  { %v7912_v47 = vpop.f32.mrf.mxu1  ;;  %6448 = vmatmul.mubr.bf16.vlgmr.msra.gmra.mxu1 %v1716_v6  ;;  %8285 = vmatpush3.bf16.msra.mxu0 %v8982_v32  ;;  %v9013_v32 = vld [vmem:[#allocation13 + $0xac0] sm:$0xff]   ;;  %v9016_v6 = vld [vmem:[#allocation13 + $0x938] sm:$0xff]  }
 0x478   :  { %8205 = vmatpush3.bf16.msra.mxu1 %v8984_v42  ;;  %6527 = vmatprep.mubr.bf16.mxu1 %v1721_v9  ;;  %v9015_v42 = vld [vmem:[#allocation13 + $0x978] sm:$0xff]   ;;  %v1720_v9 = vpack.c.bf16 %v9921_v25, %v9921_v25 }
 0x479   :  { %v7913_v1 = vpop.f32.mrf.mxu1  ;;  %8206 = vmatprep.subr.bf16.mxu1 %v8987_v46  ;;  %8314 = vmatprep.subr.bf16.mxu0 %v8985_v57  ;;  %v9014_v46 = vld [vmem:[#allocation13 + $0xa80] sm:$0xff]   ;;  %v1725_v57 = vpack.c.bf16 %v10015_v34, %v10015_v34  ;;  %v9021_v34 = vld [vmem:[#allocation13 + $0xbf0] sm:$0xff]  }
 0x47a   :  { %v7914_v14 = vadd.f32 %v7913_v1, %v7912_v47  ;;  %v8022_v44 = vpop.f32.mrf.mxu0  ;;  %6648 = vmatmul.mubr.bf16.vlgmr.msra.gmra.mxu0 %v1726_v48  ;;  %v1520_v47 = vcombine.high %v9940_v62, %v9940_v62  ;;  %v1523_v1 = vcombine.high %v10026_v27, %v10026_v27 }
 0x47b   :  { %v7915_v12 = vpop.f32.mrf.mxu1  ;;  %8315 = vmatpush3.bf16.msra.mxu0 %v8986_v28  ;;  %6727 = vmatprep.mubr.bf16.mxu0 %v1731_v37  ;;  %v9020_v28 = vld [vmem:[#allocation13 + $0x930] sm:$0xff]  }
 0x47c   :  { %v5970_v40 = vadd.f32 %v7914_v14, %v10109_v60  ;;  %8207 = vmatpush3.bf16.msra.mxu1 %v8988_v53  ;;  %v8023_v41 = vpop.f32.mrf.mxu0  ;;  %8316 = vmatprep.subr.bf16.mxu0 %v8989_v15  ;;  %v8996_v60 = vld [vmem:[#allocation13 + $0x820] sm:$0xff]   ;;  %v9018_v14 = vld [vmem:[#allocation13 + $0xbb8] sm:$0xff]   ;;  %v1730_v15 = vpack.c.bf16 %v1520_v47, %v1520_v47  ;;  %v1735_v37 = vpack.c.bf16 %v1523_v1, %v1523_v1 }
 0x47d   :  { %v7916_v19 = vpop.f32.mrf.mxu1  ;;  %8208 = vmatprep.subr.bf16.mxu1 %v8991_v8  ;;  %v10125_v30 = vadd.f32 %v8023_v41, %v8022_v44  ;;  %v9023_v8 = vld [vmem:[#allocation13 + $0x968] sm:$0xff]   ;;  %v1521_v47 = vcombine.high %v9944_v2, %v9944_v2  ;;  %v1572_v1 = vcombine.high %v10039_v35, %v10039_v35 }
 0x47e   :  { %v10123_v29 = vadd.f32 %v10098_v10, %v5970_v40  ;;  %v8025_v24 = vpop.f32.mrf.mxu0  ;;  %v9001_v10 = vld [vmem:[#allocation13 + $0xad8] sm:$0xff]  }
 0x47f   :  { %8317 = vmatpush3.bf16.msra.mxu0 %v8990_v52  ;;  %v9022_v52 = vld [vmem:[#allocation13 + $0xbb0] sm:$0xff]  }
 0x480   :  { %8209 = vmatpush3.bf16.msra.mxu1 %v8992_v13  ;;  %v8026_v36 = vpop.f32.mrf.mxu0  ;;  %8318 = vmatprep.subr.bf16.mxu0 %v8993_v43  ;;  %v9024_v13 = vld [vmem:[#allocation13 + $0x928] sm:$0xff]  }
 0x481   :  { %8210 = vmatprep.subr.bf16.mxu1 %v8995_v26  ;;  %v9027_v26 = vld [vmem:[#allocation13 + $0x960] sm:$0xff]   ;;  %v9025_v43 = vld [vmem:[#allocation13 + $0xbe8] sm:$0xff]   ;;  %v9031_v36 = vld [vmem:[#allocation13 + $0x958] sm:$0xff]  }
 0x483   :  { %8319 = vmatpush3.bf16.msra.mxu0 %v8994_v31 }
 0x484   :  { %8211 = vmatpush3.bf16.msra.mxu1 %v8996_v60  ;;  %8320 = vmatprep.subr.bf16.mxu0 %v8997_v0 }
 0x485   :  { %8212 = vmatprep.subr.bf16.mxu1 %v8999_v33  ;;  %v9026_v33 = vld [vmem:[#allocation13 + $0xba8] sm:$0xff]  }
 0x487   :  { %8321 = vmatpush3.bf16.msra.mxu0 %v8998_v45  ;;  %v9032_v45 = vld [vmem:[#allocation13 + $0x918] sm:$0xff]  }
 0x488   :  { %8213 = vmatpush3.bf16.msra.mxu1 %v9000_v63  ;;  %8322 = vmatprep.subr.bf16.mxu0 %v9001_v10  ;;  %v9029_v63 = vld [vmem:[#allocation13 + $0xbe0] sm:$0xff]   ;;  %v9035_v10 = vld [vmem:[#allocation13 + $0x950] sm:$0xff]  }
 0x489   :  { %8214 = vmatprep.subr.bf16.mxu1 %v9003_v49  ;;  %v9030_v49 = vld [vmem:[#allocation13 + $0xba0] sm:$0xff]  }
 0x48b   :  { %8323 = vmatpush3.bf16.msra.mxu0 %v9002_v50  ;;  %v9034_v50 = vld [vmem:[#allocation13 + $0xb98] sm:$0xff]  }
 0x48c   :  { %8215 = vmatpush3.bf16.msra.mxu1 %v9004_v54  ;;  %8324 = vmatprep.subr.bf16.mxu0 %v9005_v11  ;;  %v9036_v54 = vld [vmem:[#allocation13 + $0x910] sm:$0xff]  }
 0x48d   :  { %8216 = vmatprep.subr.bf16.mxu1 %v9007_v58  ;;  %v9039_v58 = vld [vmem:[#allocation13 + $0x948] sm:$0xff]   ;;  %v9037_v11 = vld [vmem:[#allocation13 + $0xbd0] sm:$0xff]  }
 0x48f   :  { %8325 = vmatpush3.bf16.msra.mxu0 %v9006_v61  ;;  %v9038_v61 = vld [vmem:[#allocation13 + $0xb90] sm:$0xff]  }
 0x490   :  { %8217 = vmatpush3.bf16.msra.mxu1 %v9008_v3  ;;  %8326 = vmatprep.subr.bf16.mxu0 %v9009_v5  ;;  %v9040_v3 = vld [vmem:[#allocation13 + $0x908] sm:$0xff]  }
 0x491   :  { %8218 = vmatprep.subr.bf16.mxu1 %v9011_v4  ;;  %v9043_v4 = vld [vmem:[#allocation13 + $0x940] sm:$0xff]   ;;  %v9041_v5 = vld [vmem:[#allocation13 + $0xbc8] sm:$0xff]  }
 0x493   :  { %8327 = vmatpush3.bf16.msra.mxu0 %v9010_v23  ;;  %v9042_v23 = vld [vmem:[#allocation13 + $0xb88] sm:$0xff]  }
 0x494   :  { %8219 = vmatpush3.bf16.msra.mxu1 %v9012_v7  ;;  %8328 = vmatprep.subr.bf16.mxu0 %v9013_v32  ;;  %v9044_v7 = vld [vmem:[#allocation13 + $0x900] sm:$0xff]  }
 0x495   :  { %8248 = vmatprep.subr.bf16.mxu1 %v9015_v42  ;;  %v9047_v42 = vld [vmem:[#allocation13 + $0xa78] sm:$0xff]   ;;  %v9045_v32 = vld [vmem:[#allocation13 + $0xbc0] sm:$0xff]  }
 0x497   :  { %v7956_v53 = vpop.f32.mrf.mxu1  ;;  %6528 = vmatmul.mubr.bf16.vlgmr.msra.gmra.mxu1 %v1720_v9  ;;  %8329 = vmatpush3.bf16.msra.mxu0 %v9014_v46  ;;  %v9046_v46 = vld [vmem:[#allocation13 + $0xb80] sm:$0xff]   ;;  %v1724_v9 = vpack.c.bf16 %v9925_v39, %v9925_v39 }
 0x498   :  { %8249 = vmatpush3.bf16.msra.mxu1 %v9016_v6  ;;  %6607 = vmatprep.mubr.bf16.mxu1 %v1725_v57  ;;  %v9048_v6 = vld [vmem:[#allocation13 + $0xa38] sm:$0xff]   ;;  %v1729_v57 = vpack.c.bf16 %v10023_v59, %v10023_v59  ;;  %v9053_v59 = vld [vmem:[#allocation13 + $0xcf0] sm:$0xff]  }
 0x499   :  { %v7957_v25 = vpop.f32.mrf.mxu1  ;;  %8250 = vmatprep.subr.bf16.mxu1 %v9019_v20  ;;  %8358 = vmatprep.subr.bf16.mxu0 %v9017_v17  ;;  %v9051_v20 = vld [vmem:[#allocation13 + $0xa70] sm:$0xff]   ;;  %v9049_v17 = vld [vmem:[#allocation13 + $0xcf8] sm:$0xff]  }
 0x49a   :  { %v7958_v48 = vadd.f32 %v7957_v25, %v7956_v53  ;;  %v8066_v44 = vpop.f32.mrf.mxu0  ;;  %6728 = vmatmul.mubr.bf16.vlgmr.msra.gmra.mxu0 %v1730_v15  ;;  %v9050_v25 = vld [vmem:[#allocation13 + $0xcb8] sm:$0xff]   ;;  %v9055_v15 = vld [vmem:[#allocation13 + $0xa68] sm:$0xff]  }
 0x49b   :  { %v7959_v12 = vpop.f32.mrf.mxu1  ;;  %8359 = vmatpush3.bf16.msra.mxu0 %v9018_v14  ;;  %6807 = vmatprep.mubr.bf16.mxu0 %v1735_v37 }
 0x49c   :  { %v6050_v40 = vadd.f32 %v7958_v48, %v10123_v29  ;;  %8251 = vmatpush3.bf16.msra.mxu1 %v9020_v28  ;;  %v8067_v41 = vpop.f32.mrf.mxu0  ;;  %8360 = vmatprep.subr.bf16.mxu0 %v9021_v34  ;;  %v9028_v29 = vld [vmem:[#allocation13 + $0x920] sm:$0xff]   ;;  %v9052_v28 = vld [vmem:[#allocation13 + $0xa30] sm:$0xff]   ;;  %v1734_v48 = vpack.c.bf16 %v1521_v47, %v1521_v47  ;;  %v1739_v34 = vpack.c.bf16 %v1572_v1, %v1572_v1  ;;  %v9082_v1 = vld [vmem:[#allocation13 + $0xdb8] sm:$0xff]  }
 0x49d   :  { %v7960_v19 = vpop.f32.mrf.mxu1  ;;  %8252 = vmatprep.subr.bf16.mxu1 %v9023_v8  ;;  %v10139_v60 = vadd.f32 %v8067_v41, %v8066_v44 }
 0x49e   :  { %v10137_v24 = vadd.f32 %v10111_v55, %v6050_v40  ;;  %v8069_v31 = vpop.f32.mrf.mxu0  ;;  %v9033_v55 = vld [vmem:[#allocation13 + $0xbd8] sm:$0xff]   ;;  %v9056_v40 = vld [vmem:[#allocation13 + $0xa28] sm:$0xff]   ;;  %v9059_v19 = vld [vmem:[#allocation13 + $0xa60] sm:$0xff]  }
 0x49f   :  { %8361 = vmatpush3.bf16.msra.mxu0 %v9022_v52 }
 0x4a0   :  { %8253 = vmatpush3.bf16.msra.mxu1 %v9024_v13  ;;  %v8070_v0 = vpop.f32.mrf.mxu0  ;;  %8362 = vmatprep.subr.bf16.mxu0 %v9025_v43  ;;  %v9054_v13 = vld [vmem:[#allocation13 + $0xcb0] sm:$0xff]  }
 0x4a1   :  { %8254 = vmatprep.subr.bf16.mxu1 %v9027_v26  ;;  %v9057_v26 = vld [vmem:[#allocation13 + $0xce8] sm:$0xff]   ;;  %v9061_v0 = vld [vmem:[#allocation13 + $0xce0] sm:$0xff]  }
 0x4a3   :  { %8363 = vmatpush3.bf16.msra.mxu0 %v9026_v33  ;;  %v9063_v33 = vld [vmem:[#allocation13 + $0xa58] sm:$0xff]  }
 0x4a4   :  { %8255 = vmatpush3.bf16.msra.mxu1 %v9028_v29  ;;  %8364 = vmatprep.subr.bf16.mxu0 %v9029_v63  ;;  %v9058_v29 = vld [vmem:[#allocation13 + $0xca8] sm:$0xff]   ;;  %v9064_v63 = vld [vmem:[#allocation13 + $0xa18] sm:$0xff]  }
 0x4a5   :  { %8256 = vmatprep.subr.bf16.mxu1 %v9031_v36 }
 0x4a7   :  { %8365 = vmatpush3.bf16.msra.mxu0 %v9030_v49  ;;  %v9067_v49 = vld [vmem:[#allocation13 + $0xa50] sm:$0xff]  }
 0x4a8   :  { %8257 = vmatpush3.bf16.msra.mxu1 %v9032_v45  ;;  %8366 = vmatprep.subr.bf16.mxu0 %v9033_v55  ;;  %v9062_v45 = vld [vmem:[#allocation13 + $0xca0] sm:$0xff]   ;;  %v9066_v55 = vld [vmem:[#allocation13 + $0xc98] sm:$0xff]  }
 0x4a9   :  { %8258 = vmatprep.subr.bf16.mxu1 %v9035_v10  ;;  %v9068_v10 = vld [vmem:[#allocation13 + $0xa10] sm:$0xff]  }
 0x4ab   :  { %8367 = vmatpush3.bf16.msra.mxu0 %v9034_v50  ;;  %v9069_v50 = vld [vmem:[#allocation13 + $0xcd0] sm:$0xff]  }
 0x4ac   :  { %8259 = vmatpush3.bf16.msra.mxu1 %v9036_v54  ;;  %8368 = vmatprep.subr.bf16.mxu0 %v9037_v11  ;;  %v9071_v54 = vld [vmem:[#allocation13 + $0xa48] sm:$0xff]   ;;  %v9070_v11 = vld [vmem:[#allocation13 + $0xc90] sm:$0xff]  }
 0x4ad   :  { %8260 = vmatprep.subr.bf16.mxu1 %v9039_v58  ;;  %v9072_v58 = vld [vmem:[#allocation13 + $0xa08] sm:$0xff]  }
 0x4af   :  { %8369 = vmatpush3.bf16.msra.mxu0 %v9038_v61  ;;  %v9073_v61 = vld [vmem:[#allocation13 + $0xcc8] sm:$0xff]  }
 0x4b0   :  { %8261 = vmatpush3.bf16.msra.mxu1 %v9040_v3  ;;  %8370 = vmatprep.subr.bf16.mxu0 %v9041_v5  ;;  %v9075_v3 = vld [vmem:[#allocation13 + $0xa40] sm:$0xff]   ;;  %v9074_v5 = vld [vmem:[#allocation13 + $0xc88] sm:$0xff]  }
 0x4b1   :  { %8262 = vmatprep.subr.bf16.mxu1 %v9043_v4  ;;  %v9076_v4 = vld [vmem:[#allocation13 + $0xa00] sm:$0xff]  }
 0x4b3   :  { %8371 = vmatpush3.bf16.msra.mxu0 %v9042_v23  ;;  %v9077_v23 = vld [vmem:[#allocation13 + $0xcc0] sm:$0xff]  }
 0x4b4   :  { %8263 = vmatpush3.bf16.msra.mxu1 %v9044_v7  ;;  %8372 = vmatprep.subr.bf16.mxu0 %v9045_v32  ;;  %v9079_v7 = vld [vmem:[#allocation13 + $0xb78] sm:$0xff]   ;;  %v9078_v32 = vld [vmem:[#allocation13 + $0xc80] sm:$0xff]  }
 0x4b5   :  { %8292 = vmatprep.subr.bf16.mxu1 %v9047_v42  ;;  %v9080_v42 = vld [vmem:[#allocation13 + $0xb38] sm:$0xff]  }
 0x4b7   :  { %v8000_v53 = vpop.f32.mrf.mxu1  ;;  %6608 = vmatmul.mubr.bf16.vlgmr.msra.gmra.mxu1 %v1724_v9  ;;  %8373 = vmatpush3.bf16.msra.mxu0 %v9046_v46  ;;  %v9083_v46 = vld [vmem:[#allocation13 + $0xb70] sm:$0xff]   ;;  %v1733_v9 = vpack.c.bf16 %v10026_v27, %v10026_v27 }
 0x4b8   :  { %8293 = vmatpush3.bf16.msra.mxu1 %v9048_v6  ;;  %6687 = vmatprep.mubr.bf16.mxu1 %v1729_v57  ;;  %v1728_v6 = vpack.c.bf16 %v9940_v62, %v9940_v62  ;;  %v9081_v57 = vld [vmem:[#allocation13 + $0xdf8] sm:$0xff]   ;;  %v9085_v27 = vld [vmem:[#allocation13 + $0xdf0] sm:$0xff]  }
 0x4b9   :  { %v8001_v39 = vpop.f32.mrf.mxu1  ;;  %8294 = vmatprep.subr.bf16.mxu1 %v9051_v20  ;;  %8402 = vmatprep.subr.bf16.mxu0 %v9049_v17  ;;  %v1570_v20 = vcombine.high %v9966_v56, %v9966_v56  ;;  %v1573_v17 = vcombine.high %v10044_v38, %v10044_v38 }
 0x4ba   :  { %v8002_v14 = vadd.f32 %v8001_v39, %v8000_v53  ;;  %v8110_v12 = vpop.f32.mrf.mxu0  ;;  %6808 = vmatmul.mubr.bf16.vlgmr.msra.gmra.mxu0 %v1734_v48  ;;  %v9084_v53 = vld [vmem:[#allocation13 + $0xb30] sm:$0xff]  }
 0x4bb   :  { %v8003_v8 = vpop.f32.mrf.mxu1  ;;  %8403 = vmatpush3.bf16.msra.mxu0 %v9050_v25  ;;  %6887 = vmatprep.mubr.bf16.mxu0 %v1739_v34  ;;  %v1738_v39 = vpack.c.bf16 %v1570_v20, %v1570_v20  ;;  %v9087_v25 = vld [vmem:[#allocation13 + $0xb68] sm:$0xff]   ;;  %v9116_v20 = vld [vmem:[#allocation13 + $0xc30] sm:$0xff]  }
 0x4bc   :  { %v6130_v37 = vadd.f32 %v8002_v14, %v10137_v24  ;;  %8295 = vmatpush3.bf16.msra.mxu1 %v9052_v28  ;;  %v8111_v52 = vpop.f32.mrf.mxu0  ;;  %8404 = vmatprep.subr.bf16.mxu0 %v9053_v59  ;;  %v9060_v24 = vld [vmem:[#allocation13 + $0xa20] sm:$0xff]   ;;  %v1743_v14 = vpack.c.bf16 %v1573_v17, %v1573_v17  ;;  %v9088_v34 = vld [vmem:[#allocation13 + $0xb28] sm:$0xff]  }
 0x4bd   :  { %v8004_v44 = vpop.f32.mrf.mxu1  ;;  %8296 = vmatprep.subr.bf16.mxu1 %v9055_v15  ;;  %v10153_v43 = vadd.f32 %v8111_v52, %v8110_v12  ;;  %v9091_v12 = vld [vmem:[#allocation13 + $0xb60] sm:$0xff]  }
 0x4be   :  { %v10151_v41 = vadd.f32 %v10125_v30, %v6130_v37  ;;  %v8113_v31 = vpop.f32.mrf.mxu0  ;;  %v9065_v30 = vld [vmem:[#allocation13 + $0xcd8] sm:$0xff]   ;;  %v9086_v37 = vld [vmem:[#allocation13 + $0xdb0] sm:$0xff]   ;;  %v9089_v44 = vld [vmem:[#allocation13 + $0xde8] sm:$0xff]  }
 0x4bf   :  { %8405 = vmatpush3.bf16.msra.mxu0 %v9054_v13  ;;  %v9095_v31 = vld [vmem:[#allocation13 + $0xb58] sm:$0xff]  }
 0x4c0   :  { %8297 = vmatpush3.bf16.msra.mxu1 %v9056_v40  ;;  %v8114_v36 = vpop.f32.mrf.mxu0  ;;  %8406 = vmatprep.subr.bf16.mxu0 %v9057_v26  ;;  %v9092_v26 = vld [vmem:[#allocation13 + $0xb20] sm:$0xff]  }
 0x4c1   :  { %8298 = vmatprep.subr.bf16.mxu1 %v9059_v19  ;;  %v9094_v36 = vld [vmem:[#allocation13 + $0xda0] sm:$0xff]  }
 0x4c3   :  { %8407 = vmatpush3.bf16.msra.mxu0 %v9058_v29  ;;  %v9093_v29 = vld [vmem:[#allocation13 + $0xde0] sm:$0xff]  }
 0x4c4   :  { %8299 = vmatpush3.bf16.msra.mxu1 %v9060_v24  ;;  %8408 = vmatprep.subr.bf16.mxu0 %v9061_v0  ;;  %v9099_v0 = vld [vmem:[#allocation13 + $0xb50] sm:$0xff]  }
 0x4c5   :  { %8300 = vmatprep.subr.bf16.mxu1 %v9063_v33  ;;  %v9096_v33 = vld [vmem:[#allocation13 + $0xb18] sm:$0xff]  }
 0x4c7   :  { %8409 = vmatpush3.bf16.msra.mxu0 %v9062_v45  ;;  %v9098_v45 = vld [vmem:[#allocation13 + $0xd98] sm:$0xff]  }
 0x4c8   :  { %8301 = vmatpush3.bf16.msra.mxu1 %v9064_v63  ;;  %8410 = vmatprep.subr.bf16.mxu0 %v9065_v30  ;;  %v9100_v63 = vld [vmem:[#allocation13 + $0xb10] sm:$0xff]  }
 0x4c9   :  { %8302 = vmatprep.subr.bf16.mxu1 %v9067_v49  ;;  %v9103_v49 = vld [vmem:[#allocation13 + $0xb48] sm:$0xff]   ;;  %v9101_v30 = vld [vmem:[#allocation13 + $0xdd0] sm:$0xff]  }
 0x4cb   :  { %8411 = vmatpush3.bf16.msra.mxu0 %v9066_v55  ;;  %v9102_v55 = vld [vmem:[#allocation13 + $0xd90] sm:$0xff]  }
 0x4cc   :  { %8303 = vmatpush3.bf16.msra.mxu1 %v9068_v10  ;;  %8412 = vmatprep.subr.bf16.mxu0 %v9069_v50  ;;  %v9104_v10 = vld [vmem:[#allocation13 + $0xb08] sm:$0xff]  }
 0x4cd   :  { %8304 = vmatprep.subr.bf16.mxu1 %v9071_v54  ;;  %v9107_v54 = vld [vmem:[#allocation13 + $0xb40] sm:$0xff]   ;;  %v9105_v50 = vld [vmem:[#allocation13 + $0xdc8] sm:$0xff]  }
 0x4cf   :  { %8413 = vmatpush3.bf16.msra.mxu0 %v9070_v11  ;;  %v9106_v11 = vld [vmem:[#allocation13 + $0xd88] sm:$0xff]  }
 0x4d0   :  { %8305 = vmatpush3.bf16.msra.mxu1 %v9072_v58  ;;  %8414 = vmatprep.subr.bf16.mxu0 %v9073_v61  ;;  %v9108_v58 = vld [vmem:[#allocation13 + $0xb00] sm:$0xff]  }
 0x4d1   :  { %8306 = vmatprep.subr.bf16.mxu1 %v9075_v3  ;;  %v9111_v3 = vld [vmem:[#allocation13 + $0xc78] sm:$0xff]   ;;  %v9109_v61 = vld [vmem:[#allocation13 + $0xdc0] sm:$0xff]  }
 0x4d3   :  { %8415 = vmatpush3.bf16.msra.mxu0 %v9074_v5  ;;  %v9110_v5 = vld [vmem:[#allocation13 + $0xd80] sm:$0xff]  }
 0x4d4   :  { %8307 = vmatpush3.bf16.msra.mxu1 %v9076_v4  ;;  %8416 = vmatprep.subr.bf16.mxu0 %v9077_v23  ;;  %v9112_v4 = vld [vmem:[#allocation13 + $0xc38] sm:$0xff]   ;;  %v9115_v23 = vld [vmem:[#allocation13 + $0xc70] sm:$0xff]  }
 0x4d5   :  { %8336 = vmatprep.subr.bf16.mxu1 %v9079_v7  ;;  %v1732_v7 = vpack.c.bf16 %v9944_v2, %v9944_v2 }
 0x4d7   :  { %v8044_v47 = vpop.f32.mrf.mxu1  ;;  %6688 = vmatmul.mubr.bf16.vlgmr.msra.gmra.mxu1 %v1728_v6  ;;  %8417 = vmatpush3.bf16.msra.mxu0 %v9078_v32  ;;  %v1571_v32 = vcombine.high %v9970_v51, %v9970_v51  ;;  %v9113_v6 = vld [vmem:[#allocation13 + $0xef8] sm:$0xff]  }
 0x4d8   :  { %8337 = vmatpush3.bf16.msra.mxu1 %v9080_v42  ;;  %6767 = vmatprep.mubr.bf16.mxu1 %v1733_v9  ;;  %v1737_v42 = vpack.c.bf16 %v10039_v35, %v10039_v35  ;;  %v1622_v9 = vcombine.high %v10047_v16, %v10047_v16  ;;  %v9117_v35 = vld [vmem:[#allocation13 + $0xef0] sm:$0xff]  }
 0x4d9   :  { %v8045_v62 = vpop.f32.mrf.mxu1  ;;  %8338 = vmatprep.subr.bf16.mxu1 %v9083_v46  ;;  %8446 = vmatprep.subr.bf16.mxu0 %v9081_v57  ;;  %v9114_v57 = vld [vmem:[#allocation13 + $0xeb8] sm:$0xff]   ;;  %v1742_v17 = vpack.c.bf16 %v1571_v32, %v1571_v32 }
 0x4da   :  { %v8046_v28 = vadd.f32 %v8045_v62, %v8044_v47  ;;  %v8154_v15 = vpop.f32.mrf.mxu0  ;;  %6888 = vmatmul.mubr.bf16.vlgmr.msra.gmra.mxu0 %v1738_v39  ;;  %v1747_v62 = vpack.c.bf16 %v1622_v9, %v1622_v9 }
 0x4db   :  { %v8047_v48 = vpop.f32.mrf.mxu1  ;;  %8447 = vmatpush3.bf16.msra.mxu0 %v9082_v1  ;;  %6967 = vmatprep.mubr.bf16.mxu0 %v1743_v14  ;;  %v9118_v14 = vld [vmem:[#allocation13 + $0xeb0] sm:$0xff]  }
 0x4dc   :  { %v6210_v59 = vadd.f32 %v8046_v28, %v10151_v41  ;;  %8339 = vmatpush3.bf16.msra.mxu1 %v9084_v53  ;;  %v8155_v40 = vpop.f32.mrf.mxu0  ;;  %8448 = vmatprep.subr.bf16.mxu0 %v9085_v27  ;;  %v9090_v41 = vld [vmem:[#allocation13 + $0xda8] sm:$0xff]   ;;  %v9123_v48 = vld [vmem:[#allocation13 + $0xc60] sm:$0xff]  }
 0x4dd   :  { %v8048_v8 = vpop.f32.mrf.mxu1  ;;  %8340 = vmatprep.subr.bf16.mxu1 %v9087_v25  ;;  %v10167_v19 = vadd.f32 %v8155_v40, %v8154_v15  ;;  %v9119_v53 = vld [vmem:[#allocation13 + $0xc68] sm:$0xff]  }
 0x4de   :  { %v10165_v13 = vadd.f32 %v10139_v60, %v6210_v59  ;;  %v8157_v52 = vpop.f32.mrf.mxu0  ;;  %v9097_v60 = vld [vmem:[#allocation13 + $0xdd8] sm:$0xff]   ;;  %v9120_v27 = vld [vmem:[#allocation13 + $0xc28] sm:$0xff]  }
 0x4df   :  { %8449 = vmatpush3.bf16.msra.mxu0 %v9086_v37  ;;  %v9121_v15 = vld [vmem:[#allocation13 + $0xee8] sm:$0xff]   ;;  %v9125_v52 = vld [vmem:[#allocation13 + $0xee0] sm:$0xff]  }
 0x4e0   :  { %8341 = vmatpush3.bf16.msra.mxu1 %v9088_v34  ;;  %v8158_v24 = vpop.f32.mrf.mxu0  ;;  %8450 = vmatprep.subr.bf16.mxu0 %v9089_v44  ;;  %v9122_v40 = vld [vmem:[#allocation13 + $0xea8] sm:$0xff]   ;;  %v9127_v44 = vld [vmem:[#allocation13 + $0xc58] sm:$0xff]  }
 0x4e1   :  { %8342 = vmatprep.subr.bf16.mxu1 %v9091_v12  ;;  %v9124_v12 = vld [vmem:[#allocation13 + $0xc20] sm:$0xff]   ;;  %v9132_v24 = vld [vmem:[#allocation13 + $0xc10] sm:$0xff]  }
 0x4e3   :  { %8451 = vmatpush3.bf16.msra.mxu0 %v9090_v41  ;;  %v9126_v41 = vld [vmem:[#allocation13 + $0xea0] sm:$0xff]  }
 0x4e4   :  { %8343 = vmatpush3.bf16.msra.mxu1 %v9092_v26  ;;  %8452 = vmatprep.subr.bf16.mxu0 %v9093_v29  ;;  %v9128_v26 = vld [vmem:[#allocation13 + $0xc18] sm:$0xff]  }
 0x4e5   :  { %8344 = vmatprep.subr.bf16.mxu1 %v9095_v31  ;;  %v9131_v31 = vld [vmem:[#allocation13 + $0xc50] sm:$0xff]   ;;  %v9130_v29 = vld [vmem:[#allocation13 + $0xe98] sm:$0xff]  }
 0x4e7   :  { %8453 = vmatpush3.bf16.msra.mxu0 %v9094_v36  ;;  %v9133_v36 = vld [vmem:[#allocation13 + $0xed0] sm:$0xff]  }
 0x4e8   :  { %8345 = vmatpush3.bf16.msra.mxu1 %v9096_v33  ;;  %8454 = vmatprep.subr.bf16.mxu0 %v9097_v60  ;;  %v9135_v33 = vld [vmem:[#allocation13 + $0xc48] sm:$0xff]   ;;  %v9134_v60 = vld [vmem:[#allocation13 + $0xe90] sm:$0xff]  }
 0x4e9   :  { %8346 = vmatprep.subr.bf16.mxu1 %v9099_v0  ;;  %v9136_v0 = vld [vmem:[#allocation13 + $0xc08] sm:$0xff]  }
 0x4eb   :  { %8455 = vmatpush3.bf16.msra.mxu0 %v9098_v45  ;;  %v9137_v45 = vld [vmem:[#allocation13 + $0xec8] sm:$0xff]  }
 0x4ec   :  { %8347 = vmatpush3.bf16.msra.mxu1 %v9100_v63  ;;  %8456 = vmatprep.subr.bf16.mxu0 %v9101_v30  ;;  %v9139_v63 = vld [vmem:[#allocation13 + $0xc40] sm:$0xff]   ;;  %v9138_v30 = vld [vmem:[#allocation13 + $0xe88] sm:$0xff]  }
 0x4ed   :  { %8348 = vmatprep.subr.bf16.mxu1 %v9103_v49  ;;  %v9140_v49 = vld [vmem:[#allocation13 + $0xc00] sm:$0xff]  }
 0x4ef   :  { %8457 = vmatpush3.bf16.msra.mxu0 %v9102_v55  ;;  %v9141_v55 = vld [vmem:[#allocation13 + $0xec0] sm:$0xff]  }
 0x4f0   :  { %8349 = vmatpush3.bf16.msra.mxu1 %v9104_v10  ;;  %8458 = vmatprep.subr.bf16.mxu0 %v9105_v50  ;;  %v9143_v10 = vld [vmem:[#allocation13 + $0xd78] sm:$0xff]   ;;  %v9142_v50 = vld [vmem:[#allocation13 + $0xe80] sm:$0xff]  }
 0x4f1   :  { %8350 = vmatprep.subr.bf16.mxu1 %v9107_v54  ;;  %v9144_v54 = vld [vmem:[#allocation13 + $0xd38] sm:$0xff]  }
 0x4f3   :  { %8459 = vmatpush3.bf16.msra.mxu0 %v9106_v11  ;;  %v9147_v11 = vld [vmem:[#allocation13 + $0xd70] sm:$0xff]  }
 0x4f4   :  { %8351 = vmatpush3.bf16.msra.mxu1 %v9108_v58  ;;  %8460 = vmatprep.subr.bf16.mxu0 %v9109_v61  ;;  %v1736_v58 = vpack.c.bf16 %v9966_v56, %v9966_v56  ;;  %v1620_v61 = vcombine.high %v9988_v21, %v9988_v21 }
 0x4f5   :  { %8380 = vmatprep.subr.bf16.mxu1 %v9111_v3  ;;  %v1741_v3 = vpack.c.bf16 %v10044_v38, %v10044_v38  ;;  %v9149_v38 = vld [vmem:[#allocation13 + $0xff0] sm:$0xff]  }
 0x4f7   :  { %v8088_v46 = vpop.f32.mrf.mxu1  ;;  %6768 = vmatmul.mubr.bf16.vlgmr.msra.gmra.mxu1 %v1732_v7  ;;  %8461 = vmatpush3.bf16.msra.mxu0 %v9110_v5  ;;  %v1623_v7 = vcombine.high %v10050_v18, %v10050_v18 }
 0x4f8   :  { %8381 = vmatpush3.bf16.msra.mxu1 %v9112_v4  ;;  %6847 = vmatprep.mubr.bf16.mxu1 %v1737_v42  ;;  %v9145_v4 = vld [vmem:[#allocation13 + $0xff8] sm:$0xff]  }
 0x4f9   :  { %v8089_v2 = vpop.f32.mrf.mxu1  ;;  %8382 = vmatprep.subr.bf16.mxu1 %v9115_v23  ;;  %8490 = vmatprep.subr.bf16.mxu0 %v9113_v6  ;;  %v9148_v23 = vld [vmem:[#allocation13 + $0xd30] sm:$0xff]   ;;  %v9146_v42 = vld [vmem:[#allocation13 + $0xfb8] sm:$0xff]   ;;  %v1746_v6 = vpack.c.bf16 %v1620_v61, %v1620_v61  ;;  %v1751_v9 = vpack.c.bf16 %v1623_v7, %v1623_v7 }
 0x4fa   :  { %v8090_v47 = vadd.f32 %v8089_v2, %v8088_v46  ;;  %v8198_v39 = vpop.f32.mrf.mxu0  ;;  %6968 = vmatmul.mubr.bf16.vlgmr.msra.gmra.mxu0 %v1742_v17  ;;  %v9151_v46 = vld [vmem:[#allocation13 + $0xd68] sm:$0xff]  }
 0x4fb   :  { %v8091_v1 = vpop.f32.mrf.mxu1  ;;  %8491 = vmatpush3.bf16.msra.mxu0 %v9114_v57  ;;  %7047 = vmatprep.mubr.bf16.mxu0 %v1747_v62 }
 0x4fc   :  { %v6290_v28 = vadd.f32 %v8090_v47, %v10165_v13  ;;  %8383 = vmatpush3.bf16.msra.mxu1 %v9116_v20  ;;  %v8199_v59 = vpop.f32.mrf.mxu0  ;;  %8492 = vmatprep.subr.bf16.mxu0 %v9117_v35  ;;  %v9152_v47 = vld [vmem:[#allocation13 + $0xd28] sm:$0xff]   ;;  %v9150_v35 = vld [vmem:[#allocation13 + $0xfb0] sm:$0xff]  }
 0x4fd   :  { %v8092_v25 = vpop.f32.mrf.mxu1  ;;  %8384 = vmatprep.subr.bf16.mxu1 %v9119_v53  ;;  %v10181_v8 = vadd.f32 %v8199_v59, %v8198_v39  ;;  %v9155_v53 = vld [vmem:[#allocation13 + $0xd60] sm:$0xff]   ;;  %v9153_v1 = vld [vmem:[#allocation13 + $0xfe8] sm:$0xff]  }
 0x4fe   :  { %v10179_v34 = vadd.f32 %v10153_v43, %v6290_v28  ;;  %v8201_v37 = vpop.f32.mrf.mxu0  ;;  %v9129_v43 = vld [vmem:[#allocation13 + $0xed8] sm:$0xff]   ;;  %v9156_v25 = vld [vmem:[#allocation13 + $0xd20] sm:$0xff]  }
 0x4ff   :  { %8493 = vmatpush3.bf16.msra.mxu0 %v9118_v14  ;;  %v9154_v14 = vld [vmem:[#allocation13 + $0xfa8] sm:$0xff]   ;;  %v9158_v37 = vld [vmem:[#allocation13 + $0xfa0] sm:$0xff]  }
 0x500   :  { %8385 = vmatpush3.bf16.msra.mxu1 %v9120_v27  ;;  %v8202_v13 = vpop.f32.mrf.mxu0  ;;  %8494 = vmatprep.subr.bf16.mxu0 %v9121_v15  ;;  %v9157_v15 = vld [vmem:[#allocation13 + $0xfe0] sm:$0xff]  }
 0x501   :  { %8386 = vmatprep.subr.bf16.mxu1 %v9123_v48  ;;  %v9159_v48 = vld [vmem:[#allocation13 + $0xd58] sm:$0xff]   ;;  %v9167_v13 = vld [vmem:[#allocation13 + $0xd48] sm:$0xff]  }
 0x503   :  { %8495 = vmatpush3.bf16.msra.mxu0 %v9122_v40  ;;  %v9164_v40 = vld [vmem:[#allocation13 + $0xd10] sm:$0xff]  }
 0x504   :  { %8387 = vmatpush3.bf16.msra.mxu1 %v9124_v12  ;;  %8496 = vmatprep.subr.bf16.mxu0 %v9125_v52  ;;  %v9163_v12 = vld [vmem:[#allocation13 + $0xd50] sm:$0xff]  }
 0x505   :  { %8388 = vmatprep.subr.bf16.mxu1 %v9127_v44  ;;  %v9162_v44 = vld [vmem:[#allocation13 + $0xf98] sm:$0xff]   ;;  %v9165_v52 = vld [vmem:[#allocation13 + $0xfd0] sm:$0xff]  }
 0x507   :  { %8497 = vmatpush3.bf16.msra.mxu0 %v9126_v41  ;;  %v9166_v41 = vld [vmem:[#allocation13 + $0xf90] sm:$0xff]  }
 0x508   :  { %8389 = vmatpush3.bf16.msra.mxu1 %v9128_v26  ;;  %8498 = vmatprep.subr.bf16.mxu0 %v9129_v43  ;;  %v9168_v26 = vld [vmem:[#allocation13 + $0xd08] sm:$0xff]  }
 0x509   :  { %8390 = vmatprep.subr.bf16.mxu1 %v9131_v31  ;;  %v9171_v31 = vld [vmem:[#allocation13 + $0xd40] sm:$0xff]   ;;  %v9169_v43 = vld [vmem:[#allocation13 + $0xfc8] sm:$0xff]  }
 0x50b   :  { %8499 = vmatpush3.bf16.msra.mxu0 %v9130_v29  ;;  %v9170_v29 = vld [vmem:[#allocation13 + $0xf88] sm:$0xff]  }
 0x50c   :  { %8391 = vmatpush3.bf16.msra.mxu1 %v9132_v24  ;;  %8500 = vmatprep.subr.bf16.mxu0 %v9133_v36  ;;  %v9172_v24 = vld [vmem:[#allocation13 + $0xd00] sm:$0xff]  }
 0x50d   :  { %8392 = vmatprep.subr.bf16.mxu1 %v9135_v33  ;;  %v9175_v33 = vld [vmem:[#allocation13 + $0xe78] sm:$0xff]   ;;  %v9173_v36 = vld [vmem:[#allocation13 + $0xfc0] sm:$0xff]  }
 0x50f   :  { %8501 = vmatpush3.bf16.msra.mxu0 %v9134_v60  ;;  %v9174_v60 = vld [vmem:[#allocation13 + $0xf80] sm:$0xff]  }
 0x510   :  { %8393 = vmatpush3.bf16.msra.mxu1 %v9136_v0  ;;  %8502 = vmatprep.subr.bf16.mxu0 %v9137_v45  ;;  %v9176_v0 = vld [vmem:[#allocation13 + $0xe38] sm:$0xff]   ;;  %v9177_v45 = vld [vmem:[#allocation13 + $0xe70] sm:$0xff]  }
 0x511   :  { %8394 = vmatprep.subr.bf16.mxu1 %v9139_v63  ;;  %v1740_v63 = vpack.c.bf16 %v9970_v51, %v9970_v51 }
 0x513   :  { %8503 = vmatpush3.bf16.msra.mxu0 %v9138_v30  ;;  %v1621_v30 = vcombine.high %v9992_v22, %v9992_v22 }
 0x514   :  { %8395 = vmatpush3.bf16.msra.mxu1 %v9140_v49  ;;  %8504 = vmatprep.subr.bf16.mxu0 %v9141_v55  ;;  %v1745_v49 = vpack.c.bf16 %v10047_v16, %v10047_v16  ;;  %v9178_v55 = vld [vmem:[#allocation13 + $0xe30] sm:$0xff]   ;;  %v9180_v16 = vld [vmem:[#allocation13 + $0xe28] sm:$0xff]  }
 0x515   :  { %8424 = vmatprep.subr.bf16.mxu1 %v9143_v10  ;;  %v1750_v51 = vpack.c.bf16 %v1621_v30, %v1621_v30 }
 0x517   :  { %v8132_v5 = vpop.f32.mrf.mxu1  ;;  %6848 = vmatmul.mubr.bf16.vlgmr.msra.gmra.mxu1 %v1736_v58  ;;  %8505 = vmatpush3.bf16.msra.mxu0 %v9142_v50  ;;  %v9179_v50 = vld [vmem:[#allocation13 + $0xe68] sm:$0xff]  }
 0x518   :  { %8425 = vmatpush3.bf16.msra.mxu1 %v9144_v54  ;;  %6927 = vmatprep.mubr.bf16.mxu1 %v1741_v3 }
 0x519   :  { %v8133_v56 = vpop.f32.mrf.mxu1  ;;  %8426 = vmatprep.subr.bf16.mxu1 %v9147_v11  ;;  %8534 = vmatprep.subr.bf16.mxu0 %v9145_v4 }
 0x51a   :  { %v8134_v32 = vadd.f32 %v8133_v56, %v8132_v5  ;;  %v8242_v57 = vpop.f32.mrf.mxu0  ;;  %7048 = vmatmul.mubr.bf16.vlgmr.msra.gmra.mxu0 %v1746_v6  ;;  %v9181_v5 = vld [vmem:[#allocation13 + $0xe60] sm:$0xff]   ;;  %v9183_v6 = vld [vmem:[#allocation13 + $0xe58] sm:$0xff]  }
 0x51b   :  { %v8135_v20 = vpop.f32.mrf.mxu1  ;;  %8535 = vmatpush3.bf16.msra.mxu0 %v9146_v42  ;;  %7127 = vmatprep.mubr.bf16.mxu0 %v1751_v9  ;;  %v9185_v9 = vld [vmem:[#allocation13 + $0xe50] sm:$0xff]  }
 0x51c   :  { %v6370_v2 = vadd.f32 %v8134_v32, %v10179_v34  ;;  %8427 = vmatpush3.bf16.msra.mxu1 %v9148_v23  ;;  %v8243_v62 = vpop.f32.mrf.mxu0  ;;  %8536 = vmatprep.subr.bf16.mxu0 %v9149_v38  ;;  %v9160_v34 = vld [vmem:[#allocation13 + $0xd18] sm:$0xff]   ;;  %v9182_v32 = vld [vmem:[#allocation13 + $0xe20] sm:$0xff]   ;;  %v9186_v20 = vld [vmem:[#allocation13 + $0xe10] sm:$0xff]  }
 0x51d   :  { %v8136_v17 = vpop.f32.mrf.mxu1  ;;  %8428 = vmatprep.subr.bf16.mxu1 %v9151_v46  ;;  %v10195_v39 = vadd.f32 %v8243_v62, %v8242_v57  ;;  %v9184_v46 = vld [vmem:[#allocation13 + $0xe18] sm:$0xff]   ;;  %v9188_v57 = vld [vmem:[#allocation13 + $0xe08] sm:$0xff]   ;;  %v9193_v62 = vld [vmem:[#allocation13 + $0xf70] sm:$0xff]  }
 0x51e   :  { %v10193_v28 = vadd.f32 %v10167_v19, %v6370_v2  ;;  %v8245_v27 = vpop.f32.mrf.mxu0  ;;  %v9161_v19 = vld [vmem:[#allocation13 + $0xfd8] sm:$0xff]   ;;  %v9187_v2 = vld [vmem:[#allocation13 + $0xe48] sm:$0xff]  }
 0x51f   :  { %8537 = vmatpush3.bf16.msra.mxu0 %v9150_v35  ;;  %v9191_v17 = vld [vmem:[#allocation13 + $0xf78] sm:$0xff]   ;;  %v9194_v27 = vld [vmem:[#allocation13 + $0xf30] sm:$0xff]  }
 0x520   :  { %8429 = vmatpush3.bf16.msra.mxu1 %v9152_v47  ;;  %v8246_v59 = vpop.f32.mrf.mxu0  ;;  %8538 = vmatprep.subr.bf16.mxu0 %v9153_v1  ;;  %v9190_v47 = vld [vmem:[#allocation13 + $0xe00] sm:$0xff]   ;;  %v9192_v35 = vld [vmem:[#allocation13 + $0xf38] sm:$0xff]   ;;  %v1749_v1 = vpack.c.bf16 %v10050_v18, %v10050_v18 }
 0x521   :  { %8430 = vmatprep.subr.bf16.mxu1 %v9155_v53  ;;  %v1744_v53 = vpack.c.bf16 %v9988_v21, %v9988_v21 }
 0x523   :  { %8539 = vmatpush3.bf16.msra.mxu0 %v9154_v14  ;;  %v9195_v14 = vld [vmem:[#allocation13 + $0xf68] sm:$0xff]  }
 0x524   :  { %8431 = vmatpush3.bf16.msra.mxu1 %v9156_v25  ;;  %8540 = vmatprep.subr.bf16.mxu0 %v9157_v15 }
 0x525   :  { %8432 = vmatprep.subr.bf16.mxu1 %v9159_v48 }
 0x527   :  { %8541 = vmatpush3.bf16.msra.mxu0 %v9158_v37  ;;  %v9196_v37 = vld [vmem:[#allocation13 + $0xf28] sm:$0xff]  }
 0x528   :  { %8433 = vmatpush3.bf16.msra.mxu1 %v9160_v34  ;;  %8542 = vmatprep.subr.bf16.mxu0 %v9161_v19 }
 0x529   :  { %8434 = vmatprep.subr.bf16.mxu1 %v9163_v12  ;;  %v9197_v12 = vld [vmem:[#allocation13 + $0xf60] sm:$0xff]  }
 0x52b   :  { %8543 = vmatpush3.bf16.msra.mxu0 %v9162_v44 }
 0x52c   :  { %8435 = vmatpush3.bf16.msra.mxu1 %v9164_v40  ;;  %8544 = vmatprep.subr.bf16.mxu0 %v9165_v52  ;;  %v9199_v52 = vld [vmem:[#allocation13 + $0xf58] sm:$0xff]  }
 0x52d   :  { %8436 = vmatprep.subr.bf16.mxu1 %v9167_v13  ;;  %v9198_v13 = vld [vmem:[#allocation13 + $0xf20] sm:$0xff]  }
 0x52f   :  { %8545 = vmatpush3.bf16.msra.mxu0 %v9166_v41  ;;  %v9200_v41 = vld [vmem:[#allocation13 + $0xf18] sm:$0xff]  }
 0x530   :  { %8437 = vmatpush3.bf16.msra.mxu1 %v9168_v26  ;;  %8546 = vmatprep.subr.bf16.mxu0 %v9169_v43  ;;  %v9202_v43 = vld [vmem:[#allocation13 + $0xf10] sm:$0xff]  }
 0x531   :  { %8438 = vmatprep.subr.bf16.mxu1 %v9171_v31  ;;  %v9201_v31 = vld [vmem:[#allocation13 + $0xf50] sm:$0xff]  }
 0x533   :  { %8547 = vmatpush3.bf16.msra.mxu0 %v9170_v29  ;;  %v9204_v29 = vld [vmem:[#allocation13 + $0xf08] sm:$0xff]  }
 0x534   :  { %8439 = vmatpush3.bf16.msra.mxu1 %v9172_v24  ;;  %8548 = vmatprep.subr.bf16.mxu0 %v9173_v36  ;;  %v9203_v24 = vld [vmem:[#allocation13 + $0xf48] sm:$0xff]   ;;  %v1748_v36 = vpack.c.bf16 %v9992_v22, %v9992_v22 }
 0x535   :  { %8468 = vmatprep.subr.bf16.mxu1 %v9175_v33  ;;  %v9205_v33 = vld [vmem:[#allocation13 + $0xf40] sm:$0xff]  }
 0x537   :  { %v8176_v10 = vpop.f32.mrf.mxu1  ;;  %6928 = vmatmul.mubr.bf16.vlgmr.msra.gmra.mxu1 %v1740_v63  ;;  %8549 = vmatpush3.bf16.msra.mxu0 %v9174_v60 }
 0x538   :  { %8469 = vmatpush3.bf16.msra.mxu1 %v9176_v0  ;;  %7007 = vmatprep.mubr.bf16.mxu1 %v1745_v49 }
 0x539   :  { %v8177_v54 = vpop.f32.mrf.mxu1  ;;  %8470 = vmatprep.subr.bf16.mxu1 %v9177_v45 }
 0x53a   :  { %v8178_v58 = vadd.f32 %v8177_v54, %v8176_v10  ;;  %v8286_v61 = vpop.f32.mrf.mxu0  ;;  %7128 = vmatmul.mubr.bf16.vlgmr.msra.gmra.mxu0 %v1750_v51 }
 0x53b   :  { %v8179_v11 = vpop.f32.mrf.mxu1 }
 0x53c   :  { %v6450_v3 = vadd.f32 %v8178_v58, %v10193_v28  ;;  %8471 = vmatpush3.bf16.msra.mxu1 %v9178_v55  ;;  %v8287_v7 = vpop.f32.mrf.mxu0 }
 0x53d   :  { %v8180_v4 = vpop.f32.mrf.mxu1  ;;  %8472 = vmatprep.subr.bf16.mxu1 %v9179_v50  ;;  %v10205_v56 = vadd.f32 %v8287_v7, %v8286_v61  ;;  %v9207_v7 = vld [vmem:[%s10251_s9 + $0x38] sm:$0xff]  }
 0x53e   :  { %v6490_v23 = vadd.f32 %v10181_v8, %v6450_v3  ;;  %v8289_v42 = vpop.f32.mrf.mxu0  ;;  %v9189_v8 = vld [vmem:[#allocation13 + $0xe40] sm:$0xff]  }
 0x540   :  { %8473 = vmatpush3.bf16.msra.mxu1 %v9180_v16  ;;  %v8290_v38 = vpop.f32.mrf.mxu0 }
 0x541   :  { %8474 = vmatprep.subr.bf16.mxu1 %v9181_v5 }
 0x544   :  { %8475 = vmatpush3.bf16.msra.mxu1 %v9182_v32  ;;  %v9440_v32 = vmov 0.0  }
 0x545   :  { %8476 = vmatprep.subr.bf16.mxu1 %v9183_v6 }
 0x548   :  { %8477 = vmatpush3.bf16.msra.mxu1 %v9184_v46 }
 0x549   :  { %8478 = vmatprep.subr.bf16.mxu1 %v9185_v9  ;;  %v9209_v9 = vld [vmem:[%s10251_s9 + $0x28] sm:$0xff]  }
 0x54c   :  { %8479 = vmatpush3.bf16.msra.mxu1 %v9186_v20  ;;  %v9210_v20 = vld [vmem:[%s10251_s9 + $0x20] sm:$0xff]  }
 0x54d   :  { %8480 = vmatprep.subr.bf16.mxu1 %v9187_v2  ;;  %v9211_v2 = vld [vmem:[%s10251_s9 + $0x18] sm:$0xff]  }
 0x550   :  { %8481 = vmatpush3.bf16.msra.mxu1 %v9188_v57 }
 0x551   :  { %8482 = vmatprep.subr.bf16.mxu1 %v9189_v8 }
 0x554   :  { %8483 = vmatpush3.bf16.msra.mxu1 %v9190_v47 }
 0x555   :  { %8512 = vmatprep.subr.bf16.mxu1 %v9191_v17 }
 0x557   :  { %v8220_v28 = vpop.f32.mrf.mxu1  ;;  %7008 = vmatmul.mubr.bf16.vlgmr.msra.gmra.mxu1 %v1744_v53 }
 0x558   :  { %8513 = vmatpush3.bf16.msra.mxu1 %v9192_v35  ;;  %7087 = vmatprep.mubr.bf16.mxu1 %v1749_v1 }
 0x559   :  { %v8221_v25 = vpop.f32.mrf.mxu1  ;;  %8514 = vmatprep.subr.bf16.mxu1 %v9193_v62 }
 0x55a   :  { %v8222_v48 = vadd.f32 %v8221_v25, %v8220_v28  ;;  %v8330_v34 = vpop.f32.mrf.mxu0 }
 0x55b   :  { %v8223_v59 = vpop.f32.mrf.mxu1 }
 0x55c   :  { %v6530_v15 = vadd.f32 %v8222_v48, %v6490_v23  ;;  %8515 = vmatpush3.bf16.msra.mxu1 %v9194_v27  ;;  %v8331_v19 = vpop.f32.mrf.mxu0  ;;  %v9212_v48 = vld [vmem:[%s10251_s9 + $0x10] sm:$0xff]   ;;  %v9213_v59 = vld [vmem:[%s10251_s9 + $0x8] sm:$0xff]  }
 0x55d   :  { %v8224_v21 = vpop.f32.mrf.mxu1  ;;  %8516 = vmatprep.subr.bf16.mxu1 %v9195_v14  ;;  %v8332_v40 = vadd.f32 %v8331_v19, %v8330_v34 }
 0x55e   :  { %v6570_v18 = vadd.f32 %v10195_v39, %v6530_v15  ;;  %v8333_v44 = vpop.f32.mrf.mxu0  ;;  %v9206_v39 = vld [vmem:[#allocation13 + $0xf00] sm:$0xff]  }
 0x55f   :  { %v9214_v15 = vld [vmem:[%s10251_s9] sm:$0xff]  }
 0x560   :  { %8517 = vmatpush3.bf16.msra.mxu1 %v9196_v37  ;;  %v8334_v26 = vpop.f32.mrf.mxu0 }
 0x561   :  { %8518 = vmatprep.subr.bf16.mxu1 %v9197_v12 }
 0x564   :  { %8519 = vmatpush3.bf16.msra.mxu1 %v9198_v13 }
 0x565   :  { %8520 = vmatprep.subr.bf16.mxu1 %v9199_v52 }
 0x568   :  { %8521 = vmatpush3.bf16.msra.mxu1 %v9200_v41 }
 0x569   :  { %8522 = vmatprep.subr.bf16.mxu1 %v9201_v31 }
 0x56c   :  { %8523 = vmatpush3.bf16.msra.mxu1 %v9202_v43 }
 0x56d   :  { %8524 = vmatprep.subr.bf16.mxu1 %v9203_v24 }
 0x570   :  { %8525 = vmatpush3.bf16.msra.mxu1 %v9204_v29 }
 0x571   :  { %8526 = vmatprep.subr.bf16.mxu1 %v9205_v33 }
 0x574   :  { %8527 = vmatpush3.bf16.msra.mxu1 %v9206_v39 }
 0x575   :  { %8603 = vmatprep.subr.bf16.mxu1 %v9440_v32 }
 0x577   :  { %v8264_v0 = vpop.f32.mrf.mxu1  ;;  %7088 = vmatmul.mubr.bf16.vlgmr.msra.gmra.mxu1 %v1748_v36 }
 0x578   :  { %8604 = vmatpush3.bf16.msra.mxu1 %v9207_v7  ;;  %8619 = vmatprep.mubr.msk.bf16.mxu1 %vm9441_vm9, %v9440_v32 }
 0x579   :  { %v8265_v60 = vpop.f32.mrf.mxu1  ;;  %8605 = vmatprep.subr.bf16.mxu1 %v9440_v32 }
 0x57a   :  { %v8266_v63 = vadd.f32 %v8265_v60, %v8264_v0  ;;  %v8374_v30 = vpop.f32.mrf.mxu0 }
 0x57b   :  { %v8267_v45 = vpop.f32.mrf.mxu1 }
 0x57c   :  { %v6610_v49 = vadd.f32 %v8266_v63, %v6570_v18  ;;  %v8375_v55 = vpop.f32.mrf.mxu0 }
 0x57d   :  { %v8268_v10 = vpop.f32.mrf.mxu1  ;;  %v8376_v50 = vadd.f32 %v8375_v55, %v8374_v30 }
 0x57e   :  { %v6650_v54 = vadd.f32 %v10205_v56, %v6610_v49  ;;  %v8377_v58 = vpop.f32.mrf.mxu0  ;;  %v9208_v56 = vld [vmem:[%s10251_s9 + $0x30] sm:$0xff]   ;;  %s9442_s9 = smov [#allocation17]  }
 0x57f   :  { %8606 = vmatpush3.bf16.msra.mxu1 %v9208_v56  ;;  %s7256_s3 = sshll.u32 %s9442_s9, 4  ;;  %s7257_s3 = int_to_ptr.vmem [resolvable:$true] %s7256_s3 }
 0x580   :  { %v8378_v51 = vpop.f32.mrf.mxu0  ;;  %8607 = vmatprep.subr.bf16.mxu1 %v9440_v32  ;;  %s9395_s17 = scalar_lea.vmem %s7257_s3, 32  ;;  %p9400_p4 = scmp.lt.s32.totalorder %s7257_s3, %s7257_s3 }
 0x581   :  { %p9396_p3 = scmp.ne.s32.totalorder %s7257_s3, %s9395_s17  ;;  %p9401_p5 = scmp.lt.s32.totalorder %s9395_s17, %s9395_s17 }
 0x583   :  { %8608 = vmatpush3.bf16.msra.mxu1 %v9209_v9  ;;  %p9402_p6 = por %p9401_p5, %p9400_p4 }
 0x584   :  { %8609 = vmatprep.subr.bf16.mxu1 %v9440_v32 }
 0x585   :  { %p9403_p7 = pnand %p9402_p6, %p9396_p3 }
 0x587   :  { %8610 = vmatpush3.bf16.msra.mxu1 %v9210_v20 }
 0x588   :  { %8611 = vmatprep.subr.bf16.mxu1 %v9440_v32 }
 0x58b   :  { %8612 = vmatpush3.bf16.msra.mxu1 %v9211_v2 }
 0x58c   :  { %8613 = vmatprep.subr.bf16.mxu1 %v9440_v32 }
 0x58f   :  { %8614 = vmatpush3.bf16.msra.mxu1 %v9212_v48 }
 0x590   :  { %8615 = vmatprep.subr.bf16.mxu1 %v9440_v32 }
 0x593   :  { %8616 = vmatpush3.bf16.msra.mxu1 %v9213_v59 }
 0x594   :  { %8617 = vmatprep.subr.bf16.mxu1 %v9440_v32 }
 0x597   :  { %v8308_v11 = vpop.f32.mrf.mxu1  ;;  %8618 = vmatpush3.bf16.msra.mxu1 %v9214_v15 }
 0x599   :  { %v8309_v3 = vpop.f32.mrf.mxu1 }
 0x59a   :  { %v8310_v61 = vadd.f32 %v8309_v3, %v8308_v11  ;;  %v8418_v22 = vpop.f32.mrf.mxu0 }
 0x59b   :  { %v8311_v16 = vpop.f32.mrf.mxu1 }
 0x59c   :  { %v6690_v4 = vadd.f32 %v8310_v61, %v6650_v54  ;;  %v8419_v23 = vpop.f32.mrf.mxu0 }
 0x59d   :  { %v8312_v5 = vpop.f32.mrf.mxu1  ;;  %v8420_v6 = vadd.f32 %v8419_v23, %v8418_v22 }
 0x59e   :  { %v6730_v42 = vadd.f32 %v8332_v40, %v6690_v4  ;;  %v8421_v38 = vpop.f32.mrf.mxu0 }
 0x5a0   :  { %v8422_v46 = vpop.f32.mrf.mxu0 }
 0x5b7   :  { %v8352_v57 = vpop.f32.mrf.mxu1 }
 0x5b9   :  { %v8353_v8 = vpop.f32.mrf.mxu1 }
 0x5ba   :  { %v8354_v47 = vadd.f32 %v8353_v8, %v8352_v57  ;;  %v8462_v53 = vpop.f32.mrf.mxu0 }
 0x5bb   :  { %v8355_v17 = vpop.f32.mrf.mxu1 }
 0x5bc   :  { %v6770_v35 = vadd.f32 %v8354_v47, %v6730_v42  ;;  %v8463_v1 = vpop.f32.mrf.mxu0  ;;  %v7824_v42 = vld [vmem:[#allocation16] ss:$0 sm:$0xff] }
 0x5bd   :  { %v8356_v62 = vpop.f32.mrf.mxu1  ;;  %v8464_v27 = vadd.f32 %v8463_v1, %v8462_v53 }
 0x5be   :  { %v6810_v28 = vadd.f32 %v8376_v50, %v6770_v35  ;;  %v8465_v25 = vpop.f32.mrf.mxu0 }
 0x5c0   :  { %v8466_v14 = vpop.f32.mrf.mxu0 }
 0x5d7   :  { %v8396_v34 = vpop.f32.mrf.mxu1 }
 0x5d9   :  { %v8397_v37 = vpop.f32.mrf.mxu1 }
 0x5da   :  { %v8398_v21 = vadd.f32 %v8397_v37, %v8396_v34  ;;  %v8506_v18 = vpop.f32.mrf.mxu0 }
 0x5db   :  { %v8399_v12 = vpop.f32.mrf.mxu1 }
 0x5dc   :  { %v6850_v19 = vadd.f32 %v8398_v21, %v6810_v28  ;;  %v8507_v44 = vpop.f32.mrf.mxu0 }
 0x5dd   :  { %v8400_v40 = vpop.f32.mrf.mxu1  ;;  %v8508_v52 = vadd.f32 %v8507_v44, %v8506_v18 }
 0x5de   :  { %v6890_v13 = vadd.f32 %v8420_v6, %v6850_v19  ;;  %v8509_v26 = vpop.f32.mrf.mxu0 }
 0x5e0   :  { %v8510_v41 = vpop.f32.mrf.mxu0 }
 0x5f7   :  { %v8440_v31 = vpop.f32.mrf.mxu1 }
 0x5f9   :  { %v8441_v43 = vpop.f32.mrf.mxu1 }
 0x5fa   :  { %v8442_v24 = vadd.f32 %v8441_v43, %v8440_v31  ;;  %v8550_v39 = vpop.f32.mrf.mxu0 }
 0x5fb   :  { %v8443_v29 = vpop.f32.mrf.mxu1 }
 0x5fc   :  { %v6930_v33 = vadd.f32 %v8442_v24, %v6890_v13  ;;  %v8551_v0 = vpop.f32.mrf.mxu0 }
 0x5fd   :  { %v8444_v36 = vpop.f32.mrf.mxu1  ;;  %v8552_v16 = vadd.f32 %v8551_v0, %v8550_v39 }
 0x5fe   :  { %v6970_v60 = vadd.f32 %v8464_v27, %v6930_v33  ;;  %v8553_v63 = vpop.f32.mrf.mxu0 }
 0x600   :  { %v8554_v45 = vpop.f32.mrf.mxu0 }
 0x617   :  { %v8484_v49 = vpop.f32.mrf.mxu1 }
 0x619   :  { %v8485_v30 = vpop.f32.mrf.mxu1 }
 0x61a   :  { %v8486_v10 = vadd.f32 %v8485_v30, %v8484_v49 }
 0x61b   :  { %v8487_v55 = vpop.f32.mrf.mxu1 }
 0x61c   :  { %v7010_v54 = vadd.f32 %v8486_v10, %v6970_v60 }
 0x61d   :  { %v8488_v50 = vpop.f32.mrf.mxu1 }
 0x61e   :  { %v7050_v58 = vadd.f32 %v8508_v52, %v7010_v54 }
 0x637   :  { %v8528_v51 = vpop.f32.mrf.mxu1 }
 0x639   :  { %v8529_v11 = vpop.f32.mrf.mxu1 }
 0x63a   :  { %v8530_v3 = vadd.f32 %v8529_v11, %v8528_v51 }
 0x63b   :  { %v8531_v61 = vpop.f32.mrf.mxu1 }
 0x63c   :  { %v7090_v4 = vadd.f32 %v8530_v3, %v7050_v58 }
 0x63d   :  { %v8532_v22 = vpop.f32.mrf.mxu1 }
 0x63e   :  { %v7130_v5 = vadd.f32 %v8552_v16, %v7090_v4 }
 0x640   :  { %v7135_v7 = vmax.f32 %v7130_v5, 0.0 }
 0x642   :  { %v7136_v23 = vpack.c.bf16 %v7135_v7, %v7135_v7 }
 0x644   :  { %8620 = vmatmul.mubr.bf16.vlgmr.msra.gmra.mxu1 %v7136_v23 }
 0x704   :  { %v7242_v32 = vpop.f32.mrf.mxu1 }
 0x705   :  { %v7243_v6 = vadd.f32 %v7824_v42, %v7242_v32 }
 0x706   :  { %v8621_v56 = vpop.f32.mrf.mxu1 }
 0x707   :  { %7249 = vst.msk [vmem:[#allocation17] sm:$0x3] %vm7248_vm10, %v7243_v6 }
 0x708   :  { %v7245_v38 = vpop.f32.mrf.mxu1 }
 0x709   :  { %9406 = shalt.err (!%p9403_p7)
}
 0x70a   :  { %7259 = dma.vmem_to_hbm [thread:$0]  %s7257_s3, 32, %s10253_s11, [#allocation4]   ;;  %v8622_v46 = vpop.f32.mrf.mxu1 }
 0x70b   :  { %9425 = dma.done.wait [#allocation4], 32  }
 0x70c   :  { %9426 = vsyncadd [#allocation4], 4294967264 }
 0x70d   :  { %7263 = vsyncpa [#allocation3], 1 }
 0x70e   :  { %7264 = vsyncpa [#allocation6], 1 }
 0x70f   :  { %7265 = vsyncpa [#allocation9], 1 }
 0x710   :  { %7266 = vsyncpa [#allocation12], 1 }
 0x711   :  { %7267 = vsyncpa [#allocation15], 1 }
 0x712   :  { %7268 = vsyncpa [#allocation4], 1 }

</bundles_post_ra>
